<compile_context>
chip_gen: v5e
topology: v5e:2x2
jax: 0.10.0
libtpu: 0.0.40
codegen_flags: <defaults>
</compile_context>

<pallas_src>
import jax
import jax.numpy as jnp
from jax.experimental import pallas as pl
from jax.experimental.pallas import tpu as pltpu

IN_DIM = 784          # 1 * 28 * 28
HID = 400
LATENT = 20
NUM_CLASSES = 10
TB_TARGET = 256       # batch tile: matches the 256-row MXU on v6e/v7x, fine on v5e too


def _round_up(n, m):
    return -(-n // m) * m


def vae_kernel(x_ref, labels_ref, eps_ref,
               w1_ref, b1_ref,
               wh_ref, bh_ref,
               w2z_ref, w2c_ref, b2_ref,
               w3_ref, b3_ref,
               recon_ref, mu_ref, logvar_ref):
    x = x_ref[...]                                                     # (TB, 784) f32

    # encoder: Linear(784, 400) + ReLU  (bf16 MXU, f32 accumulation)
    h = jnp.dot(x.astype(jnp.bfloat16), w1_ref[...],
                preferred_element_type=jnp.float32) + b1_ref[...]
    h = jnp.maximum(h, 0.0)                                            # (TB, 400) f32

    # fused mu/logvar heads: one (400, 40) matmul, sliced afterwards
    heads = jnp.dot(h.astype(jnp.bfloat16), wh_ref[...],
                    preferred_element_type=jnp.float32) + bh_ref[...]  # (TB, 40)
    mu = heads[:, :LATENT]
    logvar = heads[:, LATENT:]

    # reparameterize: z = mu + eps * exp(0.5 * logvar)   (f32 elementwise)
    z = mu + eps_ref[...] * jnp.exp(0.5 * logvar)                      # (TB, 20)

    # one-hot(labels, 10) in-kernel via iota compare (free VPU work)
    labels = labels_ref[...]                                           # (TB, 1) int32
    classes = jax.lax.broadcasted_iota(jnp.int32,
                                       (labels.shape[0], NUM_CLASSES), 1)
    onehot = (labels == classes).astype(jnp.bfloat16)                  # (TB, 10)

    # decoder layer 1: Linear(latent+10, 400) + ReLU.
    # concat([z, onehot]) @ W2  ==  z @ W2[:latent] + onehot @ W2[latent:]
    d = (jnp.dot(z.astype(jnp.bfloat16), w2z_ref[...],
                 preferred_element_type=jnp.float32)
         + jnp.dot(onehot, w2c_ref[...], preferred_element_type=jnp.float32)
         + b2_ref[...])
    d = jnp.maximum(d, 0.0)                                            # (TB, 400)

    # decoder layer 2: Linear(400, 784) + Sigmoid
    logits = jnp.dot(d.astype(jnp.bfloat16), w3_ref[...],
                     preferred_element_type=jnp.float32) + b3_ref[...]
    recon_ref[...] = jax.nn.sigmoid(logits)                            # (TB, 784)
    mu_ref[...] = mu
    logvar_ref[...] = logvar


def vae_forward(x, labels, eps, params, *, tb=TB_TARGET):
    """x: (B, 1, 28, 28) f32 NCHW; labels: (B,) int; eps: (B, LATENT) f32 (randn noise)."""
    B = x.shape[0]
    x_flat = x.reshape(B, -1).astype(jnp.float32)          # nn.Flatten
    labels2d = labels.astype(jnp.int32).reshape(B, 1)
    eps = eps.astype(jnp.float32)

    # Batch tiling: TB is a multiple of 8 (f32 sublane); pad B up to a multiple of TB.
    TB = min(tb, _round_up(B, 8))
    B_pad = _round_up(B, TB)
    if B_pad != B:
        pad = B_pad - B
        x_flat = jnp.pad(x_flat, ((0, pad), (0, 0)))
        labels2d = jnp.pad(labels2d, ((0, pad), (0, 0)))
        eps = jnp.pad(eps, ((0, pad), (0, 0)))

    grid = (B_pad // TB,)

    def batch_spec(cols):
        return pl.BlockSpec((TB, cols), lambda i: (i, 0))

    def resident(arr):
        # constant index_map -> block is fetched once and stays resident in VMEM
        return pl.BlockSpec(arr.shape, lambda i: (0, 0))

    weight_args = (params["w1"], params["b1"],
                   params["wh"], params["bh"],
                   params["w2z"], params["w2c"], params["b2"],
                   params["w3"], params["b3"])

    in_specs = ([batch_spec(IN_DIM), batch_spec(1), batch_spec(LATENT)]
                + [resident(w) for w in weight_args])
    out_specs = (batch_spec(IN_DIM), batch_spec(LATENT), batch_spec(LATENT))
    out_shape = (jax.ShapeDtypeStruct((B_pad, IN_DIM), jnp.float32),
                 jax.ShapeDtypeStruct((B_pad, LATENT), jnp.float32),
                 jax.ShapeDtypeStruct((B_pad, LATENT), jnp.float32))

    # Advisory cost estimate (helps XLA scheduling around the custom call).
    flops = 2 * B_pad * (IN_DIM * HID + HID * 2 * LATENT
                         + (LATENT + NUM_CLASSES) * HID + HID * IN_DIM)
    transcendentals = B_pad * (LATENT + IN_DIM)            # exp in reparam + sigmoid
    weight_bytes = sum(int(w.size) * w.dtype.itemsize for w in weight_args)
    act_bytes = B_pad * (IN_DIM * 4 + 4 + LATENT * 4       # x, labels, eps in
                         + IN_DIM * 4 + 2 * LATENT * 4)    # recon, mu, logvar out
    cost = pl.CostEstimate(flops=flops, transcendentals=transcendentals,
                           bytes_accessed=weight_bytes + act_bytes)

    recon, mu, logvar = pl.pallas_call(
        vae_kernel,
        grid=grid,
        in_specs=in_specs,
        out_specs=out_specs,
        out_shape=out_shape,
        compiler_params=pltpu.CompilerParams(
            dimension_semantics=("parallel",),             # megacore on v7x
            vmem_limit_bytes=32 << 20),                    # ~8 MB needed; headroom on 64 MB v7x
        cost_estimate=cost,
    )(x_flat, labels2d, eps, *weight_args)

    return recon[:B], mu[:B], logvar[:B]


def init_params(key):
    """PyTorch-default-style init (uniform +/- 1/sqrt(fan_in)); weights stored bf16."""
    def linear(k, fan_in, fan_out):
        kw, kb = jax.random.split(k)
        bound = 1.0 / (fan_in ** 0.5)
        w = jax.random.uniform(kw, (fan_in, fan_out), jnp.float32, -bound, bound)
        b = jax.random.uniform(kb, (1, fan_out), jnp.float32, -bound, bound)
        return w, b

    k = jax.random.split(key, 5)
    w1, b1 = linear(k[0], IN_DIM, HID)
    wmu, bmu = linear(k[1], HID, LATENT)
    wlv, blv = linear(k[2], HID, LATENT)
    w2, b2 = linear(k[3], LATENT + NUM_CLASSES, HID)
    w3, b3 = linear(k[4], HID, IN_DIM)

    wh = jnp.concatenate([wmu, wlv], axis=1)               # fused heads (400, 40)
    bh = jnp.concatenate([bmu, blv], axis=1)               # (1, 40)

    bf16 = lambda w: w.astype(jnp.bfloat16)
    return dict(w1=bf16(w1), b1=b1,
                wh=bf16(wh), bh=bh,
                w2z=bf16(w2[:LATENT]), w2c=bf16(w2[LATENT:]), b2=b2,
                w3=bf16(w3), b3=b3)


def vae_forward_ref(x, labels, eps, params):
    """Pure-JAX f32 reference using the same (bf16-rounded) weights."""
    B = x.shape[0]
    xf = x.reshape(B, -1).astype(jnp.float32)
    f32 = lambda w: w.astype(jnp.float32)
    h = jnp.maximum(xf @ f32(params["w1"]) + params["b1"], 0.0)
    heads = h @ f32(params["wh"]) + params["bh"]
    mu = heads[:, :LATENT]
    logvar = heads[:, LATENT:]
    z = mu + eps * jnp.exp(0.5 * logvar)
    onehot = jax.nn.one_hot(labels, NUM_CLASSES, dtype=jnp.float32)
    d = jnp.maximum(z @ f32(params["w2z"]) + onehot @ f32(params["w2c"])
                    + params["b2"], 0.0)
    recon = jax.nn.sigmoid(d @ f32(params["w3"]) + params["b3"])
    return recon, mu, logvar


if __name__ == "__main__":
    key = jax.random.PRNGKey(0)
    k_param, k_x, k_lbl, k_eps = jax.random.split(key, 4)

    B = 8
    params = init_params(k_param)
    x = jax.random.normal(k_x, (B, 1, 28, 28), jnp.float32)      # NCHW, like PyTorch
    labels = jax.random.randint(k_lbl, (B,), 0, NUM_CLASSES, jnp.int32)
    # eps is the randn_like noise from reparameterize(); generated here so the kernel
    # is deterministic and matches the reference.
    eps = jax.random.normal(k_eps, (B, LATENT), jnp.float32)

    recon, mu, logvar = vae_forward(x, labels, eps, params)
    jax.block_until_ready((recon, mu, logvar))

    r_ref, mu_ref_v, lv_ref_v = vae_forward_ref(x, labels, eps, params)
    assert recon.shape == (B, IN_DIM) and mu.shape == (B, LATENT) and logvar.shape == (B, LATENT)
    # Kernel uses bf16 matmul inputs (f32 accumulation); reference is pure f32,
    # so compare at bf16-appropriate tolerance.
    assert jnp.allclose(recon, r_ref, atol=5e-2, rtol=5e-2)
    assert jnp.allclose(mu, mu_ref_v, atol=5e-2, rtol=5e-2)
    assert jnp.allclose(logvar, lv_ref_v, atol=5e-2, rtol=5e-2)

    print("KERNEL_OK")
</pallas_src>

<mosaic_0001>
module attributes {stable_mosaic.version = 11 : i64} {
  func.func @vae_kernel(%arg0: i32, %arg1: memref<8x784xf32, #tpu.memory_space<vmem>>, %arg2: memref<8x1xi32, #tpu.memory_space<vmem>>, %arg3: memref<8x20xf32, #tpu.memory_space<vmem>>, %arg4: memref<784x400xbf16, #tpu.memory_space<vmem>>, %arg5: memref<1x400xf32, #tpu.memory_space<vmem>>, %arg6: memref<400x40xbf16, #tpu.memory_space<vmem>>, %arg7: memref<1x40xf32, #tpu.memory_space<vmem>>, %arg8: memref<20x400xbf16, #tpu.memory_space<vmem>>, %arg9: memref<10x400xbf16, #tpu.memory_space<vmem>>, %arg10: memref<1x400xf32, #tpu.memory_space<vmem>>, %arg11: memref<400x784xbf16, #tpu.memory_space<vmem>>, %arg12: memref<1x784xf32, #tpu.memory_space<vmem>>, %arg13: memref<8x784xf32, #tpu.memory_space<vmem>>, %arg14: memref<8x20xf32, #tpu.memory_space<vmem>>, %arg15: memref<8x20xf32, #tpu.memory_space<vmem>>) attributes {dimension_semantics = [#tpu.dimension_semantics<parallel>], iteration_bounds = array<i64: 1>, scalar_prefetch = 0 : i64, scratch_operands = 0 : i64, tpu.core_type = #tpu.core_type<tc>, window_params = [{transform_indices = @transform_0, window_bounds = array<i64: 8, 784>}, {transform_indices = @transform_1, window_bounds = array<i64: 8, 1>}, {transform_indices = @transform_2, window_bounds = array<i64: 8, 20>}, {pipeline_mode = #tpu.pipeline_mode<synchronous>, transform_indices = @transform_3, window_bounds = array<i64: 784, 400>}, {pipeline_mode = #tpu.pipeline_mode<synchronous>, transform_indices = @transform_4, window_bounds = array<i64: 1, 400>}, {pipeline_mode = #tpu.pipeline_mode<synchronous>, transform_indices = @transform_5, window_bounds = array<i64: 400, 40>}, {pipeline_mode = #tpu.pipeline_mode<synchronous>, transform_indices = @transform_6, window_bounds = array<i64: 1, 40>}, {pipeline_mode = #tpu.pipeline_mode<synchronous>, transform_indices = @transform_7, window_bounds = array<i64: 20, 400>}, {pipeline_mode = #tpu.pipeline_mode<synchronous>, transform_indices = @transform_8, window_bounds = array<i64: 10, 400>}, {pipeline_mode = #tpu.pipeline_mode<synchronous>, transform_indices = @transform_9, window_bounds = array<i64: 1, 400>}, {pipeline_mode = #tpu.pipeline_mode<synchronous>, transform_indices = @transform_10, window_bounds = array<i64: 400, 784>}, {pipeline_mode = #tpu.pipeline_mode<synchronous>, transform_indices = @transform_11, window_bounds = array<i64: 1, 784>}, {transform_indices = @transform_12, window_bounds = array<i64: 8, 784>}, {transform_indices = @transform_13, window_bounds = array<i64: 8, 20>}, {transform_indices = @transform_14, window_bounds = array<i64: 8, 20>}]} {
    %c0 = arith.constant 0 : index
    %c0_0 = arith.constant 0 : index
    %0 = vector.load %arg1[%c0, %c0_0] : memref<8x784xf32, #tpu.memory_space<vmem>>, vector<8x784xf32>
    %1 = arith.truncf %0 : vector<8x784xf32> to vector<8x784xbf16>
    %c0_1 = arith.constant 0 : index
    %c0_2 = arith.constant 0 : index
    %2 = vector.load %arg4[%c0_1, %c0_2] : memref<784x400xbf16, #tpu.memory_space<vmem>>, vector<784x400xbf16>
    %cst = arith.constant dense<0.000000e+00> : vector<8x400xf32>
    %3 = tpu.matmul %1, %2, %cst {dimension_numbers = #tpu.dot_dimension_numbers<[1], [0], [0], [1], [0, 0, 1, 1], [], []>} : vector<8x784xbf16>, vector<784x400xbf16>, vector<8x400xf32> -> vector<8x400xf32>
    %c0_3 = arith.constant 0 : index
    %c0_4 = arith.constant 0 : index
    %4 = vector.load %arg5[%c0_3, %c0_4] : memref<1x400xf32, #tpu.memory_space<vmem>>, vector<1x400xf32>
    %5 = vector.broadcast %4 : vector<1x400xf32> to vector<8x400xf32>
    %6 = arith.addf %3, %5 : vector<8x400xf32>
    %cst_5 = arith.constant 0.000000e+00 : f32
    %7 = vector.broadcast %cst_5 : f32 to vector<8x400xf32>
    %8 = arith.maximumf %6, %7 : vector<8x400xf32>
    %9 = arith.truncf %8 : vector<8x400xf32> to vector<8x400xbf16>
    %c0_6 = arith.constant 0 : index
    %c0_7 = arith.constant 0 : index
    %10 = vector.load %arg6[%c0_6, %c0_7] : memref<400x40xbf16, #tpu.memory_space<vmem>>, vector<400x40xbf16>
    %cst_8 = arith.constant dense<0.000000e+00> : vector<8x40xf32>
    %11 = tpu.matmul %9, %10, %cst_8 {dimension_numbers = #tpu.dot_dimension_numbers<[1], [0], [0], [1], [0, 0, 1, 1], [], []>} : vector<8x400xbf16>, vector<400x40xbf16>, vector<8x40xf32> -> vector<8x40xf32>
    %c0_9 = arith.constant 0 : index
    %c0_10 = arith.constant 0 : index
    %12 = vector.load %arg7[%c0_9, %c0_10] : memref<1x40xf32, #tpu.memory_space<vmem>>, vector<1x40xf32>
    %13 = vector.broadcast %12 : vector<1x40xf32> to vector<8x40xf32>
    %14 = arith.addf %11, %13 : vector<8x40xf32>
    %15 = vector.extract_strided_slice %14 {offsets = [0, 0], sizes = [8, 20], strides = [1, 1]} : vector<8x40xf32> to vector<8x20xf32>
    %16 = vector.extract_strided_slice %14 {offsets = [0, 20], sizes = [8, 20], strides = [1, 1]} : vector<8x40xf32> to vector<8x20xf32>
    %c0_11 = arith.constant 0 : index
    %c0_12 = arith.constant 0 : index
    %17 = vector.load %arg3[%c0_11, %c0_12] : memref<8x20xf32, #tpu.memory_space<vmem>>, vector<8x20xf32>
    %cst_13 = arith.constant 5.000000e-01 : f32
    %18 = vector.broadcast %cst_13 : f32 to vector<8x20xf32>
    %19 = arith.mulf %18, %16 : vector<8x20xf32>
    %20 = math.exp %19 : vector<8x20xf32>
    %21 = arith.mulf %17, %20 : vector<8x20xf32>
    %22 = arith.addf %15, %21 : vector<8x20xf32>
    %c0_14 = arith.constant 0 : index
    %c0_15 = arith.constant 0 : index
    %23 = vector.load %arg2[%c0_14, %c0_15] : memref<8x1xi32, #tpu.memory_space<vmem>>, vector<8x1xi32>
    %24 = tpu.iota {dimensions = array<i32: 1>} : vector<8x10xi32>
    %25 = vector.broadcast %23 : vector<8x1xi32> to vector<8x10xi32>
    %26 = arith.cmpi eq, %25, %24 : vector<8x10xi32>
    %27 = arith.extui %26 : vector<8x10xi1> to vector<8x10xi32>
    %28 = arith.sitofp %27 : vector<8x10xi32> to vector<8x10xf32>
    %29 = arith.truncf %28 : vector<8x10xf32> to vector<8x10xbf16>
    %30 = arith.truncf %22 : vector<8x20xf32> to vector<8x20xbf16>
    %c0_16 = arith.constant 0 : index
    %c0_17 = arith.constant 0 : index
    %31 = vector.load %arg8[%c0_16, %c0_17] : memref<20x400xbf16, #tpu.memory_space<vmem>>, vector<20x400xbf16>
    %cst_18 = arith.constant dense<0.000000e+00> : vector<8x400xf32>
    %32 = tpu.matmul %30, %31, %cst_18 {dimension_numbers = #tpu.dot_dimension_numbers<[1], [0], [0], [1], [0, 0, 1, 1], [], []>} : vector<8x20xbf16>, vector<20x400xbf16>, vector<8x400xf32> -> vector<8x400xf32>
    %c0_19 = arith.constant 0 : index
    %c0_20 = arith.constant 0 : index
    %33 = vector.load %arg9[%c0_19, %c0_20] : memref<10x400xbf16, #tpu.memory_space<vmem>>, vector<10x400xbf16>
    %cst_21 = arith.constant dense<0.000000e+00> : vector<8x400xf32>
    %34 = tpu.matmul %29, %33, %cst_21 {dimension_numbers = #tpu.dot_dimension_numbers<[1], [0], [0], [1], [0, 0, 1, 1], [], []>} : vector<8x10xbf16>, vector<10x400xbf16>, vector<8x400xf32> -> vector<8x400xf32>
    %35 = arith.addf %32, %34 : vector<8x400xf32>
    %c0_22 = arith.constant 0 : index
    %c0_23 = arith.constant 0 : index
    %36 = vector.load %arg10[%c0_22, %c0_23] : memref<1x400xf32, #tpu.memory_space<vmem>>, vector<1x400xf32>
    %37 = vector.broadcast %36 : vector<1x400xf32> to vector<8x400xf32>
    %38 = arith.addf %35, %37 : vector<8x400xf32>
    %cst_24 = arith.constant 0.000000e+00 : f32
    %39 = vector.broadcast %cst_24 : f32 to vector<8x400xf32>
    %40 = arith.maximumf %38, %39 : vector<8x400xf32>
    %41 = arith.truncf %40 : vector<8x400xf32> to vector<8x400xbf16>
    %c0_25 = arith.constant 0 : index
    %c0_26 = arith.constant 0 : index
    %42 = vector.load %arg11[%c0_25, %c0_26] : memref<400x784xbf16, #tpu.memory_space<vmem>>, vector<400x784xbf16>
    %cst_27 = arith.constant dense<0.000000e+00> : vector<8x784xf32>
    %43 = tpu.matmul %41, %42, %cst_27 {dimension_numbers = #tpu.dot_dimension_numbers<[1], [0], [0], [1], [0, 0, 1, 1], [], []>} : vector<8x400xbf16>, vector<400x784xbf16>, vector<8x784xf32> -> vector<8x784xf32>
    %c0_28 = arith.constant 0 : index
    %c0_29 = arith.constant 0 : index
    %44 = vector.load %arg12[%c0_28, %c0_29] : memref<1x784xf32, #tpu.memory_space<vmem>>, vector<1x784xf32>
    %45 = vector.broadcast %44 : vector<1x784xf32> to vector<8x784xf32>
    %46 = arith.addf %43, %45 : vector<8x784xf32>
    %47 = arith.negf %46 : vector<8x784xf32>
    %48 = math.exp %47 : vector<8x784xf32>
    %cst_30 = arith.constant 1.000000e+00 : f32
    %49 = vector.broadcast %cst_30 : f32 to vector<8x784xf32>
    %50 = arith.addf %49, %48 : vector<8x784xf32>
    %51 = arith.divf %49, %50 : vector<8x784xf32>
    %c0_31 = arith.constant 0 : index
    %c0_32 = arith.constant 0 : index
    %52 = vector.load %arg13[%c0_31, %c0_32] : memref<8x784xf32, #tpu.memory_space<vmem>>, vector<8x784xf32>
    tpu.vector_store %arg13[%c0_31, %c0_32], %51 {strides = array<i32>} : memref<8x784xf32, #tpu.memory_space<vmem>>, vector<8x784xf32>,
    %c0_33 = arith.constant 0 : index
    %c0_34 = arith.constant 0 : index
    %53 = vector.load %arg14[%c0_33, %c0_34] : memref<8x20xf32, #tpu.memory_space<vmem>>, vector<8x20xf32>
    tpu.vector_store %arg14[%c0_33, %c0_34], %15 {strides = array<i32>} : memref<8x20xf32, #tpu.memory_space<vmem>>, vector<8x20xf32>,
    %c0_35 = arith.constant 0 : index
    %c0_36 = arith.constant 0 : index
    %54 = vector.load %arg15[%c0_35, %c0_36] : memref<8x20xf32, #tpu.memory_space<vmem>>, vector<8x20xf32>
    tpu.vector_store %arg15[%c0_35, %c0_36], %16 {strides = array<i32>} : memref<8x20xf32, #tpu.memory_space<vmem>>, vector<8x20xf32>,
    return
  }
  func.func @transform_0(%arg0: i32) -> (i32, i32) {
    %c0_i32 = arith.constant 0 : i32
    %c0_i32_0 = arith.constant 0 : i32
    return %arg0, %c0_i32 : i32, i32
  }
  func.func @transform_1(%arg0: i32) -> (i32, i32) {
    %c0_i32 = arith.constant 0 : i32
    %c0_i32_0 = arith.constant 0 : i32
    return %arg0, %c0_i32 : i32, i32
  }
  func.func @transform_2(%arg0: i32) -> (i32, i32) {
    %c0_i32 = arith.constant 0 : i32
    %c0_i32_0 = arith.constant 0 : i32
    return %arg0, %c0_i32 : i32, i32
  }
  func.func @transform_3(%arg0: i32) -> (i32, i32) {
    %c0_i32 = arith.constant 0 : i32
    %c0_i32_0 = arith.constant 0 : i32
    %c0_i32_1 = arith.constant 0 : i32
    return %c0_i32, %c0_i32_0 : i32, i32
  }
  func.func @transform_4(%arg0: i32) -> (i32, i32) {
    %c0_i32 = arith.constant 0 : i32
    %c0_i32_0 = arith.constant 0 : i32
    %c0_i32_1 = arith.constant 0 : i32
    return %c0_i32, %c0_i32_0 : i32, i32
  }
  func.func @transform_5(%arg0: i32) -> (i32, i32) {
    %c0_i32 = arith.constant 0 : i32
    %c0_i32_0 = arith.constant 0 : i32
    %c0_i32_1 = arith.constant 0 : i32
    return %c0_i32, %c0_i32_0 : i32, i32
  }
  func.func @transform_6(%arg0: i32) -> (i32, i32) {
    %c0_i32 = arith.constant 0 : i32
    %c0_i32_0 = arith.constant 0 : i32
    %c0_i32_1 = arith.constant 0 : i32
    return %c0_i32, %c0_i32_0 : i32, i32
  }
  func.func @transform_7(%arg0: i32) -> (i32, i32) {
    %c0_i32 = arith.constant 0 : i32
    %c0_i32_0 = arith.constant 0 : i32
    %c0_i32_1 = arith.constant 0 : i32
    return %c0_i32, %c0_i32_0 : i32, i32
  }
  func.func @transform_8(%arg0: i32) -> (i32, i32) {
    %c0_i32 = arith.constant 0 : i32
    %c0_i32_0 = arith.constant 0 : i32
    %c0_i32_1 = arith.constant 0 : i32
    return %c0_i32, %c0_i32_0 : i32, i32
  }
  func.func @transform_9(%arg0: i32) -> (i32, i32) {
    %c0_i32 = arith.constant 0 : i32
    %c0_i32_0 = arith.constant 0 : i32
    %c0_i32_1 = arith.constant 0 : i32
    return %c0_i32, %c0_i32_0 : i32, i32
  }
  func.func @transform_10(%arg0: i32) -> (i32, i32) {
    %c0_i32 = arith.constant 0 : i32
    %c0_i32_0 = arith.constant 0 : i32
    %c0_i32_1 = arith.constant 0 : i32
    return %c0_i32, %c0_i32_0 : i32, i32
  }
  func.func @transform_11(%arg0: i32) -> (i32, i32) {
    %c0_i32 = arith.constant 0 : i32
    %c0_i32_0 = arith.constant 0 : i32
    %c0_i32_1 = arith.constant 0 : i32
    return %c0_i32, %c0_i32_0 : i32, i32
  }
  func.func @transform_12(%arg0: i32) -> (i32, i32) {
    %c0_i32 = arith.constant 0 : i32
    %c0_i32_0 = arith.constant 0 : i32
    return %arg0, %c0_i32 : i32, i32
  }
  func.func @transform_13(%arg0: i32) -> (i32, i32) {
    %c0_i32 = arith.constant 0 : i32
    %c0_i32_0 = arith.constant 0 : i32
    return %arg0, %c0_i32 : i32, i32
  }
  func.func @transform_14(%arg0: i32) -> (i32, i32) {
    %c0_i32 = arith.constant 0 : i32
    %c0_i32_0 = arith.constant 0 : i32
    return %arg0, %c0_i32 : i32, i32
  }
}

</mosaic_0001>

<bundles_post_ra>
// kernel: tpu_custom_call.1
= control target key start
LH: loop header
LB: loop body
LE: loop exit
PB: predicated region body
PF: predicated region fallthrough
CT: control target
= control target key end

     0   :  { %20 = vsyncpa [#allocation3], 0  ;;  %vm1247_vm0 = vcmask 130048   ;;  %s8587_s0 = inlined_call_operand.vmem [shape: f32[8,784], index: 0, kind: input, shape index: {}]   ;;  %s8588_s1 = inlined_call_operand.vmem [shape: s32[8,1], index: 1, kind: input, shape index: {}]   ;;  %s8589_s2 = inlined_call_operand.vmem [shape: f32[8,20], index: 2, kind: input, shape index: {}]   ;;  %s8590_s3 = inlined_call_operand.vmem [shape: bf16[784,400], index: 3, kind: input, shape index: {}]   ;;  %s8591_s4 = inlined_call_operand.vmem [shape: f32[1,400], index: 4, kind: input, shape index: {}]   ;;  %s8592_s5 = inlined_call_operand.vmem [shape: bf16[400,40], index: 5, kind: input, shape index: {}]   ;;  %s8593_s6 = inlined_call_operand.vmem [shape: f32[1,40], index: 6, kind: input, shape index: {}]   ;;  %s8594_s7 = inlined_call_operand.vmem [shape: bf16[20,400], index: 7, kind: input, shape index: {}]   ;;  %s8595_s8 = inlined_call_operand.vmem [shape: bf16[10,400], index: 8, kind: input, shape index: {}]   ;;  %s8596_s9 = inlined_call_operand.vmem [shape: f32[1,400], index: 9, kind: input, shape index: {}]   ;;  %s8597_s10 = inlined_call_operand.vmem [shape: bf16[400,784], index: 10, kind: input, shape index: {}]   ;;  %s8598_s11 = inlined_call_operand.vmem [shape: f32[1,784], index: 11, kind: input, shape index: {}]   ;;  %s8599_s12 = inlined_call_operand.hbm [shape: f32[8,784], index: 12, kind: output, shape index: {0}]   ;;  %s8600_s13 = inlined_call_operand.hbm [shape: f32[8,20], index: 13, kind: output, shape index: {1}]   ;;  %s8601_s14 = inlined_call_operand.hbm [shape: f32[8,20], index: 14, kind: output, shape index: {2}]  }
   0x1   :  { %v3909_v0 = vld [vmem:[%s8590_s3 + $0xe0] sm:$0xf]  ;;  %v5469_v1 = vld [vmem:[%s8590_s3 + $0xec] sm:$0xf0] }
   0x2   :  { %v4037_v2 = vld [vmem:[%s8590_s3 + $0x1e0] sm:$0xf]  ;;  %v3910_v3 = vor.u32 %v5469_v1, %v3909_v0  ;;  %v5501_v4 = vld [vmem:[%s8590_s3 + $0x1ec] sm:$0xf0] }
   0x3   :  { %v4165_v5 = vld [vmem:[%s8590_s3 + $0x2e0] sm:$0xf]  ;;  %v5533_v6 = vld [vmem:[%s8590_s3 + $0x2ec] sm:$0xf0]  ;;  %v4038_v7 = vor.u32 %v5501_v4, %v4037_v2 }
   0x4   :  { %v4166_v8 = vor.u32 %v5533_v6, %v4165_v5  ;;  %v4293_v9 = vld [vmem:[%s8590_s3 + $0x3e0] sm:$0xf]  ;;  %v5565_v10 = vld [vmem:[%s8590_s3 + $0x3ec] sm:$0xf0]  ;;  %1251 = vmatpush.bf16.msra.mxu0 %v3910_v3 }
   0x5   :  { %v3893_v11 = vld [vmem:[%s8590_s3 + $0xc0] sm:$0xf]  ;;  %v4294_v12 = vor.u32 %v5565_v10, %v4293_v9  ;;  %v5465_v13 = vld [vmem:[%s8590_s3 + $0xcc] sm:$0xf0]  ;;  %1264 = vmatpush.bf16.msra.mxu1 %v4038_v7 }
   0x6   :  { %v4021_v14 = vld [vmem:[%s8590_s3 + $0x1c0] sm:$0xf]  ;;  %v5497_v15 = vld [vmem:[%s8590_s3 + $0x1cc] sm:$0xf0]  ;;  %1277 = vmatpush.bf16.msra.mxu2 %v4166_v8  ;;  %v3894_v16 = vor.u32 %v5465_v13, %v3893_v11 }
   0x7   :  { %v4022_v17 = vor.u32 %v5497_v15, %v4021_v14  ;;  %v4149_v18 = vld [vmem:[%s8590_s3 + $0x2c0] sm:$0xf]  ;;  %v5529_v19 = vld [vmem:[%s8590_s3 + $0x2cc] sm:$0xf0]  ;;  %1290 = vmatpush.bf16.msra.mxu3 %v4294_v12 }
   0x8   :  { %v4277_v20 = vld [vmem:[%s8590_s3 + $0x3c0] sm:$0xf]  ;;  %v4150_v21 = vor.u32 %v5529_v19, %v4149_v18  ;;  %v5561_v22 = vld [vmem:[%s8590_s3 + $0x3cc] sm:$0xf0]  ;;  %1252 = vmatpush.bf16.msra.mxu0 %v3894_v16 }
   0x9   :  { %v3877_v23 = vld [vmem:[%s8590_s3 + $0xa0] sm:$0xf]  ;;  %v5461_v24 = vld [vmem:[%s8590_s3 + $0xac] sm:$0xf0]  ;;  %v4278_v25 = vor.u32 %v5561_v22, %v4277_v20  ;;  %1265 = vmatpush.bf16.msra.mxu1 %v4022_v17 }
   0xa   :  { %v4005_v26 = vld [vmem:[%s8590_s3 + $0x1a0] sm:$0xf]  ;;  %v5493_v27 = vld [vmem:[%s8590_s3 + $0x1ac] sm:$0xf0]  ;;  %v3878_v29 = vor.u32 %v5461_v24, %v3877_v23  ;;  %1278 = vmatpush.bf16.msra.mxu2 %v4150_v21 }
   0xb   :  { %v4133_v28 = vld [vmem:[%s8590_s3 + $0x2a0] sm:$0xf]  ;;  %v5525_v30 = vld [vmem:[%s8590_s3 + $0x2ac] sm:$0xf0]  ;;  %v4006_v33 = vor.u32 %v5493_v27, %v4005_v26  ;;  %1291 = vmatpush.bf16.msra.mxu3 %v4278_v25 }
   0xc   :  { %v4261_v31 = vld [vmem:[%s8590_s3 + $0x3a0] sm:$0xf]  ;;  %v5557_v32 = vld [vmem:[%s8590_s3 + $0x3ac] sm:$0xf0]  ;;  %v4134_v34 = vor.u32 %v5525_v30, %v4133_v28  ;;  %1253 = vmatpush.bf16.msra.mxu0 %v3878_v29 }
   0xd   :  { %v3861_v35 = vld [vmem:[%s8590_s3 + $0x80] sm:$0xf]  ;;  %v5457_v36 = vld [vmem:[%s8590_s3 + $0x8c] sm:$0xf0]  ;;  %v4262_v38 = vor.u32 %v5557_v32, %v4261_v31  ;;  %1266 = vmatpush.bf16.msra.mxu1 %v4006_v33  ;;  %v5467_v33 = vld [vmem:[%s8590_s3 + $0xe4] sm:$0xf] }
   0xe   :  { %v3989_v37 = vld [vmem:[%s8590_s3 + $0x180] sm:$0xf]  ;;  %v5489_v39 = vld [vmem:[%s8590_s3 + $0x18c] sm:$0xf0]  ;;  %v3862_v44 = vor.u32 %v5457_v36, %v3861_v35  ;;  %1279 = vmatpush.bf16.msra.mxu2 %v4134_v34  ;;  %v3911_v34 = vld [vmem:[%s8590_s3 + $0xf0] sm:$0xf0] }
   0xf   :  { %v4117_v40 = vld [vmem:[%s8590_s3 + $0x280] sm:$0xf]  ;;  %v5521_v41 = vld [vmem:[%s8590_s3 + $0x28c] sm:$0xf0]  ;;  %v3990_v45 = vor.u32 %v5489_v39, %v3989_v37  ;;  %1292 = vmatpush.bf16.msra.mxu3 %v4262_v38 }
  0x10   :  { %v4245_v42 = vld [vmem:[%s8590_s3 + $0x380] sm:$0xf]  ;;  %v5553_v43 = vld [vmem:[%s8590_s3 + $0x38c] sm:$0xf0]  ;;  %v4118_v46 = vor.u32 %v5521_v41, %v4117_v40  ;;  %1254 = vmatpush.bf16.msra.mxu0 %v3862_v44  ;;  %v4039_v44 = vld [vmem:[%s8590_s3 + $0x1f0] sm:$0xf0] }
  0x11   :  { %v3845_v47 = vld [vmem:[%s8590_s3 + $0x60] sm:$0xf]  ;;  %v5453_v48 = vld [vmem:[%s8590_s3 + $0x6c] sm:$0xf0]  ;;  %v4246_v50 = vor.u32 %v5553_v43, %v4245_v42  ;;  %1267 = vmatpush.bf16.msra.mxu1 %v3990_v45  ;;  %v5499_v43 = vld [vmem:[%s8590_s3 + $0x1e4] sm:$0xf] }
  0x12   :  { %v3973_v49 = vld [vmem:[%s8590_s3 + $0x160] sm:$0xf]  ;;  %v5485_v51 = vld [vmem:[%s8590_s3 + $0x16c] sm:$0xf0]  ;;  %v3846_v56 = vor.u32 %v5453_v48, %v3845_v47  ;;  %1280 = vmatpush.bf16.msra.mxu2 %v4118_v46  ;;  %v50_v45 = vld [vmem:[%s8587_s0 + $0x18] sm:$0xff]  ;;  %v3914_v47 = vor.u32 %v5467_v33, %v3911_v34 }
  0x13   :  { %v4101_v52 = vld [vmem:[%s8590_s3 + $0x260] sm:$0xf]  ;;  %v5517_v53 = vld [vmem:[%s8590_s3 + $0x26c] sm:$0xf0]  ;;  %v3974_v57 = vor.u32 %v5485_v51, %v3973_v49  ;;  %1293 = vmatpush.bf16.msra.mxu3 %v4246_v50 }
  0x14   :  { %v4229_v54 = vld [vmem:[%s8590_s3 + $0x360] sm:$0xf]  ;;  %v5549_v55 = vld [vmem:[%s8590_s3 + $0x36c] sm:$0xf0]  ;;  %v4102_v58 = vor.u32 %v5517_v53, %v4101_v52  ;;  %1255 = vmatpush.bf16.msra.mxu0 %v3846_v56  ;;  %v5463_v53 = vld [vmem:[%s8590_s3 + $0xc4] sm:$0xf] }
  0x15   :  { %v3829_v59 = vld [vmem:[%s8590_s3 + $0x40] sm:$0xf]  ;;  %v5449_v60 = vld [vmem:[%s8590_s3 + $0x4c] sm:$0xf0]  ;;  %v4230_v62 = vor.u32 %v5549_v55, %v4229_v54  ;;  %1268 = vmatpush.bf16.msra.mxu1 %v3974_v57  ;;  %v3895_v54 = vld [vmem:[%s8590_s3 + $0xd0] sm:$0xf0]  ;;  %v6291_v57 = vpack.c.bf16 %v50_v45, %v50_v45 }
  0x16   :  { %v3957_v61 = vld [vmem:[%s8590_s3 + $0x140] sm:$0xf]  ;;  %v5481_v63 = vld [vmem:[%s8590_s3 + $0x14c] sm:$0xf0]  ;;  %v3830_v4 = vor.u32 %v5449_v60, %v3829_v59  ;;  %1281 = vmatpush.bf16.msra.mxu2 %v4102_v58  ;;  %v48_v58 = vld [vmem:[%s8587_s0 + $0x8] sm:$0xff]  ;;  %v4042_v59 = vor.u32 %v5499_v43, %v4039_v44 }
  0x17   :  { %v4085_v0 = vld [vmem:[%s8590_s3 + $0x240] sm:$0xf]  ;;  %v5513_v1 = vld [vmem:[%s8590_s3 + $0x24c] sm:$0xf0]  ;;  %v3958_v5 = vor.u32 %v5481_v63, %v3957_v61  ;;  %1294 = vmatpush.bf16.msra.mxu3 %v4230_v62  ;;  %v5495_v61 = vld [vmem:[%s8590_s3 + $0x1c4] sm:$0xf] }
  0x18   :  { %v4213_v2 = vld [vmem:[%s8590_s3 + $0x340] sm:$0xf]  ;;  %v5545_v3 = vld [vmem:[%s8590_s3 + $0x34c] sm:$0xf0]  ;;  %v4086_v6 = vor.u32 %v5513_v1, %v4085_v0  ;;  %1256 = vmatpush.bf16.msra.mxu0 %v3830_v4  ;;  %v4023_v62 = vld [vmem:[%s8590_s3 + $0x1d0] sm:$0xf0]  ;;  %v3898_v0 = vor.u32 %v5463_v53, %v3895_v54 }
  0x19   :  { %v3813_v7 = vld [vmem:[%s8590_s3 + $0x20] sm:$0xf]  ;;  %v5445_v8 = vld [vmem:[%s8590_s3 + $0x2c] sm:$0xf0]  ;;  %v4214_v10 = vor.u32 %v5545_v3, %v4213_v2  ;;  %1269 = vmatpush.bf16.msra.mxu1 %v3958_v5  ;;  %v5459_v5 = vld [vmem:[%s8590_s3 + $0xa4] sm:$0xf] }
  0x1a   :  { %v3941_v9 = vld [vmem:[%s8590_s3 + $0x120] sm:$0xf]  ;;  %v5477_v11 = vld [vmem:[%s8590_s3 + $0x12c] sm:$0xf0]  ;;  %v3814_v16 = vor.u32 %v5445_v8, %v3813_v7  ;;  %1282 = vmatpush.bf16.msra.mxu2 %v4086_v6  ;;  %v3879_v6 = vld [vmem:[%s8590_s3 + $0xb0] sm:$0xf0]  ;;  %v6322_v7 = vpack.c.bf16 %v48_v58, %v48_v58  ;;  %v4026_v8 = vor.u32 %v5495_v61, %v4023_v62 }
  0x1b   :  { %v4069_v12 = vld [vmem:[%s8590_s3 + $0x220] sm:$0xf]  ;;  %v5509_v13 = vld [vmem:[%s8590_s3 + $0x22c] sm:$0xf0]  ;;  %v3942_v20 = vor.u32 %v5477_v11, %v3941_v9  ;;  %1295 = vmatpush.bf16.msra.mxu3 %v4214_v10  ;;  %v5491_v10 = vld [vmem:[%s8590_s3 + $0x1a4] sm:$0xf] }
  0x1c   :  { %v4197_v14 = vld [vmem:[%s8590_s3 + $0x320] sm:$0xf]  ;;  %v5541_v15 = vld [vmem:[%s8590_s3 + $0x32c] sm:$0xf0]  ;;  %v4070_v21 = vor.u32 %v5509_v13, %v4069_v12  ;;  %1257 = vmatpush.bf16.msra.mxu0 %v3814_v16  ;;  %v4007_v11 = vld [vmem:[%s8590_s3 + $0x1b0] sm:$0xf0]  ;;  %v3882_v13 = vor.u32 %v5459_v5, %v3879_v6 }
  0x1d   :  { %v3797_v17 = vld [vmem:[%s8590_s3] sm:$0xf]  ;;  %v5441_v18 = vld [vmem:[%s8590_s3 + $0xc] sm:$0xf0]  ;;  %v4198_v25 = vor.u32 %v5541_v15, %v4197_v14  ;;  %1270 = vmatpush.bf16.msra.mxu1 %v3942_v20  ;;  %v4010_v20 = vor.u32 %v5491_v10, %v4007_v11  ;;  %v5447_v43 = vld [vmem:[%s8590_s3 + $0x44] sm:$0xf] }
  0x1e   :  { %v3925_v19 = vld [vmem:[%s8590_s3 + $0x100] sm:$0xf]  ;;  %v5473_v22 = vld [vmem:[%s8590_s3 + $0x10c] sm:$0xf0]  ;;  %v3798_v32 = vor.u32 %v5441_v18, %v3797_v17  ;;  %1283 = vmatpush.bf16.msra.mxu2 %v4070_v21  ;;  %v5455_v18 = vld [vmem:[%s8590_s3 + $0x84] sm:$0xf] }
  0x1f   :  { %v4053_v23 = vld [vmem:[%s8590_s3 + $0x200] sm:$0xf]  ;;  %v5505_v24 = vld [vmem:[%s8590_s3 + $0x20c] sm:$0xf0]  ;;  %v3926_v36 = vor.u32 %v5473_v22, %v3925_v19  ;;  %1296 = vmatpush.bf16.msra.mxu3 %v4198_v25  ;;  %v3863_v19 = vld [vmem:[%s8590_s3 + $0x90] sm:$0xf0] }
  0x20   :  { %v4181_v26 = vld [vmem:[%s8590_s3 + $0x300] sm:$0xf]  ;;  %v5537_v27 = vld [vmem:[%s8590_s3 + $0x30c] sm:$0xf0]  ;;  %v4054_v37 = vor.u32 %v5505_v24, %v4053_v23  ;;  %1258 = vmatpush.bf16.msra.mxu0 %v3798_v32  ;;  %v5487_v22 = vld [vmem:[%s8590_s3 + $0x184] sm:$0xf]  ;;  %v3866_v25 = vor.u32 %v5455_v18, %v3863_v19 }
  0x21   :  { %v4421_v28 = vld [vmem:[%s8590_s3 + $0x4e0] sm:$0xf]  ;;  %v5597_v29 = vld [vmem:[%s8590_s3 + $0x4ec] sm:$0xf0]  ;;  %v4182_v41 = vor.u32 %v5537_v27, %v4181_v26  ;;  %1271 = vmatpush.bf16.msra.mxu1 %v3926_v36  ;;  %v3991_v23 = vld [vmem:[%s8590_s3 + $0x190] sm:$0xf0] }
  0x22   :  { %v4549_v30 = vld [vmem:[%s8590_s3 + $0x5e0] sm:$0xf]  ;;  %v5629_v31 = vld [vmem:[%s8590_s3 + $0x5ec] sm:$0xf0]  ;;  %v4422_v42 = vor.u32 %v5597_v29, %v4421_v28  ;;  %1284 = vmatpush.bf16.msra.mxu2 %v4054_v37  ;;  %v3994_v33 = vor.u32 %v5487_v22, %v3991_v23  ;;  %v3975_v36 = vld [vmem:[%s8590_s3 + $0x170] sm:$0xf0] }
  0x23   :  { %v49_v35 = vld [vmem:[%s8587_s0 + $0x10] sm:$0xff]  ;;  %v4565_v38 = vld [vmem:[%s8590_s3 + $0x600] sm:$0xf]  ;;  %v4550_v46 = vor.u32 %v5629_v31, %v4549_v30  ;;  %1297 = vmatpush.bf16.msra.mxu3 %v4182_v41  ;;  %v5451_v30 = vld [vmem:[%s8590_s3 + $0x64] sm:$0xf] }
  0x24   :  { %v5633_v39 = vld [vmem:[%s8590_s3 + $0x60c] sm:$0xf0]  ;;  %v47_v40 = vld [vmem:[%s8587_s0] sm:$0xff]  ;;  %v6278_v51 = vpack.c.bf16 %v49_v35, %v49_v35  ;;  %1303 = vmatpush.bf16.msrb.mxu0 %v4422_v42  ;;  %1272 = vmatmul.bf16.vlgmr.msra.gmra.mxu1 %v6322_v7  ;;  %v3847_v31 = vld [vmem:[%s8590_s3 + $0x70] sm:$0xf0] }
  0x25   :  { %v4405_v48 = vld [vmem:[%s8590_s3 + $0x4c0] sm:$0xf]  ;;  %v5593_v49 = vld [vmem:[%s8590_s3 + $0x4cc] sm:$0xf0]  ;;  %v6289_v55 = vpack.c.bf16 %v47_v40, %v47_v40  ;;  %v4566_v56 = vor.u32 %v5633_v39, %v4565_v38  ;;  %1316 = vmatpush.bf16.msrb.mxu1 %v4550_v46  ;;  %v5483_v35 = vld [vmem:[%s8590_s3 + $0x164] sm:$0xf]  ;;  %v3850_v38 = vor.u32 %v5451_v30, %v3847_v31 }
  0x26   :  { %v4533_v50 = vld [vmem:[%s8590_s3 + $0x5c0] sm:$0xf]  ;;  %v5625_v52 = vld [vmem:[%s8590_s3 + $0x5cc] sm:$0xf0]  ;;  %v4406_v60 = vor.u32 %v5593_v49, %v4405_v48  ;;  %1285 = vmatmul.bf16.vlgmr.msra.gmra.mxu2 %v6278_v51  ;;  %1298 = vmatmul.bf16.vlgmr.msra.gmra.mxu3 %v6291_v57  ;;  %v3831_v44 = vld [vmem:[%s8590_s3 + $0x50] sm:$0xf0]  ;;  %v3978_v46 = vor.u32 %v5483_v35, %v3975_v36 }
  0x27   :  { %1342 = vmatpush.bf16.msrb.mxu3 %v3914_v47  ;;  %v4534_v63 = vor.u32 %v5625_v52, %v4533_v50  ;;  %v4389_v1 = vld [vmem:[%s8590_s3 + $0x4a0] sm:$0xf]  ;;  %v5589_v2 = vld [vmem:[%s8590_s3 + $0x4ac] sm:$0xf0]  ;;  %1259 = vmatmul.bf16.vlgmr.msra.gmra.mxu0 %v6289_v55  ;;  %v5479_v48 = vld [vmem:[%s8590_s3 + $0x144] sm:$0xf]  ;;  %v3834_v52 = vor.u32 %v5447_v43, %v3831_v44 }
  0x28   :  { %v4517_v3 = vld [vmem:[%s8590_s3 + $0x5a0] sm:$0xf]  ;;  %v5621_v4 = vld [vmem:[%s8590_s3 + $0x5ac] sm:$0xf0]  ;;  %1336 = vmatpush.bf16.msrb.mxu2 %v4566_v56  ;;  %1304 = vmatpush.bf16.msrb.mxu0 %v4406_v60  ;;  %v4390_v9 = vor.u32 %v5589_v2, %v4389_v1  ;;  %v3959_v49 = vld [vmem:[%s8590_s3 + $0x150] sm:$0xf0] }
  0x29   :  { %1317 = vmatpush.bf16.msrb.mxu1 %v4534_v63  ;;  %v4518_v12 = vor.u32 %v5621_v4, %v4517_v3  ;;  %v4373_v14 = vld [vmem:[%s8590_s3 + $0x480] sm:$0xf]  ;;  %v5585_v15 = vld [vmem:[%s8590_s3 + $0x48c] sm:$0xf0]  ;;  %v3815_v60 = vld [vmem:[%s8590_s3 + $0x30] sm:$0xf0]  ;;  %v3962_v61 = vor.u32 %v5479_v48, %v3959_v49 }
  0x2a   :  { %v4501_v16 = vld [vmem:[%s8590_s3 + $0x580] sm:$0xf]  ;;  %v5617_v17 = vld [vmem:[%s8590_s3 + $0x58c] sm:$0xf0]  ;;  %v4374_v21 = vor.u32 %v5585_v15, %v4373_v14  ;;  %v5475_v63 = vld [vmem:[%s8590_s3 + $0x124] sm:$0xf] }
  0x2b   :  { %1343 = vmatpush.bf16.msrb.mxu3 %v3898_v0  ;;  %v4502_v24 = vor.u32 %v5617_v17, %v4501_v16  ;;  %v4357_v26 = vld [vmem:[%s8590_s3 + $0x460] sm:$0xf]  ;;  %v5581_v27 = vld [vmem:[%s8590_s3 + $0x46c] sm:$0xf0]  ;;  %v3943_v0 = vld [vmem:[%s8590_s3 + $0x130] sm:$0xf0] }
  0x2c   :  { %1355 = vmatpush.bf16.msra.mxu2 %v4042_v59  ;;  %1305 = vmatpush.bf16.msrb.mxu0 %v4390_v9  ;;  %v4485_v28 = vld [vmem:[%s8590_s3 + $0x560] sm:$0xf]  ;;  %v5613_v29 = vld [vmem:[%s8590_s3 + $0x56c] sm:$0xf0]  ;;  %v4358_v34 = vor.u32 %v5581_v27, %v4357_v26  ;;  %v5443_v59 = vld [vmem:[%s8590_s3 + $0x24] sm:$0xf]  ;;  %v3946_v14 = vor.u32 %v5475_v63, %v3943_v0 }
  0x2d   :  { %1318 = vmatpush.bf16.msrb.mxu1 %v4518_v12  ;;  %v53_v32 = vld [vmem:[%s8587_s0 + $0x30] sm:$0xff]  ;;  %v4486_v37 = vor.u32 %v5613_v29, %v4485_v28  ;;  %v4341_v39 = vld [vmem:[%s8590_s3 + $0x440] sm:$0xf]  ;;  %v3818_v3 = vor.u32 %v5443_v59, %v3815_v60  ;;  %v5531_v10 = vld [vmem:[%s8590_s3 + $0x2e4] sm:$0xf] }
  0x2e   :  { %v5577_v40 = vld [vmem:[%s8590_s3 + $0x44c] sm:$0xf0]  ;;  %v4469_v41 = vld [vmem:[%s8590_s3 + $0x540] sm:$0xf]  ;;  %v6401_v45 = vpack.c.bf16 %v53_v32, %v53_v32  ;;  %v3799_v9 = vld [vmem:[%s8590_s3 + $0x10] sm:$0xf0] }
  0x2f   :  { %1344 = vmatpush.bf16.msrb.mxu3 %v3882_v13  ;;  %v5609_v42 = vld [vmem:[%s8590_s3 + $0x54c] sm:$0xf0]  ;;  %v4342_v47 = vor.u32 %v5577_v40, %v4341_v39  ;;  %v4325_v53 = vld [vmem:[%s8590_s3 + $0x420] sm:$0xf]  ;;  %v4167_v11 = vld [vmem:[%s8590_s3 + $0x2f0] sm:$0xf0] }
  0x30   :  { %1356 = vmatpush.bf16.msra.mxu2 %v4026_v8  ;;  %1306 = vmatpush.bf16.msrb.mxu0 %v4374_v21  ;;  %v4470_v50 = vor.u32 %v5609_v42, %v4469_v41  ;;  %v5573_v54 = vld [vmem:[%s8590_s3 + $0x42c] sm:$0xf0]  ;;  %v4453_v56 = vld [vmem:[%s8590_s3 + $0x520] sm:$0xf]  ;;  %v5439_v8 = vld [vmem:[%s8590_s3 + $0x4] sm:$0xf] }
  0x31   :  { %1319 = vmatpush.bf16.msrb.mxu1 %v4502_v24  ;;  %v5605_v58 = vld [vmem:[%s8590_s3 + $0x52c] sm:$0xf0]  ;;  %v4326_v62 = vor.u32 %v5573_v54, %v4325_v53  ;;  %v4309_v1 = vld [vmem:[%s8590_s3 + $0x400] sm:$0xf]  ;;  %v5563_v12 = vld [vmem:[%s8590_s3 + $0x3e4] sm:$0xf]  ;;  %v4170_v24 = vor.u32 %v5531_v10, %v4167_v11 }
  0x32   :  { %v4454_v2 = vor.u32 %v5605_v58, %v4453_v56  ;;  %v5569_v4 = vld [vmem:[%s8590_s3 + $0x40c] sm:$0xf0]  ;;  %v4437_v5 = vld [vmem:[%s8590_s3 + $0x500] sm:$0xf]  ;;  %v4295_v13 = vld [vmem:[%s8590_s3 + $0x3f0] sm:$0xf0] }
  0x33   :  { %1345 = vmatpush.bf16.msrb.mxu3 %v3866_v25  ;;  %v5601_v6 = vld [vmem:[%s8590_s3 + $0x50c] sm:$0xf0]  ;;  %v4310_v15 = vor.u32 %v5569_v4, %v4309_v1  ;;  %v5595_v16 = vld [vmem:[%s8590_s3 + $0x4e4] sm:$0xf]  ;;  %v4423_v17 = vld [vmem:[%s8590_s3 + $0x4f0] sm:$0xf0]  ;;  %v4298_v25 = vor.u32 %v5563_v12, %v4295_v13 }
  0x34   :  { %1357 = vmatpush.bf16.msra.mxu2 %v4010_v20  ;;  %1307 = vmatpush.bf16.msrb.mxu0 %v4358_v34  ;;  %v51_v18 = vld [vmem:[%s8587_s0 + $0x20] sm:$0xff]  ;;  %v4438_v19 = vor.u32 %v5601_v6, %v4437_v5  ;;  %v3802_v20 = vor.u32 %v5439_v8, %v3799_v9  ;;  %v3927_v22 = vld [vmem:[%s8590_s3 + $0x110] sm:$0xf0]  ;;  %v52_v23 = vld [vmem:[%s8587_s0 + $0x28] sm:$0xff]  ;;  %v4426_v29 = vor.u32 %v5595_v16, %v4423_v17 }
  0x35   :  { %1320 = vmatpush.bf16.msrb.mxu1 %v4486_v37  ;;  %v5471_v21 = vld [vmem:[%s8590_s3 + $0x104] sm:$0xf]  ;;  %v4551_v27 = vld [vmem:[%s8590_s3 + $0x5f0] sm:$0xf0]  ;;  %v6492_v30 = vpack.c.bf16 %v51_v18, %v51_v18  ;;  %v6503_v35 = vpack.c.bf16 %v52_v23, %v52_v23 }
  0x36   :  { %4579 = vmatmul.msk.bf16.vlgmr.msrb.gmra.mxu2 %vm1247_vm0, %v6401_v45  ;;  %v5627_v26 = vld [vmem:[%s8590_s3 + $0x5e4] sm:$0xf]  ;;  %v4151_v31 = vld [vmem:[%s8590_s3 + $0x2d0] sm:$0xf0]  ;;  %v3930_v34 = vor.u32 %v5471_v21, %v3927_v22 }
  0x37   :  { %1346 = vmatpush.bf16.msrb.mxu3 %v3850_v38  ;;  %v5527_v28 = vld [vmem:[%s8590_s3 + $0x2c4] sm:$0xf]  ;;  %v4407_v37 = vld [vmem:[%s8590_s3 + $0x4d0] sm:$0xf0]  ;;  %v4554_v38 = vor.u32 %v5627_v26, %v4551_v27 }
  0x38   :  { %1358 = vmatpush.bf16.msra.mxu2 %v3994_v33  ;;  %1308 = vmatpush.bf16.msrb.mxu0 %v4342_v47  ;;  %v5559_v32 = vld [vmem:[%s8590_s3 + $0x3c4] sm:$0xf]  ;;  %v4279_v33 = vld [vmem:[%s8590_s3 + $0x3d0] sm:$0xf0]  ;;  %v4154_v39 = vor.u32 %v5527_v28, %v4151_v31 }
  0x39   :  { %1321 = vmatpush.bf16.msrb.mxu1 %v4470_v50  ;;  %v5591_v36 = vld [vmem:[%s8590_s3 + $0x4c4] sm:$0xf]  ;;  %v4282_v40 = vor.u32 %v5559_v32, %v4279_v33  ;;  %v4535_v42 = vld [vmem:[%s8590_s3 + $0x5d0] sm:$0xf0] }
  0x3a   :  { %v5623_v41 = vld [vmem:[%s8590_s3 + $0x5c4] sm:$0xf]  ;;  %v4410_v44 = vor.u32 %v5591_v36, %v4407_v37  ;;  %v4263_v48 = vld [vmem:[%s8590_s3 + $0x3b0] sm:$0xf0] }
  0x3b   :  { %1347 = vmatpush.bf16.msrb.mxu3 %v3834_v52  ;;  %v5523_v43 = vld [vmem:[%s8590_s3 + $0x2a4] sm:$0xf]  ;;  %v4391_v50 = vld [vmem:[%s8590_s3 + $0x4b0] sm:$0xf0]  ;;  %v4538_v52 = vor.u32 %v5623_v41, %v4535_v42 }
  0x3c   :  { %1359 = vmatpush.bf16.msra.mxu2 %v3978_v46  ;;  %1309 = vmatpush.bf16.msrb.mxu0 %v4326_v62  ;;  %v4135_v46 = vld [vmem:[%s8590_s3 + $0x2b0] sm:$0xf0]  ;;  %v5555_v47 = vld [vmem:[%s8590_s3 + $0x3a4] sm:$0xf] }
  0x3d   :  { %1322 = vmatpush.bf16.msrb.mxu1 %v4454_v2  ;;  %v5587_v49 = vld [vmem:[%s8590_s3 + $0x4a4] sm:$0xf]  ;;  %v4138_v53 = vor.u32 %v5523_v43, %v4135_v46  ;;  %v4266_v54 = vor.u32 %v5555_v47, %v4263_v48  ;;  %v4519_v58 = vld [vmem:[%s8590_s3 + $0x5b0] sm:$0xf0] }
  0x3e   :  { %v5619_v56 = vld [vmem:[%s8590_s3 + $0x5a4] sm:$0xf]  ;;  %v4394_v60 = vor.u32 %v5587_v49, %v4391_v50  ;;  %v4247_v63 = vld [vmem:[%s8590_s3 + $0x390] sm:$0xf0] }
  0x3f   :  { %1348 = vmatpush.bf16.msrb.mxu3 %v3818_v3  ;;  %v5519_v59 = vld [vmem:[%s8590_s3 + $0x284] sm:$0xf]  ;;  %v4375_v1 = vld [vmem:[%s8590_s3 + $0x490] sm:$0xf0]  ;;  %v4522_v2 = vor.u32 %v5619_v56, %v4519_v58  ;;  %v3917_v56 = vld [vmem:[%s8590_s3 + $0xe8] sm:$0xf] }
  0x40   :  { %1360 = vmatpush.bf16.msra.mxu2 %v3962_v61  ;;  %1310 = vmatpush.bf16.msrb.mxu0 %v4310_v15  ;;  %v4119_v61 = vld [vmem:[%s8590_s3 + $0x290] sm:$0xf0]  ;;  %v5551_v62 = vld [vmem:[%s8590_s3 + $0x384] sm:$0xf]  ;;  %v5470_v58 = vld [vmem:[%s8590_s3 + $0xf4] sm:$0xf0] }
  0x41   :  { %1323 = vmatpush.bf16.msrb.mxu1 %v4438_v19  ;;  %v5583_v0 = vld [vmem:[%s8590_s3 + $0x484] sm:$0xf]  ;;  %v4122_v3 = vor.u32 %v5519_v59, %v4119_v61  ;;  %v4250_v4 = vor.u32 %v5551_v62, %v4247_v63  ;;  %v4503_v6 = vld [vmem:[%s8590_s3 + $0x590] sm:$0xf0]  ;;  %v4045_v59 = vld [vmem:[%s8590_s3 + $0x1e8] sm:$0xf] }
  0x42   :  { %v5615_v5 = vld [vmem:[%s8590_s3 + $0x584] sm:$0xf]  ;;  %v4378_v9 = vor.u32 %v5583_v0, %v4375_v1  ;;  %v4103_v10 = vld [vmem:[%s8590_s3 + $0x270] sm:$0xf0]  ;;  %v5502_v61 = vld [vmem:[%s8590_s3 + $0x1f4] sm:$0xf0] }
  0x43   :  { %1349 = vmatpush.bf16.msrb.mxu3 %v3802_v20  ;;  %1311 = vmatmul.bf16.vlgmr.msrb.gmra.mxu0 %v6492_v30  ;;  %v5515_v8 = vld [vmem:[%s8590_s3 + $0x264] sm:$0xf]  ;;  %v4231_v12 = vld [vmem:[%s8590_s3 + $0x370] sm:$0xf0]  ;;  %v4506_v15 = vor.u32 %v5615_v5, %v4503_v6  ;;  %v3918_v6 = vor.u32 %v5470_v58, %v3917_v56 }
  0x44   :  { %1361 = vmatpush.bf16.msra.mxu2 %v3946_v14  ;;  %1368 = vmatpush.bf16.msra.mxu0 %v4170_v24  ;;  %v5547_v11 = vld [vmem:[%s8590_s3 + $0x364] sm:$0xf]  ;;  %v4359_v14 = vld [vmem:[%s8590_s3 + $0x470] sm:$0xf0]  ;;  %v4106_v16 = vor.u32 %v5515_v8, %v4103_v10  ;;  %v5534_v8 = vld [vmem:[%s8590_s3 + $0x2f4] sm:$0xf0] }
  0x45   :  { %1381 = vmatpush.bf16.msra.mxu1 %v4298_v25  ;;  %v5579_v13 = vld [vmem:[%s8590_s3 + $0x464] sm:$0xf]  ;;  %v4234_v17 = vor.u32 %v5547_v11, %v4231_v12  ;;  %v4487_v19 = vld [vmem:[%s8590_s3 + $0x570] sm:$0xf0]  ;;  %v5566_v10 = vld [vmem:[%s8590_s3 + $0x3f4] sm:$0xf0]  ;;  %v4046_v11 = vor.u32 %v5502_v61, %v4045_v59 }
  0x46   :  { %1324 = vmatmul.bf16.vlgmr.msrb.gmra.mxu1 %v6503_v35  ;;  %1350 = vmatmul.bf16.vlgmr.msrb.gmra.mxu3 %v6289_v55  ;;  %v5611_v18 = vld [vmem:[%s8590_s3 + $0x564] sm:$0xf]  ;;  %v4362_v21 = vor.u32 %v5579_v13, %v4359_v14  ;;  %v4087_v22 = vld [vmem:[%s8590_s3 + $0x250] sm:$0xf0]  ;;  %v3901_v13 = vld [vmem:[%s8590_s3 + $0xc8] sm:$0xf] }
  0x47   :  { %1394 = vmatpush.bf16.msra.mxu3 %v4426_v29  ;;  %v5511_v20 = vld [vmem:[%s8590_s3 + $0x244] sm:$0xf]  ;;  %v4215_v24 = vld [vmem:[%s8590_s3 + $0x350] sm:$0xf0]  ;;  %v4490_v27 = vor.u32 %v5611_v18, %v4487_v19  ;;  %v5466_v14 = vld [vmem:[%s8590_s3 + $0xd4] sm:$0xf0] }
  0x48   :  { %1362 = vmatpush.bf16.msra.mxu2 %v3930_v34  ;;  %1369 = vmatpush.bf16.msra.mxu0 %v4154_v39  ;;  %v5543_v23 = vld [vmem:[%s8590_s3 + $0x344] sm:$0xf]  ;;  %v4343_v26 = vld [vmem:[%s8590_s3 + $0x450] sm:$0xf0]  ;;  %v4090_v28 = vor.u32 %v5511_v20, %v4087_v22  ;;  %v4157_v20 = vld [vmem:[%s8590_s3 + $0x2c8] sm:$0xf] }
  0x49   :  { %1382 = vmatpush.bf16.msra.mxu1 %v4282_v40  ;;  %v5575_v25 = vld [vmem:[%s8590_s3 + $0x444] sm:$0xf]  ;;  %v4218_v29 = vor.u32 %v5543_v23, %v4215_v24  ;;  %v4471_v32 = vld [vmem:[%s8590_s3 + $0x550] sm:$0xf0]  ;;  %v5530_v22 = vld [vmem:[%s8590_s3 + $0x2d4] sm:$0xf0] }
  0x4a   :  { %v5607_v31 = vld [vmem:[%s8590_s3 + $0x544] sm:$0xf]  ;;  %v4346_v34 = vor.u32 %v5575_v25, %v4343_v26  ;;  %v4071_v36 = vld [vmem:[%s8590_s3 + $0x230] sm:$0xf0]  ;;  %v4285_v23 = vld [vmem:[%s8590_s3 + $0x3c8] sm:$0xf] }
  0x4b   :  { %1395 = vmatpush.bf16.msra.mxu3 %v4410_v44  ;;  %1363 = vmatmul.bf16.vlgmr.msra.gmra.mxu2 %v6322_v7  ;;  %v5507_v33 = vld [vmem:[%s8590_s3 + $0x224] sm:$0xf]  ;;  %v4327_v40 = vld [vmem:[%s8590_s3 + $0x430] sm:$0xf0]  ;;  %v4474_v41 = vor.u32 %v5607_v31, %v4471_v32  ;;  %v5562_v24 = vld [vmem:[%s8590_s3 + $0x3d4] sm:$0xf0] }
  0x4c   :  { %1407 = vmatpush.bf16.msrb.mxu2 %v4554_v38  ;;  %1370 = vmatpush.bf16.msra.mxu0 %v4138_v53  ;;  %v5539_v37 = vld [vmem:[%s8590_s3 + $0x324] sm:$0xf]  ;;  %v4199_v38 = vld [vmem:[%s8590_s3 + $0x330] sm:$0xf0]  ;;  %v4074_v44 = vor.u32 %v5507_v33, %v4071_v36  ;;  %v3885_v26 = vld [vmem:[%s8590_s3 + $0xa8] sm:$0xf] }
  0x4d   :  { %1383 = vmatpush.bf16.msra.mxu1 %v4266_v54  ;;  %v5571_v39 = vld [vmem:[%s8590_s3 + $0x424] sm:$0xf]  ;;  %v4455_v43 = vld [vmem:[%s8590_s3 + $0x530] sm:$0xf0]  ;;  %v4202_v46 = vor.u32 %v5539_v37, %v4199_v38 }
  0x4e   :  { %v5603_v42 = vld [vmem:[%s8590_s3 + $0x524] sm:$0xf]  ;;  %v4055_v48 = vld [vmem:[%s8590_s3 + $0x210] sm:$0xf0]  ;;  %v4330_v50 = vor.u32 %v5571_v39, %v4327_v40 }
  0x4f   :  { %1396 = vmatpush.bf16.msra.mxu3 %v4394_v60  ;;  %v5503_v47 = vld [vmem:[%s8590_s3 + $0x204] sm:$0xf]  ;;  %v4311_v54 = vld [vmem:[%s8590_s3 + $0x410] sm:$0xf0]  ;;  %v4458_v60 = vor.u32 %v5603_v42, %v4455_v43 }
  0x50   :  { %1408 = vmatpush.bf16.msrb.mxu2 %v4538_v52  ;;  %1371 = vmatpush.bf16.msra.mxu0 %v4122_v3  ;;  %v5535_v49 = vld [vmem:[%s8590_s3 + $0x304] sm:$0xf]  ;;  %v4183_v52 = vld [vmem:[%s8590_s3 + $0x310] sm:$0xf0]  ;;  %v4058_v0 = vor.u32 %v5503_v47, %v4055_v48 }
  0x51   :  { %1384 = vmatpush.bf16.msra.mxu1 %v4250_v4  ;;  %v5567_v53 = vld [vmem:[%s8590_s3 + $0x404] sm:$0xf]  ;;  %v4567_v63 = vld [vmem:[%s8590_s3 + $0x610] sm:$0xf0]  ;;  %v4186_v1 = vor.u32 %v5535_v49, %v4183_v52  ;;  %v4173_v4 = vld [vmem:[%s8590_s3 + $0x2e8] sm:$0xf] }
  0x52   :  { %v5631_v62 = vld [vmem:[%s8590_s3 + $0x604] sm:$0xf]  ;;  %v4439_v3 = vld [vmem:[%s8590_s3 + $0x510] sm:$0xf0]  ;;  %v4314_v5 = vor.u32 %v5567_v53, %v4311_v54  ;;  %v4174_v18 = vor.u32 %v5534_v8, %v4173_v4 }
  0x53   :  { %1397 = vmatpush.bf16.msra.mxu3 %v4378_v9  ;;  %v4301_v9 = vld [vmem:[%s8590_s3 + $0x3e8] sm:$0xf]  ;;  %v4570_v12 = vor.u32 %v5631_v62, %v4567_v63 }
  0x54   :  { %1409 = vmatpush.bf16.msrb.mxu2 %v4522_v2  ;;  %1372 = vmatpush.bf16.msra.mxu0 %v4106_v16  ;;  %v5599_v2 = vld [vmem:[%s8590_s3 + $0x504] sm:$0xf]  ;;  %v4029_v16 = vld [vmem:[%s8590_s3 + $0x1c8] sm:$0xf]  ;;  %v4302_v19 = vor.u32 %v5566_v10, %v4301_v9 }
  0x55   :  { %1385 = vmatpush.bf16.msra.mxu1 %v4234_v17  ;;  %v5498_v17 = vld [vmem:[%s8590_s3 + $0x1d4] sm:$0xf0] }
  0x56   :  { %v4030_v25 = vor.u32 %v5498_v17, %v4029_v16 }
  0x57   :  { %1398 = vmatpush.bf16.msra.mxu3 %v4362_v21  ;;  %v3902_v21 = vor.u32 %v5466_v14, %v3901_v13 }
  0x58   :  { %1410 = vmatpush.bf16.msrb.mxu2 %v4506_v15  ;;  %1373 = vmatpush.bf16.msra.mxu0 %v4090_v28  ;;  %v4442_v15 = vor.u32 %v5599_v2, %v4439_v3  ;;  %v4013_v28 = vld [vmem:[%s8590_s3 + $0x1a8] sm:$0xf] }
  0x59   :  { %1386 = vmatpush.bf16.msra.mxu1 %v4218_v29  ;;  %v5494_v29 = vld [vmem:[%s8590_s3 + $0x1b4] sm:$0xf0] }
  0x5b   :  { %1399 = vmatpush.bf16.msra.mxu3 %v4346_v34 }
  0x5c   :  { %1411 = vmatpush.bf16.msrb.mxu2 %v4490_v27  ;;  %1374 = vmatpush.bf16.msra.mxu0 %v4074_v44  ;;  %v5462_v27 = vld [vmem:[%s8590_s3 + $0xb4] sm:$0xf0] }
  0x5d   :  { %1387 = vmatpush.bf16.msra.mxu1 %v4202_v46 }
  0x5f   :  { %1400 = vmatpush.bf16.msra.mxu3 %v4330_v50 }
  0x60   :  { %1412 = vmatpush.bf16.msrb.mxu2 %v4474_v41  ;;  %1375 = vmatpush.bf16.msra.mxu0 %v4058_v0 }
  0x61   :  { %1388 = vmatpush.bf16.msra.mxu1 %v4186_v1 }
  0x63   :  { %1401 = vmatpush.bf16.msra.mxu3 %v4314_v5  ;;  %1376 = vmatmul.bf16.vlgmr.msra.gmra.mxu0 %v6278_v51 }
  0x64   :  { %1413 = vmatpush.bf16.msrb.mxu2 %v4458_v60  ;;  %1427 = vmatpush.bf16.msrb.mxu0 %v4570_v12 }
  0x65   :  { %1433 = vmatpush.bf16.msrb.mxu1 %v3918_v6 }
  0x67   :  { %1446 = vmatpush.bf16.msrb.mxu3 %v4046_v11 }
  0x68   :  { %1414 = vmatpush.bf16.msrb.mxu2 %v4442_v15 }
  0x69   :  { %21 = vsyncpa [#allocation5], 0  ;;  %1459 = vmatpush.bf16.msra.mxu0 %v4174_v18  ;;  %v4158_v31 = vor.u32 %v5530_v22, %v4157_v20  ;;  %v4286_v32 = vor.u32 %v5562_v24, %v4285_v23  ;;  %v4141_v33 = vld [vmem:[%s8590_s3 + $0x2a8] sm:$0xf]  ;;  %1434 = vmatpush.bf16.msrb.mxu1 %v3902_v21  ;;  %v3886_v34 = vor.u32 %v5462_v27, %v3885_v26  ;;  %v5526_v36 = vld [vmem:[%s8590_s3 + $0x2b4] sm:$0xf0] }
  0x6a   :  { %1402 = vmatmul.bf16.vlgmr.msra.gmra.mxu3 %v6492_v30  ;;  %v4269_v37 = vld [vmem:[%s8590_s3 + $0x3a8] sm:$0xf]  ;;  %v5558_v38 = vld [vmem:[%s8590_s3 + $0x3b4] sm:$0xf0]  ;;  %v4014_v39 = vor.u32 %v5494_v29, %v4013_v28  ;;  %1389 = vmatmul.bf16.vlgmr.msra.gmra.mxu1 %v6291_v57  ;;  %v4142_v44 = vor.u32 %v5526_v36, %v4141_v33  ;;  %vm2028_vm1 = vcmask 162816   ;;  %vm1933_vm2 = vcmask 1044480  }
  0x6b   :  { %1447 = vmatpush.bf16.msrb.mxu3 %v4030_v25  ;;  %1415 = vmatmul.bf16.vlgmr.msrb.gmra.mxu2 %v6503_v35  ;;  %v3869_v40 = vld [vmem:[%s8590_s3 + $0x88] sm:$0xf]  ;;  %v5458_v41 = vld [vmem:[%s8590_s3 + $0x94] sm:$0xf0]  ;;  %v4270_v46 = vor.u32 %v5558_v38, %v4269_v37  ;;  %vm1929_vm4 = vcmask 80896   ;;  %vm2032_vm5 = vcmask 1041408  }
  0x6c   :  { %1472 = vmatpush.bf16.msra.mxu2 %v4302_v19  ;;  %v3997_v42 = vld [vmem:[%s8590_s3 + $0x188] sm:$0xf]  ;;  %v5490_v43 = vld [vmem:[%s8590_s3 + $0x194] sm:$0xf0]  ;;  %v3870_v48 = vor.u32 %v5458_v41, %v3869_v40  ;;  %s3777_s30 = sshll.u32 %s8601_s14, 4  ;;  %s5962_s14 = smov [#allocation2]   ;;  %s3778_s30 = int_to_ptr.hbm [resolvable:$true] %s3777_s30 }
  0x6d   :  { %1460 = vmatpush.bf16.msra.mxu0 %v4158_v31  ;;  %v4125_v47 = vld [vmem:[%s8590_s3 + $0x288] sm:$0xf]  ;;  %1435 = vmatpush.bf16.msrb.mxu1 %v3886_v34  ;;  %v5522_v49 = vld [vmem:[%s8590_s3 + $0x294] sm:$0xf0]  ;;  %v3998_v53 = vor.u32 %v5490_v43, %v3997_v42  ;;  %s3753_s15 = sshll.u32 %s5962_s14, 4  ;;  %s3755_s18 = sshll.u32 %s8599_s12, 4  ;;  %s3754_s15 = int_to_ptr.vmem [resolvable:$true] %s3753_s15  ;;  %s3756_s18 = int_to_ptr.hbm [resolvable:$true] %s3755_s18 }
  0x6e   :  { %v4253_v50 = vld [vmem:[%s8590_s3 + $0x388] sm:$0xf]  ;;  %v5554_v52 = vld [vmem:[%s8590_s3 + $0x394] sm:$0xf0]  ;;  %v4126_v60 = vor.u32 %v5522_v49, %v4125_v47  ;;  %v5468_v47 = vld [vmem:[%s8590_s3 + $0xec] sm:$0xf] }
  0x6f   :  { %1448 = vmatpush.bf16.msrb.mxu3 %v4014_v39  ;;  %v3853_v54 = vld [vmem:[%s8590_s3 + $0x68] sm:$0xf]  ;;  %v5454_v56 = vld [vmem:[%s8590_s3 + $0x74] sm:$0xf0]  ;;  %v4254_v61 = vor.u32 %v5554_v52, %v4253_v50  ;;  %v3919_v50 = vld [vmem:[%s8590_s3 + $0xf8] sm:$0xf0] }
  0x70   :  { %1473 = vmatpush.bf16.msra.mxu2 %v4286_v32  ;;  %v3981_v58 = vld [vmem:[%s8590_s3 + $0x168] sm:$0xf]  ;;  %v5486_v59 = vld [vmem:[%s8590_s3 + $0x174] sm:$0xf0]  ;;  %v3854_v63 = vor.u32 %v5454_v56, %v3853_v54 }
  0x71   :  { %1461 = vmatpush.bf16.msra.mxu0 %v4142_v44  ;;  %v4109_v62 = vld [vmem:[%s8590_s3 + $0x268] sm:$0xf]  ;;  %1436 = vmatpush.bf16.msrb.mxu1 %v3870_v48  ;;  %v5518_v0 = vld [vmem:[%s8590_s3 + $0x274] sm:$0xf0]  ;;  %v3982_v3 = vor.u32 %v5486_v59, %v3981_v58 }
  0x72   :  { %v4237_v1 = vld [vmem:[%s8590_s3 + $0x368] sm:$0xf]  ;;  %v5550_v2 = vld [vmem:[%s8590_s3 + $0x374] sm:$0xf0]  ;;  %v4110_v9 = vor.u32 %v5518_v0, %v4109_v62 }
  0x73   :  { %1449 = vmatpush.bf16.msrb.mxu3 %v3998_v53  ;;  %v3837_v4 = vld [vmem:[%s8590_s3 + $0x48] sm:$0xf]  ;;  %v5450_v5 = vld [vmem:[%s8590_s3 + $0x54] sm:$0xf0]  ;;  %v4238_v10 = vor.u32 %v5550_v2, %v4237_v1  ;;  %4580 = vmatmul.msk.bf16.vlgmr.msrb.gmra.mxu0 %vm1247_vm0, %v6401_v45  ;;  %v5500_v1 = vld [vmem:[%s8590_s3 + $0x1ec] sm:$0xf] }
  0x74   :  { %1474 = vmatpush.bf16.msra.mxu2 %v4270_v46  ;;  %v3965_v6 = vld [vmem:[%s8590_s3 + $0x148] sm:$0xf]  ;;  %v5482_v8 = vld [vmem:[%s8590_s3 + $0x154] sm:$0xf0]  ;;  %v3838_v12 = vor.u32 %v5450_v5, %v3837_v4  ;;  %v4047_v2 = vld [vmem:[%s8590_s3 + $0x1f8] sm:$0xf0] }
  0x75   :  { %1462 = vmatpush.bf16.msra.mxu0 %v4126_v60  ;;  %v4093_v11 = vld [vmem:[%s8590_s3 + $0x248] sm:$0xf]  ;;  %1437 = vmatpush.bf16.msrb.mxu1 %v3854_v63  ;;  %v5514_v13 = vld [vmem:[%s8590_s3 + $0x254] sm:$0xf0]  ;;  %v3966_v16 = vor.u32 %v5482_v8, %v3965_v6  ;;  %v3922_v63 = vor.u32 %v5468_v47, %v3919_v50  ;;  %v5464_v4 = vld [vmem:[%s8590_s3 + $0xcc] sm:$0xf] }
  0x76   :  { %v4221_v14 = vld [vmem:[%s8590_s3 + $0x348] sm:$0xf]  ;;  %v5546_v15 = vld [vmem:[%s8590_s3 + $0x354] sm:$0xf0]  ;;  %v4094_v21 = vor.u32 %v5514_v13, %v4093_v11  ;;  %v3903_v5 = vld [vmem:[%s8590_s3 + $0xd8] sm:$0xf0] }
  0x77   :  { %1450 = vmatpush.bf16.msrb.mxu3 %v3982_v3  ;;  %v3821_v17 = vld [vmem:[%s8590_s3 + $0x28] sm:$0xf]  ;;  %v5446_v18 = vld [vmem:[%s8590_s3 + $0x34] sm:$0xf0]  ;;  %v4222_v22 = vor.u32 %v5546_v15, %v4221_v14  ;;  %v3906_v13 = vor.u32 %v5464_v4, %v3903_v5  ;;  %v5496_v14 = vld [vmem:[%s8590_s3 + $0x1cc] sm:$0xf] }
  0x78   :  { %1475 = vmatpush.bf16.msra.mxu2 %v4254_v61  ;;  %v3949_v19 = vld [vmem:[%s8590_s3 + $0x128] sm:$0xf]  ;;  %v5478_v20 = vld [vmem:[%s8590_s3 + $0x134] sm:$0xf0]  ;;  %v3822_v25 = vor.u32 %v5446_v18, %v3821_v17  ;;  %v4031_v15 = vld [vmem:[%s8590_s3 + $0x1d8] sm:$0xf0] }
  0x79   :  { %1463 = vmatpush.bf16.msra.mxu0 %v4110_v9  ;;  %v4077_v23 = vld [vmem:[%s8590_s3 + $0x228] sm:$0xf]  ;;  %v5510_v24 = vld [vmem:[%s8590_s3 + $0x234] sm:$0xf0]  ;;  %1438 = vmatpush.bf16.msrb.mxu1 %v3838_v12  ;;  %v3950_v29 = vor.u32 %v5478_v20, %v3949_v19  ;;  %v5460_v17 = vld [vmem:[%s8590_s3 + $0xac] sm:$0xf] }
  0x7a   :  { %v4205_v26 = vld [vmem:[%s8590_s3 + $0x328] sm:$0xf]  ;;  %v5542_v27 = vld [vmem:[%s8590_s3 + $0x334] sm:$0xf0]  ;;  %v4078_v38 = vor.u32 %v5510_v24, %v4077_v23  ;;  %v3887_v18 = vld [vmem:[%s8590_s3 + $0xb8] sm:$0xf0] }
  0x7b   :  { %v3805_v28 = vld [vmem:[%s8590_s3 + $0x8] sm:$0xf]  ;;  %1451 = vmatpush.bf16.msrb.mxu3 %v3966_v16  ;;  %v5442_v31 = vld [vmem:[%s8590_s3 + $0x14] sm:$0xf0]  ;;  %v4206_v39 = vor.u32 %v5542_v27, %v4205_v26  ;;  %v5492_v26 = vld [vmem:[%s8590_s3 + $0x1ac] sm:$0xf] }
  0x7c   :  { %1476 = vmatpush.bf16.msra.mxu2 %v4238_v10  ;;  %v3933_v32 = vld [vmem:[%s8590_s3 + $0x108] sm:$0xf]  ;;  %v5474_v33 = vld [vmem:[%s8590_s3 + $0x114] sm:$0xf0]  ;;  %v3806_v43 = vor.u32 %v5442_v31, %v3805_v28  ;;  %v4050_v10 = vor.u32 %v5500_v1, %v4047_v2  ;;  %v4015_v27 = vld [vmem:[%s8590_s3 + $0x1b8] sm:$0xf0] }
  0x7d   :  { %v4429_v34 = vld [vmem:[%s8590_s3 + $0x4e8] sm:$0xf]  ;;  %v5598_v36 = vld [vmem:[%s8590_s3 + $0x4f4] sm:$0xf0]  ;;  %1464 = vmatpush.bf16.msra.mxu0 %v4094_v21  ;;  %1439 = vmatpush.bf16.msrb.mxu1 %v3822_v25  ;;  %v3934_v48 = vor.u32 %v5474_v33, %v3933_v32  ;;  %v3890_v25 = vor.u32 %v5460_v17, %v3887_v18  ;;  %v3871_v31 = vld [vmem:[%s8590_s3 + $0x98] sm:$0xf0] }
  0x7e   :  { %v4557_v37 = vld [vmem:[%s8590_s3 + $0x5e8] sm:$0xf]  ;;  %v5630_v40 = vld [vmem:[%s8590_s3 + $0x5f4] sm:$0xf0]  ;;  %v4430_v49 = vor.u32 %v5598_v36, %v4429_v34  ;;  %v4018_v36 = vor.u32 %v5492_v26, %v4015_v27  ;;  %v5480_v4 = vld [vmem:[%s8590_s3 + $0x14c] sm:$0xf] }
  0x7f   :  { %v4061_v41 = vld [vmem:[%s8590_s3 + $0x208] sm:$0xf]  ;;  %v5506_v42 = vld [vmem:[%s8590_s3 + $0x214] sm:$0xf0]  ;;  %1452 = vmatpush.bf16.msrb.mxu3 %v3950_v29  ;;  %v4558_v54 = vor.u32 %v5630_v40, %v4557_v37  ;;  %v5456_v29 = vld [vmem:[%s8590_s3 + $0x8c] sm:$0xf] }
  0x80   :  { %1477 = vmatpush.bf16.msra.mxu2 %v4222_v22  ;;  %v4189_v44 = vld [vmem:[%s8590_s3 + $0x308] sm:$0xf]  ;;  %v5538_v46 = vld [vmem:[%s8590_s3 + $0x314] sm:$0xf0]  ;;  %v4062_v59 = vor.u32 %v5506_v42, %v4061_v41  ;;  %v4034_v22 = vor.u32 %v5496_v14, %v4031_v15  ;;  %v5488_v40 = vld [vmem:[%s8590_s3 + $0x18c] sm:$0xf] }
  0x81   :  { %v4573_v52 = vld [vmem:[%s8590_s3 + $0x608] sm:$0xf]  ;;  %v5634_v53 = vld [vmem:[%s8590_s3 + $0x614] sm:$0xf0]  ;;  %1465 = vmatpush.bf16.msra.mxu0 %v4078_v38  ;;  %v4190_v60 = vor.u32 %v5538_v46, %v4189_v44  ;;  %1440 = vmatpush.bf16.msrb.mxu1 %v3806_v43  ;;  %v3999_v41 = vld [vmem:[%s8590_s3 + $0x198] sm:$0xf0] }
  0x82   :  { %v4413_v56 = vld [vmem:[%s8590_s3 + $0x4c8] sm:$0xf]  ;;  %v5594_v58 = vld [vmem:[%s8590_s3 + $0x4d4] sm:$0xf0]  ;;  %v4574_v0 = vor.u32 %v5634_v53, %v4573_v52  ;;  %v5452_v43 = vld [vmem:[%s8590_s3 + $0x6c] sm:$0xf] }
  0x83   :  { %v4541_v61 = vld [vmem:[%s8590_s3 + $0x5c8] sm:$0xf]  ;;  %v5626_v62 = vld [vmem:[%s8590_s3 + $0x5d4] sm:$0xf0]  ;;  %1453 = vmatpush.bf16.msrb.mxu3 %v3934_v48  ;;  %v4414_v3 = vor.u32 %v5594_v58, %v4413_v56  ;;  %v3855_v44 = vld [vmem:[%s8590_s3 + $0x78] sm:$0xf0] }
  0x84   :  { %1478 = vmatpush.bf16.msra.mxu2 %v4206_v39  ;;  %v4542_v6 = vor.u32 %v5626_v62, %v4541_v61  ;;  %v4397_v8 = vld [vmem:[%s8590_s3 + $0x4a8] sm:$0xf]  ;;  %v5590_v9 = vld [vmem:[%s8590_s3 + $0x4b4] sm:$0xf0]  ;;  %1441 = vmatmul.bf16.vlgmr.msrb.gmra.mxu1 %v6289_v55  ;;  %v3874_v39 = vor.u32 %v5456_v29, %v3871_v31  ;;  %v3858_v53 = vor.u32 %v5452_v43, %v3855_v44  ;;  %v3983_v56 = vld [vmem:[%s8590_s3 + $0x178] sm:$0xf0] }
  0x85   :  { %1485 = vmatpush.bf16.msra.mxu1 %v4430_v49  ;;  %1466 = vmatpush.bf16.msra.mxu0 %v4062_v59  ;;  %v4525_v11 = vld [vmem:[%s8590_s3 + $0x5a8] sm:$0xf]  ;;  %v5622_v12 = vld [vmem:[%s8590_s3 + $0x5b4] sm:$0xf0]  ;;  %v4398_v16 = vor.u32 %v5590_v9, %v4397_v8  ;;  %v4002_v49 = vor.u32 %v5488_v40, %v3999_v41  ;;  %v5448_v59 = vld [vmem:[%s8590_s3 + $0x4c] sm:$0xf] }
  0x86   :  { %1454 = vmatmul.bf16.vlgmr.msrb.gmra.mxu3 %v6322_v7  ;;  %v4526_v19 = vor.u32 %v5622_v12, %v4525_v11  ;;  %v4381_v20 = vld [vmem:[%s8590_s3 + $0x488] sm:$0xf]  ;;  %v5586_v21 = vld [vmem:[%s8590_s3 + $0x494] sm:$0xf0]  ;;  %v3967_v5 = vld [vmem:[%s8590_s3 + $0x158] sm:$0xf0] }
  0x87   :  { %1498 = vmatpush.bf16.msra.mxu3 %v4558_v54  ;;  %v4509_v23 = vld [vmem:[%s8590_s3 + $0x588] sm:$0xf]  ;;  %v5618_v24 = vld [vmem:[%s8590_s3 + $0x594] sm:$0xf0]  ;;  %v4382_v28 = vor.u32 %v5586_v21, %v4381_v20  ;;  %v5484_v54 = vld [vmem:[%s8590_s3 + $0x16c] sm:$0xf]  ;;  %v3970_v15 = vor.u32 %v5480_v4, %v3967_v5 }
  0x88   :  { %1479 = vmatpush.bf16.msra.mxu2 %v4190_v60  ;;  %1467 = vmatmul.bf16.vlgmr.msra.gmra.mxu0 %v6278_v51  ;;  %v4510_v32 = vor.u32 %v5618_v24, %v4509_v23  ;;  %v4365_v33 = vld [vmem:[%s8590_s3 + $0x468] sm:$0xf]  ;;  %v5582_v34 = vld [vmem:[%s8590_s3 + $0x474] sm:$0xf0]  ;;  %v3839_v60 = vld [vmem:[%s8590_s3 + $0x58] sm:$0xf0] }
  0x89   :  { %1518 = vmatpush.bf16.msrb.mxu0 %v4574_v0  ;;  %1486 = vmatpush.bf16.msra.mxu1 %v4414_v3  ;;  %v4493_v37 = vld [vmem:[%s8590_s3 + $0x568] sm:$0xf]  ;;  %v5614_v38 = vld [vmem:[%s8590_s3 + $0x574] sm:$0xf0]  ;;  %v4366_v42 = vor.u32 %v5582_v34, %v4365_v33  ;;  %v3986_v0 = vor.u32 %v5484_v54, %v3983_v56  ;;  %v3842_v3 = vor.u32 %v5448_v59, %v3839_v60  ;;  %v5444_v8 = vld [vmem:[%s8590_s3 + $0x2c] sm:$0xf] }
  0x8a   :  { %v4494_v46 = vor.u32 %v5614_v38, %v4493_v37  ;;  %v4349_v47 = vld [vmem:[%s8590_s3 + $0x448] sm:$0xf]  ;;  %v5578_v48 = vld [vmem:[%s8590_s3 + $0x454] sm:$0xf0]  ;;  %v3823_v9 = vld [vmem:[%s8590_s3 + $0x38] sm:$0xf0] }
  0x8b   :  { %1499 = vmatpush.bf16.msra.mxu3 %v4542_v6  ;;  %1480 = vmatmul.bf16.vlgmr.msra.gmra.mxu2 %v6291_v57  ;;  %v4477_v50 = vld [vmem:[%s8590_s3 + $0x548] sm:$0xf]  ;;  %v5610_v52 = vld [vmem:[%s8590_s3 + $0x554] sm:$0xf0]  ;;  %v4350_v58 = vor.u32 %v5578_v48, %v4349_v47  ;;  %v4175_v17 = vld [vmem:[%s8590_s3 + $0x2f8] sm:$0xf0] }
  0x8c   :  { %1524 = vmatpush.bf16.msrb.mxu2 %v3922_v63  ;;  %v4478_v61 = vor.u32 %v5610_v52, %v4477_v50  ;;  %v4333_v62 = vld [vmem:[%s8590_s3 + $0x428] sm:$0xf]  ;;  %v5574_v63 = vld [vmem:[%s8590_s3 + $0x434] sm:$0xf0]  ;;  %v5564_v18 = vld [vmem:[%s8590_s3 + $0x3ec] sm:$0xf] }
  0x8d   :  { %1537 = vmatpush.bf16.msra.mxu0 %v4050_v10  ;;  %1487 = vmatpush.bf16.msra.mxu1 %v4398_v16  ;;  %v4461_v1 = vld [vmem:[%s8590_s3 + $0x528] sm:$0xf]  ;;  %v5606_v2 = vld [vmem:[%s8590_s3 + $0x534] sm:$0xf0]  ;;  %v4334_v6 = vor.u32 %v5574_v63, %v4333_v62  ;;  %v5532_v16 = vld [vmem:[%s8590_s3 + $0x2ec] sm:$0xf] }
  0x8e   :  { %v4317_v10 = vld [vmem:[%s8590_s3 + $0x408] sm:$0xf]  ;;  %v4462_v11 = vor.u32 %v5606_v2, %v4461_v1  ;;  %v5570_v12 = vld [vmem:[%s8590_s3 + $0x414] sm:$0xf0]  ;;  %v4303_v20 = vld [vmem:[%s8590_s3 + $0x3f8] sm:$0xf0]  ;;  %v4178_v27 = vor.u32 %v5532_v16, %v4175_v17 }
  0x8f   :  { %1500 = vmatpush.bf16.msra.mxu3 %v4526_v19  ;;  %v5602_v14 = vld [vmem:[%s8590_s3 + $0x514] sm:$0xf0]  ;;  %v3826_v19 = vor.u32 %v5444_v8, %v3823_v9  ;;  %v5476_v21 = vld [vmem:[%s8590_s3 + $0x12c] sm:$0xf]  ;;  %v4318_v23 = vor.u32 %v5570_v12, %v4317_v10  ;;  %v4431_v29 = vld [vmem:[%s8590_s3 + $0x4f8] sm:$0xf0]  ;;  %v4306_v31 = vor.u32 %v5564_v18, %v4303_v20 }
  0x90   :  { %1525 = vmatpush.bf16.msrb.mxu2 %v3906_v13  ;;  %v4445_v13 = vld [vmem:[%s8590_s3 + $0x508] sm:$0xf]  ;;  %v5440_v24 = vld [vmem:[%s8590_s3 + $0xc] sm:$0xf]  ;;  %v4159_v34 = vld [vmem:[%s8590_s3 + $0x2d8] sm:$0xf0] }
  0x91   :  { %1538 = vmatpush.bf16.msra.mxu0 %v4034_v22  ;;  %1488 = vmatpush.bf16.msra.mxu1 %v4382_v28  ;;  %v3951_v22 = vld [vmem:[%s8590_s3 + $0x138] sm:$0xf0]  ;;  %v4446_v26 = vor.u32 %v5602_v14, %v4445_v13  ;;  %v5596_v28 = vld [vmem:[%s8590_s3 + $0x4ec] sm:$0xf] }
  0x92   :  { %v5528_v33 = vld [vmem:[%s8590_s3 + $0x2cc] sm:$0xf]  ;;  %v4287_v38 = vld [vmem:[%s8590_s3 + $0x3d8] sm:$0xf0]  ;;  %v4434_v41 = vor.u32 %v5596_v28, %v4431_v29 }
  0x93   :  { %1501 = vmatpush.bf16.msra.mxu3 %v4510_v32  ;;  %v3954_v32 = vor.u32 %v5476_v21, %v3951_v22  ;;  %v3935_v40 = vld [vmem:[%s8590_s3 + $0x118] sm:$0xf0]  ;;  %v4162_v44 = vor.u32 %v5528_v33, %v4159_v34  ;;  %v5524_v50 = vld [vmem:[%s8590_s3 + $0x2ac] sm:$0xf] }
  0x94   :  { %1526 = vmatpush.bf16.msrb.mxu2 %v3890_v25  ;;  %v3807_v25 = vld [vmem:[%s8590_s3 + $0x18] sm:$0xf0]  ;;  %v5556_v54 = vld [vmem:[%s8590_s3 + $0x3ac] sm:$0xf] }
  0x95   :  { %1539 = vmatpush.bf16.msra.mxu0 %v4018_v36  ;;  %1489 = vmatpush.bf16.msra.mxu1 %v4366_v42  ;;  %v5560_v36 = vld [vmem:[%s8590_s3 + $0x3cc] sm:$0xf]  ;;  %v3810_v37 = vor.u32 %v5440_v24, %v3807_v25  ;;  %v4559_v43 = vld [vmem:[%s8590_s3 + $0x5f8] sm:$0xf0] }
  0x96   :  { %v5628_v42 = vld [vmem:[%s8590_s3 + $0x5ec] sm:$0xf]  ;;  %v4415_v47 = vld [vmem:[%s8590_s3 + $0x4d8] sm:$0xf0]  ;;  %v4290_v48 = vor.u32 %v5560_v36, %v4287_v38 }
  0x97   :  { %1502 = vmatpush.bf16.msra.mxu3 %v4494_v46  ;;  %v5592_v46 = vld [vmem:[%s8590_s3 + $0x4cc] sm:$0xf]  ;;  %v4143_v52 = vld [vmem:[%s8590_s3 + $0x2b8] sm:$0xf0] }
  0x98   :  { %1527 = vmatpush.bf16.msrb.mxu2 %v3874_v39  ;;  %4581 = vmatmul.msk.bf16.vlgmr.msrb.gmra.mxu0 %vm1247_vm0, %v6401_v45  ;;  %v5472_v39 = vld [vmem:[%s8590_s3 + $0x10c] sm:$0xf]  ;;  %v4271_v56 = vld [vmem:[%s8590_s3 + $0x3b8] sm:$0xf0] }
  0x99   :  { %1540 = vmatpush.bf16.msra.mxu0 %v4002_v49  ;;  %1490 = vmatpush.bf16.msra.mxu1 %v4350_v58  ;;  %v3938_v49 = vor.u32 %v5472_v39, %v3935_v40  ;;  %v4418_v58 = vor.u32 %v5592_v46, %v4415_v47  ;;  %v5624_v59 = vld [vmem:[%s8590_s3 + $0x5cc] sm:$0xf]  ;;  %v4543_v60 = vld [vmem:[%s8590_s3 + $0x5d8] sm:$0xf0] }
  0x9a   :  { %v5588_v62 = vld [vmem:[%s8590_s3 + $0x4ac] sm:$0xf]  ;;  %v4399_v63 = vld [vmem:[%s8590_s3 + $0x4b8] sm:$0xf0] }
  0x9b   :  { %1503 = vmatpush.bf16.msra.mxu3 %v4478_v61  ;;  %v4146_v61 = vor.u32 %v5524_v50, %v4143_v52  ;;  %v5520_v1 = vld [vmem:[%s8590_s3 + $0x28c] sm:$0xf]  ;;  %v4127_v2 = vld [vmem:[%s8590_s3 + $0x298] sm:$0xf0] }
  0x9c   :  { %1528 = vmatpush.bf16.msrb.mxu2 %v3858_v53  ;;  %v4562_v53 = vor.u32 %v5628_v42, %v4559_v43  ;;  %v5552_v4 = vld [vmem:[%s8590_s3 + $0x38c] sm:$0xf]  ;;  %v4255_v5 = vld [vmem:[%s8590_s3 + $0x398] sm:$0xf0]  ;;  %v4130_v10 = vor.u32 %v5520_v1, %v4127_v2 }
  0x9d   :  { %1541 = vmatpush.bf16.msra.mxu0 %v3986_v0  ;;  %1491 = vmatpush.bf16.msra.mxu1 %v4334_v6  ;;  %v4274_v0 = vor.u32 %v5556_v54, %v4271_v56  ;;  %v4402_v6 = vor.u32 %v5588_v62, %v4399_v63  ;;  %v5620_v8 = vld [vmem:[%s8590_s3 + $0x5ac] sm:$0xf]  ;;  %v4527_v9 = vld [vmem:[%s8590_s3 + $0x5b8] sm:$0xf0]  ;;  %v4258_v12 = vor.u32 %v5552_v4, %v4255_v5 }
  0x9e   :  { %v5516_v13 = vld [vmem:[%s8590_s3 + $0x26c] sm:$0xf]  ;;  %v4111_v14 = vld [vmem:[%s8590_s3 + $0x278] sm:$0xf0] }
  0x9f   :  { %1504 = vmatpush.bf16.msra.mxu3 %v4462_v11  ;;  %v5584_v11 = vld [vmem:[%s8590_s3 + $0x48c] sm:$0xf]  ;;  %v4511_v20 = vld [vmem:[%s8590_s3 + $0x598] sm:$0xf0]  ;;  %v4114_v21 = vor.u32 %v5516_v13, %v4111_v14 }
  0xa0   :  { %1529 = vmatpush.bf16.msrb.mxu2 %v3842_v3  ;;  %v4546_v3 = vor.u32 %v5624_v59, %v4543_v60  ;;  %v5548_v16 = vld [vmem:[%s8590_s3 + $0x36c] sm:$0xf]  ;;  %v4495_v34 = vld [vmem:[%s8590_s3 + $0x578] sm:$0xf0] }
  0xa1   :  { %1542 = vmatpush.bf16.msra.mxu0 %v3970_v15  ;;  %1492 = vmatpush.bf16.msra.mxu1 %v4318_v23  ;;  %v4530_v15 = vor.u32 %v5620_v8, %v4527_v9  ;;  %v5580_v22 = vld [vmem:[%s8590_s3 + $0x46c] sm:$0xf]  ;;  %v4367_v23 = vld [vmem:[%s8590_s3 + $0x478] sm:$0xf0]  ;;  %v7199_v28 = vpop.f32.mrf.mxu1 }
  0xa2   :  { %v5512_v25 = vld [vmem:[%s8590_s3 + $0x24c] sm:$0xf]  ;;  %v4351_v39 = vld [vmem:[%s8590_s3 + $0x458] sm:$0xf0] }
  0xa3   :  { %1505 = vmatpush.bf16.msra.mxu3 %v4446_v26  ;;  %v4095_v26 = vld [vmem:[%s8590_s3 + $0x258] sm:$0xf0]  ;;  %v5544_v29 = vld [vmem:[%s8590_s3 + $0x34c] sm:$0xf] }
  0xa4   :  { %1530 = vmatpush.bf16.msrb.mxu2 %v3826_v19  ;;  %1493 = vmatmul.bf16.vlgmr.msra.gmra.mxu1 %v6492_v30  ;;  %v7179_v17 = vpop.f32.mrf.mxu0  ;;  %v5616_v19 = vld [vmem:[%s8590_s3 + $0x58c] sm:$0xf]  ;;  %v4079_v43 = vld [vmem:[%s8590_s3 + $0x238] sm:$0xf0] }
  0xa5   :  { %1550 = vmatpush.bf16.msrb.mxu1 %v4178_v27  ;;  %1543 = vmatpush.bf16.msra.mxu0 %v3954_v32  ;;  %v4514_v27 = vor.u32 %v5616_v19, %v4511_v20  ;;  %v4370_v32 = vor.u32 %v5580_v22, %v4367_v23  ;;  %v5612_v33 = vld [vmem:[%s8590_s3 + $0x56c] sm:$0xf]  ;;  %v4207_v47 = vld [vmem:[%s8590_s3 + $0x338] sm:$0xf0]  ;;  %v5641_v22 = vld [vmem:[%s8592_s5 + $0x30] sm:$0xff] }
  0xa6   :  { %1506 = vmatmul.bf16.vlgmr.msra.gmra.mxu3 %v6503_v35  ;;  %v5576_v38 = vld [vmem:[%s8590_s3 + $0x44c] sm:$0xf]  ;;  %v4479_v52 = vld [vmem:[%s8590_s3 + $0x558] sm:$0xf0] }
  0xa7   :  { %1563 = vmatpush.bf16.msrb.mxu3 %v4306_v31  ;;  %v4223_v31 = vld [vmem:[%s8590_s3 + $0x358] sm:$0xf0]  ;;  %v5508_v42 = vld [vmem:[%s8590_s3 + $0x22c] sm:$0xf] }
  0xa8   :  { %1531 = vmatpush.bf16.msrb.mxu2 %v3810_v37  ;;  %v4098_v37 = vor.u32 %v5512_v25, %v4095_v26  ;;  %v4226_v40 = vor.u32 %v5544_v29, %v4223_v31  ;;  %v5540_v46 = vld [vmem:[%s8590_s3 + $0x32c] sm:$0xf]  ;;  %v4082_v54 = vor.u32 %v5508_v42, %v4079_v43  ;;  %v4447_v19 = vld [vmem:[%s8590_s3 + $0x518] sm:$0xf0]  ;;  %v5647_v31 = vld [vmem:[%s8592_s5 + $0x60] sm:$0xff] }
  0xa9   :  { %1551 = vmatpush.bf16.msrb.mxu1 %v4162_v44  ;;  %1544 = vmatpush.bf16.msra.mxu0 %v3938_v49  ;;  %v7213_v36 = vpop.f32.mrf.mxu2  ;;  %v4498_v44 = vor.u32 %v5612_v33, %v4495_v34  ;;  %v4354_v49 = vor.u32 %v5576_v38, %v4351_v39  ;;  %v5608_v50 = vld [vmem:[%s8590_s3 + $0x54c] sm:$0xf]  ;;  %v4210_v59 = vor.u32 %v5540_v46, %v4207_v47  ;;  %v1275_v1 = vpop.f32.mrf.mxu1  ;;  %v5650_v20 = vld [vmem:[%s8592_s5 + $0x78] sm:$0xff]  ;;  %v5635_v46 = vld [vmem:[%s8592_s5] sm:$0xff] }
  0xaa   :  { %v5572_v56 = vld [vmem:[%s8590_s3 + $0x42c] sm:$0xf]  ;;  %v4482_v63 = vor.u32 %v5608_v50, %v4479_v52  ;;  %v5646_v34 = vld [vmem:[%s8592_s5 + $0x58] sm:$0xff] }
  0xab   :  { %1564 = vmatpush.bf16.msrb.mxu3 %v4290_v48  ;;  %1532 = vmatmul.bf16.vlgmr.msrb.gmra.mxu2 %v6289_v55  ;;  %v4383_v55 = vld [vmem:[%s8590_s3 + $0x498] sm:$0xf0]  ;;  %v5504_v60 = vld [vmem:[%s8590_s3 + $0x20c] sm:$0xf] }
  0xac   :  { %1576 = vmatpush.bf16.msra.mxu2 %v4434_v41  ;;  %1545 = vmatmul.bf16.vlgmr.msra.gmra.mxu0 %v6322_v7  ;;  %v4239_v7 = vld [vmem:[%s8590_s3 + $0x378] sm:$0xf0]  ;;  %v4386_v18 = vor.u32 %v5584_v11, %v4383_v55  ;;  %v7221_v41 = vpop.f32.mrf.mxu3  ;;  %v1262_v48 = vpop.f32.mrf.mxu0  ;;  %v5536_v62 = vld [vmem:[%s8590_s3 + $0x30c] sm:$0xf] }
  0xad   :  { %1589 = vmatpush.bf16.msrb.mxu0 %v4562_v53  ;;  %1552 = vmatpush.bf16.msrb.mxu1 %v4146_v61  ;;  %v4242_v24 = vor.u32 %v5548_v16, %v4239_v7  ;;  %v7244_v53 = vld [vmem:[%s8591_s4] sm:$0xf]  ;;  %v4063_v61 = vld [vmem:[%s8590_s3 + $0x218] sm:$0xf0]  ;;  %v5632_v2 = vld [vmem:[%s8590_s3 + $0x60c] sm:$0xf] }
  0xae   :  { %v5604_v5 = vld [vmem:[%s8590_s3 + $0x52c] sm:$0xf]  ;;  %v4066_v9 = vor.u32 %v5504_v60, %v4063_v61  ;;  %v4319_v11 = vld [vmem:[%s8590_s3 + $0x418] sm:$0xf0]  ;;  %v259_v55 = vperm.slane %v7244_v53, 0  ;;  %v260_v52 = vperm.slane %v7244_v53, 1 }
  0xaf   :  { %1565 = vmatpush.bf16.msrb.mxu3 %v4274_v0  ;;  %v4191_v0 = vld [vmem:[%s8590_s3 + $0x318] sm:$0xf0]  ;;  %v5640_v26 = vld [vmem:[%s8592_s5 + $0x28] sm:$0xff]  ;;  %s5961_s4 = smov [#allocation6]  }
  0xb0   :  { %1577 = vmatpush.bf16.msra.mxu2 %v4418_v58  ;;  %v4335_v58 = vld [vmem:[%s8590_s3 + $0x438] sm:$0xf0]  ;;  %v5636_v43 = vld [vmem:[%s8592_s5 + $0x8] sm:$0xff] }
  0xb1   :  { %1590 = vmatpush.bf16.msrb.mxu0 %v4546_v3  ;;  %1553 = vmatpush.bf16.msrb.mxu1 %v4130_v10  ;;  %v4575_v3 = vld [vmem:[%s8590_s3 + $0x618] sm:$0xf0]  ;;  %v4338_v4 = vor.u32 %v5572_v56, %v4335_v58  ;;  %v1288_v8 = vpop.f32.mrf.mxu2  ;;  %v5568_v10 = vld [vmem:[%s8590_s3 + $0x40c] sm:$0xf] }
  0xb2   :  { %v4578_v13 = vor.u32 %v5632_v2, %v4575_v3  ;;  %v4322_v7 = vor.u32 %v5568_v10, %v4319_v11  ;;  %v5658_v1 = vld [vmem:[%s8592_s5 + $0xb8] sm:$0xff]  ;;  %v5656_v8 = vld [vmem:[%s8592_s5 + $0xa8] sm:$0xff] }
  0xb3   :  { %1566 = vmatpush.bf16.msrb.mxu3 %v4258_v12  ;;  %v4194_v12 = vor.u32 %v5536_v62, %v4191_v0 }
  0xb4   :  { %1578 = vmatpush.bf16.msra.mxu2 %v4402_v6  ;;  %v4463_v6 = vld [vmem:[%s8590_s3 + $0x538] sm:$0xf0]  ;;  %v1301_v14 = vpop.f32.mrf.mxu3 }
  0xb5   :  { %1591 = vmatpush.bf16.msrb.mxu0 %v4530_v15  ;;  %1554 = vmatpush.bf16.msrb.mxu1 %v4114_v21  ;;  %v5642_v15 = vld [vmem:[%s8592_s5 + $0x38] sm:$0xff]  ;;  %v4466_v16 = vor.u32 %v5604_v5, %v4463_v6  ;;  %v1261_v21 = vadd.f32 %v7179_v17, %v259_v55  ;;  %v5649_v17 = vld [vmem:[%s8592_s5 + $0x70] sm:$0xff] }
  0xb7   :  { %1567 = vmatpush.bf16.msrb.mxu3 %v4242_v24  ;;  %v1274_v25 = vadd.f32 %v7199_v28, %v1261_v21 }
  0xb8   :  { %1579 = vmatpush.bf16.msra.mxu2 %v4386_v18  ;;  %v5600_v18 = vld [vmem:[%s8590_s3 + $0x50c] sm:$0xf] }
  0xb9   :  { %1592 = vmatpush.bf16.msrb.mxu0 %v4514_v27  ;;  %1555 = vmatpush.bf16.msrb.mxu1 %v4098_v37  ;;  %v4450_v23 = vor.u32 %v5600_v18, %v4447_v19  ;;  %v1338_v24 = vpop.f32.mrf.mxu2  ;;  %v5639_v27 = vld [vmem:[%s8592_s5 + $0x20] sm:$0xff] }
  0xbb   :  { %1568 = vmatpush.bf16.msrb.mxu3 %v4226_v40 }
  0xbc   :  { %1580 = vmatpush.bf16.msra.mxu2 %v4370_v32 }
  0xbd   :  { %1593 = vmatpush.bf16.msrb.mxu0 %v4498_v44  ;;  %1556 = vmatpush.bf16.msrb.mxu1 %v4082_v54 }
  0xbf   :  { %1569 = vmatpush.bf16.msrb.mxu3 %v4210_v59 }
  0xc0   :  { %1581 = vmatpush.bf16.msra.mxu2 %v4354_v49  ;;  %v5643_v49 = vld [vmem:[%s8592_s5 + $0x40] sm:$0xff] }
  0xc1   :  { %1594 = vmatpush.bf16.msrb.mxu0 %v4482_v63  ;;  %1557 = vmatpush.bf16.msrb.mxu1 %v4066_v9  ;;  %v1340_v29 = vpop.f32.mrf.mxu2 }
  0xc3   :  { %1570 = vmatpush.bf16.msrb.mxu3 %v4194_v12  ;;  %v1325_v28 = vpop.f32.mrf.mxu1  ;;  %v5655_v12 = vld [vmem:[%s8592_s5 + $0xa0] sm:$0xff] }
  0xc4   :  { %1582 = vmatpush.bf16.msra.mxu2 %v4338_v4  ;;  %1558 = vmatmul.bf16.vlgmr.msrb.gmra.mxu1 %v6278_v51  ;;  %v5648_v51 = vld [vmem:[%s8592_s5 + $0x68] sm:$0xff]  ;;  %v5657_v4 = vld [vmem:[%s8592_s5 + $0xb0] sm:$0xff] }
  0xc5   :  { %1609 = vmatpush.bf16.msra.mxu1 %v4578_v13  ;;  %1595 = vmatpush.bf16.msrb.mxu0 %v4466_v16  ;;  %v5654_v16 = vld [vmem:[%s8592_s5 + $0x98] sm:$0xff] }
  0xc6   :  { %1571 = vmatmul.bf16.vlgmr.msrb.gmra.mxu3 %v6291_v57  ;;  %v1287_v57 = vadd.f32 %v7213_v36, %v1274_v25  ;;  %v5637_v36 = vld [vmem:[%s8592_s5 + $0x10] sm:$0xff] }
  0xc7   :  { %1830 = vmatpush.bf16.msra.mxu3 %v5642_v15 }
  0xc8   :  { %1583 = vmatpush.bf16.msra.mxu2 %v4322_v7  ;;  %v1300_v32 = vadd.f32 %v7221_v41, %v1287_v57  ;;  %v5645_v41 = vld [vmem:[%s8592_s5 + $0x50] sm:$0xff] }
  0xc9   :  { %1843 = vmatpush.bf16.msrb.mxu1 %v5650_v20  ;;  %1596 = vmatpush.bf16.msrb.mxu0 %v4450_v23  ;;  %v1351_v39 = vpop.f32.mrf.mxu3  ;;  %v5653_v7 = vld [vmem:[%s8592_s5 + $0x90] sm:$0xff]  ;;  %v5652_v20 = vld [vmem:[%s8592_s5 + $0x88] sm:$0xff] }
  0xca   :  { %v1352_v56 = vadd.f32 %v1351_v39, %v260_v52 }
  0xcb   :  { %1831 = vmatpush.bf16.msra.mxu3 %v5641_v22  ;;  %1584 = vmatmul.bf16.vlgmr.msra.gmra.mxu2 %v6492_v30  ;;  %v1312_v30 = vpop.f32.mrf.mxu0  ;;  %v1327_v40 = vpop.f32.mrf.mxu1  ;;  %v5651_v22 = vld [vmem:[%s8592_s5 + $0x80] sm:$0xff] }
  0xcc   :  { %1597 = vmatmul.bf16.vlgmr.msrb.gmra.mxu0 %v6503_v35  ;;  %v5638_v35 = vld [vmem:[%s8592_s5 + $0x18] sm:$0xff]  ;;  %v1313_v33 = vadd.f32 %v1312_v30, %v1300_v32  ;;  %1856 = vmatpush.bf16.msrb.mxu2 %v5658_v1 }
  0xcd   :  { %1844 = vmatpush.bf16.msrb.mxu1 %v5649_v17 }
  0xce   :  { %v1326_v37 = vadd.f32 %v1325_v28, %v1313_v33  ;;  %v1364_v42 = vpop.f32.mrf.mxu2 }
  0xcf   :  { %1832 = vmatpush.bf16.msra.mxu3 %v5640_v26  ;;  %v1365_v58 = vadd.f32 %v1364_v42, %v1352_v56  ;;  %v261_v26 = vperm.slane %v7244_v53, 2 }
  0xd0   :  { %v1339_v44 = vadd.f32 %v1338_v24, %v1326_v37  ;;  %1857 = vmatpush.bf16.msrb.mxu2 %v5657_v4 }
  0xd1   :  { %1845 = vmatpush.bf16.msrb.mxu1 %v5648_v51  ;;  %v1353_v48 = vpop.f32.mrf.mxu3 }
  0xd2   :  { %v1615_v47 = vmax.f32 %v1339_v44, 0.0  ;;  %v5659_v44 = vld [vmem:[%s8592_s5 + $0xc0] sm:$0xff] }
  0xd3   :  { %1833 = vmatpush.bf16.msra.mxu3 %v5639_v27  ;;  %v1314_v38 = vpop.f32.mrf.mxu0  ;;  %1876 = vmatpush.bf16.msra.mxu0 %v5659_v44 }
  0xd4   :  { %4582 = vmatmul.msk.bf16.vlgmr.msra.gmra.mxu1 %vm1247_vm0, %v6401_v45  ;;  %v5644_v45 = vld [vmem:[%s8592_s5 + $0x48] sm:$0xff]  ;;  %v1619_v54 = vpack.c.bf16 %v1615_v47, %v1615_v47  ;;  %1858 = vmatpush.bf16.msrb.mxu2 %v5656_v8  ;;  %v5850_v8 = vld [vmem:[%s8593_s6] ss:$0 sm:$0xff]  ;;  %s5958_s6 = smov 108  }
  0xd5   :  { %1846 = vmatpush.bf16.msrb.mxu1 %v5647_v31 }
  0xd6   :  { %v1366_v50 = vpop.f32.mrf.mxu2 }
  0xd7   :  { %1834 = vmatpush.bf16.msra.mxu3 %v5638_v35 }
  0xd8   :  { %1859 = vmatpush.bf16.msrb.mxu2 %v5655_v12  ;;  %v1892_v12 = vld [vmem:[%s8588_s1] sm:$0xff] }
  0xd9   :  { %1847 = vmatpush.bf16.msrb.mxu1 %v5646_v34 }
  0xdb   :  { %1835 = vmatpush.bf16.msra.mxu3 %v5637_v36 }
  0xdc   :  { %1860 = vmatpush.bf16.msrb.mxu2 %v5654_v16 }
  0xdd   :  { %1848 = vmatpush.bf16.msrb.mxu1 %v5645_v41 }
  0xdf   :  { %1836 = vmatpush.bf16.msra.mxu3 %v5636_v43 }
  0xe0   :  { %v1377_v59 = vpop.f32.mrf.mxu0  ;;  %1861 = vmatpush.bf16.msrb.mxu2 %v5653_v7 }
  0xe1   :  { %1849 = vmatpush.bf16.msrb.mxu1 %v5644_v45  ;;  %v1378_v60 = vadd.f32 %v1377_v59, %v1365_v58 }
  0xe3   :  { %1837 = vmatpush.bf16.msra.mxu3 %v5635_v46  ;;  %v262_v46 = vperm.slane %v7244_v53, 3 }
  0xe4   :  { %1862 = vmatpush.bf16.msrb.mxu2 %v5652_v20 }
  0xe5   :  { %1850 = vmatpush.bf16.msrb.mxu1 %v5643_v49 }
  0xe6   :  { %1838 = vmatmul.bf16.vlgmr.msra.gmra.mxu3 %v1619_v54 }
  0xe7   :  { %v1390_v61 = vpop.f32.mrf.mxu1 }
  0xe8   :  { %v1391_v62 = vadd.f32 %v1390_v61, %v1378_v60  ;;  %v1379_v63 = vpop.f32.mrf.mxu0  ;;  %1863 = vmatpush.bf16.msrb.mxu2 %v5651_v22 }
  0xed   :  { %v1403_v0 = vpop.f32.mrf.mxu3 }
  0xee   :  { %v1404_v2 = vadd.f32 %v1403_v0, %v1391_v62  ;;  %v1416_v3 = vpop.f32.mrf.mxu2 }
  0xef   :  { %v1392_v5 = vpop.f32.mrf.mxu1 }
  0xf0   :  { %v1417_v6 = vadd.f32 %v1416_v3, %v1404_v2  ;;  %v1429_v9 = vpop.f32.mrf.mxu0 }
  0xf2   :  { %v1430_v11 = vadd.f32 %v1429_v9, %v1417_v6 }
  0xf4   :  { %v1616_v13 = vmax.f32 %v1430_v11, 0.0 }
  0xf5   :  { %v1405_v10 = vpop.f32.mrf.mxu3 }
  0xf6   :  { %v1418_v55 = vpop.f32.mrf.mxu2  ;;  %v1620_v14 = vpack.c.bf16 %v1616_v13, %v1616_v13  ;;  %v5957_v13 = vmov 0  }
  0xf7   :  { %5849 = vset.pattern.permute.xlu0 %v5957_v13  ;;  %v5776_v13 = vld [vmem:[%s8597_s10 + $0x360] sm:$0xf0] }
  0xf8   :  { %1851 = vmatmul.bf16.vlgmr.msrb.gmra.mxu1 %v1620_v14  ;;  %v1431_v15 = vpop.f32.mrf.mxu0  ;;  %1896 = vperm.xlu0 %5849, %v1892_v12   ;;  %v5147_v12 = vld [vmem:[%s8597_s10 + $0x348] sm:$0xf] }
 0x101   :  { %v1442_v19 = vpop.f32.mrf.mxu1 }
 0x102   :  { %v1443_v27 = vadd.f32 %v1442_v19, %v261_v26  ;;  %v4689_v26 = vld [vmem:[%s8595_s8 + $0x10] sm:$0x10] }
 0x105   :  { %v1468_v18 = vpop.f32.mrf.mxu0 }
 0x109   :  { %v1455_v21 = vpop.f32.mrf.mxu3  ;;  %v1444_v17 = vpop.f32.mrf.mxu1 }
 0x10a   :  { %v1456_v30 = vadd.f32 %v1455_v21, %v1443_v27  ;;  %v5667_v27 = vld [vmem:[%s8595_s8 + $0x14] sm:$0x10] }
 0x10c   :  { %v1469_v29 = vadd.f32 %v1468_v18, %v1456_v30  ;;  %v5665_v30 = vld [vmem:[%s8595_s8 + $0xc] sm:$0xf] }
 0x10d   :  { %v1470_v23 = vpop.f32.mrf.mxu0 }
 0x10e   :  { %v1481_v24 = vpop.f32.mrf.mxu2  ;;  %v4687_v23 = vld [vmem:[%s8595_s8] sm:$0xf] }
 0x10f   :  { %v1482_v32 = vadd.f32 %v1481_v24, %v1469_v29  ;;  %v5666_v24 = vld [vmem:[%s8595_s8 + $0xc] sm:$0x10] }
 0x110   :  { %v4688_v17 = vor.u32 %v5666_v24, %v4687_v23  ;;  %v5762_v23 = vld [vmem:[%s8597_s10 + $0x2f0] sm:$0xf0] }
 0x111   :  { %v1457_v25 = vpop.f32.mrf.mxu3 }
 0x112   :  { %v5664_v25 = vld [vmem:[%s8595_s8 + $0x4] sm:$0xf]  ;;  %v1935_v29 = vsel %vm1933_vm2, %v4688_v17, 0  ;;  %v4839_v17 = vld [vmem:[%s8597_s10 + $0xe0] sm:$0xf] }
 0x113   :  { %1953 = vmatpush.bf16.msrb.mxu3 %v1935_v29  ;;  %v1882_v29 = vld [vmem:[%s8589_s2] sm:$0xff]  ;;  %s3766_s2 = sshll.u32 %s8600_s13, 4  ;;  %s3775_s13 = sshll.u32 %s5961_s4, 4  ;;  %s3767_s2 = int_to_ptr.hbm [resolvable:$true] %s3766_s2  ;;  %s3776_s13 = int_to_ptr.vmem [resolvable:$true] %s3775_s13 }
 0x115   :  { %v1520_v51 = vpop.f32.mrf.mxu0 }
 0x116   :  { %v1483_v57 = vpop.f32.mrf.mxu2 }
 0x117   :  { %v4692_v57 = vor.u32 %v5664_v25, %v4689_v26  ;;  %v5699_v25 = vld [vmem:[%s8597_s10 + $0xf8] sm:$0xf0] }
 0x11d   :  { %v1522_v28 = vpop.f32.mrf.mxu0 }
 0x11e   :  { %v4697_v28 = vld [vmem:[%s8595_s8 + $0x18] sm:$0x10] }
 0x121   :  { %v1494_v31 = vpop.f32.mrf.mxu1 }
 0x122   :  { %v1495_v35 = vadd.f32 %v1494_v31, %v1482_v32  ;;  %v4700_v32 = vor.u32 %v5665_v30, %v4697_v28 }
 0x129   :  { %v1546_v33 = vpop.f32.mrf.mxu0  ;;  %v1507_v34 = vpop.f32.mrf.mxu3 }
 0x12a   :  { %v1508_v36 = vadd.f32 %v1507_v34, %v1495_v35  ;;  %v1496_v37 = vpop.f32.mrf.mxu1  ;;  %v1938_v35 = vsel %vm1933_vm2, %v4692_v57, 0  ;;  %v1944_v34 = vsel %vm1933_vm2, %v4700_v32, 0  ;;  %v4811_v57 = vld [vmem:[%s8597_s10 + $0xa8] sm:$0xf] }
 0x12b   :  { %1966 = vmatpush.bf16.msrb.mxu0 %v1938_v35  ;;  %1992 = vmatpush.bf16.msra.mxu2 %v1944_v34  ;;  %v5063_v34 = vld [vmem:[%s8597_s10 + $0x2a0] sm:$0xf] }
 0x12c   :  { %v1521_v38 = vadd.f32 %v1520_v51, %v1508_v36  ;;  %v4695_v51 = vld [vmem:[%s8595_s8 + $0x8] sm:$0xf]  ;;  %v1893_v36 = vlaneseq }
 0x12d   :  { %v4696_v31 = vor.u32 %v5667_v27, %v4695_v51  ;;  %v4840_v51 = vor.u32 %v5699_v25, %v4839_v17  ;;  %v5692_v27 = vld [vmem:[%s8597_s10 + $0xc0] sm:$0xf0]  ;;  %v5259_v17 = vld [vmem:[%s8597_s10 + $0x428] sm:$0xf] }
 0x12e   :  { %v1533_v39 = vpop.f32.mrf.mxu2  ;;  %v1617_v40 = vmax.f32 %v1521_v38, 0.0  ;;  %v1894_v37 = vand.u32 127, %v1893_v36  ;;  %v4812_v28 = vor.u32 %v5692_v27, %v4811_v57  ;;  %v5755_v36 = vld [vmem:[%s8597_s10 + $0x2b8] sm:$0xf0]  ;;  %v5804_v25 = vld [vmem:[%s8597_s10 + $0x440] sm:$0xf0] }
 0x12f   :  { %v1534_v47 = vadd.f32 %v1533_v39, %v262_v46  ;;  %v5959_v39 = vmov 0.0   ;;  %v5373_v57 = vld [vmem:[%s8597_s10 + $0x524] sm:$0xf0]  ;;  %v5703_v27 = vld [vmem:[%s8597_s10 + $0x11c] sm:$0xf] }
 0x130   :  { %v1621_v41 = vpack.c.bf16 %v1617_v40, %v1617_v40 }
 0x131   :  { %v1548_v42 = vpop.f32.mrf.mxu0  ;;  %v1509_v43 = vpop.f32.mrf.mxu3  ;;  %v1547_v49 = vadd.f32 %v1546_v33, %v1534_v47  ;;  %v1941_v33 = vsel %vm1933_vm2, %v4696_v31, 0 }
 0x132   :  { %1864 = vmatmul.bf16.vlgmr.msrb.gmra.mxu2 %v1621_v41  ;;  %1979 = vmatpush.bf16.msra.mxu1 %v1941_v33  ;;  %v1907_v42 = vld [vmem:[%s8594_s7 + $0x20] sm:$0x33]  ;;  %v1908_v43 = vld [vmem:[%s8594_s7 + $0x28] sm:$0x33] }
 0x133   :  { %v2012_v44 = vunpack.c.l.b16 %v1907_v42  ;;  %v2014_v46 = vunpack.c.l.b16 %v1908_v43  ;;  %v2015_v47 = vunpack.c.h.b16 %v1908_v43  ;;  %v5035_v43 = vld [vmem:[%s8597_s10 + $0x268] sm:$0xf] }
 0x136   :  { %v1535_v45 = vpop.f32.mrf.mxu2 }
 0x137   :  { %v2013_v45 = vunpack.c.h.b16 %v1907_v42 }
 0x141   :  { %v1559_v48 = vpop.f32.mrf.mxu1 }
 0x142   :  { %v1560_v50 = vadd.f32 %v1559_v48, %v1547_v49  ;;  %v2020_v48 = vpack.c.b16 %v2012_v44, %v2012_v44  ;;  %v2021_v49 = vpack.c.b16 %v2013_v45, %v2013_v45  ;;  %v5748_v44 = vld [vmem:[%s8597_s10 + $0x280] sm:$0xf0]  ;;  %v4755_v45 = vld [vmem:[%s8597_s10 + $0x38] sm:$0xf] }
 0x149   :  { %v1572_v52 = vpop.f32.mrf.mxu3  ;;  %v1598_v54 = vpop.f32.mrf.mxu0 }
 0x14a   :  { %v1573_v56 = vadd.f32 %v1572_v52, %v1560_v50  ;;  %v1561_v58 = vpop.f32.mrf.mxu1  ;;  %v2022_v50 = vpack.c.b16 %v2014_v46, %v2014_v46  ;;  %v2023_v52 = vpack.c.b16 %v2015_v47, %v2015_v47  ;;  %v5036_v46 = vor.u32 %v5748_v44, %v5035_v43  ;;  %v5678_v47 = vld [vmem:[%s8597_s10 + $0x50] sm:$0xf0] }
 0x14c   :  { %v2040_v58 = vsel %vm2032_vm5, %v2022_v50, 0  ;;  %v4756_v50 = vor.u32 %v5678_v47, %v4755_v45 }
 0x14d   :  { %2077 = vmatpush.bf16.msrb.mxu1 %v2040_v58  ;;  %v4727_v58 = vld [vmem:[%s8597_s10] sm:$0xf] }
 0x14e   :  { %v1585_v59 = vpop.f32.mrf.mxu2 }
 0x14f   :  { %v1586_v60 = vadd.f32 %v1585_v59, %v1573_v56  ;;  %v2037_v56 = vsel %vm2032_vm5, %v2021_v49, 0  ;;  %v2043_v59 = vsel %vm2032_vm5, %v2023_v52, 0  ;;  %v5825_v49 = vld [vmem:[%s8597_s10 + $0x4e8] sm:$0xf0] }
 0x150   :  { %2090 = vmatpush.bf16.msrb.mxu2 %v2043_v59 }
 0x151   :  { %v1574_v61 = vpop.f32.mrf.mxu3  ;;  %v1600_v62 = vpop.f32.mrf.mxu0  ;;  %v1599_v63 = vadd.f32 %v1598_v54, %v1586_v60  ;;  %v2034_v54 = vsel %vm2032_vm5, %v2020_v48, 0  ;;  %v4707_v60 = vld [vmem:[%s8594_s7] sm:$0xf]  ;;  %v5343_v48 = vld [vmem:[%s8597_s10 + $0x4d0] sm:$0xf] }
 0x152   :  { %v1611_v0 = vpop.f32.mrf.mxu1  ;;  %2051 = vmatpush.bf16.msra.mxu3 %v2034_v54  ;;  %v5662_v61 = vld [vmem:[%s8594_s7 + $0xc] sm:$0xf0]  ;;  %v5660_v62 = vld [vmem:[%s8594_s7 + $0x4] sm:$0xf]  ;;  %v5344_v52 = vor.u32 %v5825_v49, %v5343_v48 }
 0x153   :  { %v1612_v1 = vadd.f32 %v1611_v0, %v1599_v63  ;;  %v4708_v63 = vor.u32 %v5662_v61, %v4707_v60  ;;  %v4709_v0 = vld [vmem:[%s8594_s7 + $0x10] sm:$0xf0]  ;;  %v5007_v54 = vld [vmem:[%s8597_s10 + $0x230] sm:$0xf]  ;;  %v5671_v60 = vld [vmem:[%s8597_s10 + $0x18] sm:$0xf0] }
 0x154   :  { %v5315_v61 = vld [vmem:[%s8597_s10 + $0x498] sm:$0xf] }
 0x155   :  { %v1618_v3 = vmax.f32 %v1612_v1, 0.0  ;;  %v4715_v1 = vld [vmem:[%s8594_s7 + $0x8] sm:$0xf] }
 0x156   :  { %v1587_v2 = vpop.f32.mrf.mxu2  ;;  %2052 = vmatpush.bf16.msra.mxu3 %v4708_v63  ;;  %v4728_v63 = vor.u32 %v5671_v60, %v4727_v58  ;;  %v5790_v58 = vld [vmem:[%s8597_s10 + $0x3d0] sm:$0xf0] }
 0x157   :  { %v1622_v4 = vpack.c.bf16 %v1618_v3, %v1618_v3  ;;  %v5663_v2 = vld [vmem:[%s8594_s7 + $0x14] sm:$0xf0]  ;;  %v4712_v3 = vor.u32 %v5660_v62, %v4709_v0  ;;  %v5818_v62 = vld [vmem:[%s8597_s10 + $0x4b0] sm:$0xf0] }
 0x158   :  { %v5316_v0 = vor.u32 %v5818_v62, %v5315_v61  ;;  %v5317_v61 = vld [vmem:[%s8597_s10 + $0x4b4] sm:$0xf0]  ;;  %v5689_v62 = vld [vmem:[%s8597_s10 + $0xac] sm:$0xf] }
 0x159   :  { %4683 = vmatmul.msk.bf16.vlgmr.msra.gmra.mxu0 %vm1247_vm0, %v1622_v4  ;;  %v4716_v4 = vor.u32 %v5663_v2, %v4715_v1  ;;  %v5399_v1 = vld [vmem:[%s8597_s10 + $0x540] sm:$0xf]  ;;  %v5839_v2 = vld [vmem:[%s8597_s10 + $0x558] sm:$0xf0] }
 0x15a   :  { %v1613_v53 = vpop.f32.mrf.mxu1  ;;  %2064 = vmatpush.bf16.msra.mxu0 %v2037_v56  ;;  %v5741_v56 = vld [vmem:[%s8597_s10 + $0x248] sm:$0xf0] }
 0x15b   :  { %v5661_v53 = vld [vmem:[%s8594_s7 + $0xc] sm:$0xf]  ;;  %2078 = vmatpush.bf16.msrb.mxu1 %v4716_v4  ;;  %v5008_v59 = vor.u32 %v5741_v56, %v5007_v54  ;;  %v5400_v4 = vor.u32 %v5839_v2, %v5399_v1  ;;  %v5203_v56 = vld [vmem:[%s8597_s10 + $0x3b8] sm:$0xf] }
 0x15c   :  { %v5204_v60 = vor.u32 %v5790_v58, %v5203_v56  ;;  %v5745_v2 = vld [vmem:[%s8597_s10 + $0x26c] sm:$0xf]  ;;  %v5840_v56 = vld [vmem:[%s8597_s10 + $0x560] sm:$0xf0] }
 0x15e   :  { %2065 = vmatpush.bf16.msra.mxu0 %v4712_v3  ;;  %v5717_v3 = vld [vmem:[%s8597_s10 + $0x18c] sm:$0xf] }
 0x169   :  { %v1839_v5 = vpop.f32.mrf.mxu3 }
 0x16a   :  { %v1840_v9 = vadd.f32 %v5850_v8, %v1839_v5  ;;  %v1897_v38 = vpop.permute.xlu0 %1896  ;;  %v4717_v5 = vld [vmem:[%s8594_s7 + $0x18] sm:$0xf0]  ;;  %v4923_v8 = vld [vmem:[%s8597_s10 + $0x188] sm:$0xf] }
 0x16b   :  { %vm1898_vm3 = vcmp.eq.s32.totalorder %v1897_v38, %v1894_v37  ;;  %v5064_v37 = vor.u32 %v5755_v36, %v5063_v34  ;;  %v5685_v38 = vld [vmem:[%s8597_s10 + $0x88] sm:$0xf0]  ;;  %v5822_v36 = vld [vmem:[%s8597_s10 + $0x4d4] sm:$0xf] }
 0x16c   :  { %v4684_v40 = vsel %vm1898_vm3, 1.0, %v5959_v39  ;;  %v5371_v39 = vld [vmem:[%s8597_s10 + $0x508] sm:$0xf]  ;;  %v5797_v34 = vld [vmem:[%s8597_s10 + $0x408] sm:$0xf0] }
 0x16d   :  { %v1901_v41 = vpack.c.bf16 %v4684_v40, %v4684_v40  ;;  %v5832_v40 = vld [vmem:[%s8597_s10 + $0x520] sm:$0xf0] }
 0x16e   :  { %v5372_v42 = vor.u32 %v5832_v40, %v5371_v39  ;;  %v5696_v39 = vld [vmem:[%s8597_s10 + $0xe4] sm:$0xf]  ;;  %v4841_v40 = vld [vmem:[%s8597_s10 + $0xfc] sm:$0xf0] }
 0x16f   :  { %4701 = vmatmul.msk.bf16.vlgmr.msrb.gmra.mxu3 %vm1929_vm4, %v1901_v41  ;;  %4702 = vmatmul.msk.bf16.vlgmr.msrb.gmra.mxu0 %vm1929_vm4, %v1901_v41  ;;  %v4844_v43 = vor.u32 %v5696_v39, %v4841_v40  ;;  %v2097_v40 = vld [vmem:[%s8596_s9] sm:$0xf] }
 0x170   :  { %4703 = vmatmul.msk.bf16.vlgmr.msra.gmra.mxu1 %vm1929_vm4, %v1901_v41  ;;  %4704 = vmatmul.msk.bf16.vlgmr.msra.gmra.mxu2 %vm1929_vm4, %v1901_v41 }
 0x171   :  { %v1841_v6 = vpop.f32.mrf.mxu3  ;;  %3264 = vmatpush.bf16.msra.mxu1 %v5372_v42  ;;  %v5065_v42 = vld [vmem:[%s8597_s10 + $0x2bc] sm:$0xf0] }
 0x172   :  { %v4720_v6 = vor.u32 %v5661_v53, %v4717_v5  ;;  %v4925_v53 = vld [vmem:[%s8597_s10 + $0x1a4] sm:$0xf0]  ;;  %v5773_v5 = vld [vmem:[%s8597_s10 + $0x34c] sm:$0xf] }
 0x174   :  { %2091 = vmatpush.bf16.msrb.mxu2 %v4720_v6  ;;  %v5149_v6 = vld [vmem:[%s8597_s10 + $0x364] sm:$0xf0] }
 0x175   :  { %v1852_v10 = vpop.f32.mrf.mxu1  ;;  %3265 = vmatpush.bf16.msra.mxu1 %v5344_v52 }
 0x176   :  { %v1853_v11 = vadd.f32 %v1852_v10, %v1840_v9  ;;  %v5720_v9 = vld [vmem:[%s8597_s10 + $0x1a0] sm:$0xf0]  ;;  %v4895_v10 = vld [vmem:[%s8597_s10 + $0x150] sm:$0xf] }
 0x178   :  { %3284 = vmatpush.bf16.msra.mxu2 %v5400_v4 }
 0x179   :  { %3266 = vmatpush.bf16.msra.mxu1 %v5316_v0 }
 0x17d   :  { %v1854_v55 = vpop.f32.mrf.mxu1 }
 0x17e   :  { %v5713_v55 = vld [vmem:[%s8597_s10 + $0x168] sm:$0xf0] }
 0x1b5   :  { %v1865_v14 = vpop.f32.mrf.mxu2 }
 0x1b6   :  { %v1866_v16 = vadd.f32 %v1865_v14, %v1853_v11  ;;  %v4924_v11 = vor.u32 %v5720_v9, %v4923_v8  ;;  %v5148_v14 = vor.u32 %v5776_v13, %v5147_v12  ;;  %v4928_v8 = vor.u32 %v5717_v3, %v4925_v53  ;;  %v5811_v13 = vld [vmem:[%s8597_s10 + $0x478] sm:$0xf0]  ;;  %v5037_v3 = vld [vmem:[%s8597_s10 + $0x284] sm:$0xf0]  ;;  %v5175_v53 = vld [vmem:[%s8597_s10 + $0x380] sm:$0xf] }
 0x1b7   :  { %v5152_v9 = vor.u32 %v5773_v5, %v5149_v6  ;;  %v5040_v4 = vor.u32 %v5745_v2, %v5037_v3  ;;  %v5783_v5 = vld [vmem:[%s8597_s10 + $0x398] sm:$0xf0]  ;;  %v5808_v6 = vld [vmem:[%s8597_s10 + $0x464] sm:$0xf] }
 0x1b8   :  { %3238 = vmatpush.bf16.msrb.mxu3 %v4924_v11  ;;  %3251 = vmatpush.bf16.msrb.mxu0 %v5148_v14  ;;  %v5734_v11 = vld [vmem:[%s8597_s10 + $0x210] sm:$0xf0] }
 0x1bd   :  { %v1867_v15 = vpop.f32.mrf.mxu2 }
 0x1be   :  { %v5119_v15 = vld [vmem:[%s8597_s10 + $0x310] sm:$0xf] }
 0x1d6   :  { %v1878_v7 = vpop.f32.mrf.mxu0 }
 0x1d7   :  { %v7384_v18 = vadd.f32 %v1878_v7, %v1866_v16  ;;  %v4896_v16 = vor.u32 %v5713_v55, %v4895_v10  ;;  %v5769_v7 = vld [vmem:[%s8597_s10 + $0x328] sm:$0xf0]  ;;  %v4979_v10 = vld [vmem:[%s8597_s10 + $0x1f8] sm:$0xf]  ;;  %v5287_v55 = vld [vmem:[%s8597_s10 + $0x460] sm:$0xf] }
 0x1d8   :  { %v4980_v12 = vor.u32 %v5734_v11, %v4979_v10  ;;  %v5288_v14 = vor.u32 %v5811_v13, %v5287_v55  ;;  %v5682_v10 = vld [vmem:[%s8597_s10 + $0x74] sm:$0xf]  ;;  %v4785_v11 = vld [vmem:[%s8597_s10 + $0x8c] sm:$0xf0] }
 0x1d9   :  { %v1883_v19 = vmul.f32 0.5, %v7384_v18  ;;  %3744 = vrot.lane.b32.xlu1 %v7384_v18, %s5958_s6  ;;  %3742 = vst.msk [vmem:[#allocation4] sm:$0xff] %vm2028_vm1, %v7384_v18  ;;  %3239 = vmatpush.bf16.msrb.mxu3 %v4896_v16  ;;  %v4897_v16 = vld [vmem:[%s8597_s10 + $0x16c] sm:$0xf0]  ;;  %v5738_v13 = vld [vmem:[%s8597_s10 + $0x234] sm:$0xf] }
 0x1da   :  { %3267 = vmatpush.bf16.msra.mxu1 %v5288_v14  ;;  %v5009_v14 = vld [vmem:[%s8597_s10 + $0x24c] sm:$0xf0] }
 0x1db   :  { %v1884_v20 = vmul.f32 1.442695, %v1883_v19  ;;  %v4867_v19 = vld [vmem:[%s8597_s10 + $0x118] sm:$0xf] }
 0x1dd   :  { %5851 = vpow2.f32 %v1884_v20  ;;  %v5706_v20 = vld [vmem:[%s8597_s10 + $0x130] sm:$0xf0] }
 0x1de   :  { %v1880_v21 = vpop.f32.mrf.mxu0  ;;  %v4868_v24 = vor.u32 %v5706_v20, %v4867_v19  ;;  %v5121_v20 = vld [vmem:[%s8597_s10 + $0x32c] sm:$0xf0] }
 0x1df   :  { %v5120_v21 = vor.u32 %v5769_v7, %v5119_v15  ;;  %v5710_v15 = vld [vmem:[%s8597_s10 + $0x154] sm:$0xf] }
 0x1e0   :  { %3240 = vmatpush.bf16.msrb.mxu3 %v4868_v24  ;;  %v5766_v7 = vld [vmem:[%s8597_s10 + $0x314] sm:$0xf]  ;;  %v4900_v19 = vor.u32 %v5710_v15, %v4897_v16  ;;  %v5012_v15 = vor.u32 %v5738_v13, %v5009_v14  ;;  %v5836_v16 = vld [vmem:[%s8597_s10 + $0x544] sm:$0xf]  ;;  %v5777_v13 = vld [vmem:[%s8597_s10 + $0x368] sm:$0xf0] }
 0x1e1   :  { %3252 = vmatpush.bf16.msrb.mxu0 %v5120_v21  ;;  %v4951_v21 = vld [vmem:[%s8597_s10 + $0x1c0] sm:$0xf] }
 0x1e3   :  { %v5852_v22 = vpop.eup %5851 }
 0x1e4   :  { %1887 = vrot.lane.b32.xlu0 %v5852_v22, %s5958_s6  ;;  %v5091_v22 = vld [vmem:[%s8597_s10 + $0x2d8] sm:$0xf]  ;;  %3241 = vmatpush.bf16.msrb.mxu3 %v4840_v51  ;;  %v5260_v51 = vor.u32 %v5804_v25, %v5259_v17  ;;  %v5731_v17 = vld [vmem:[%s8597_s10 + $0x1fc] sm:$0xf] }
 0x1e5   :  { %v5092_v26 = vor.u32 %v5762_v23, %v5091_v22  ;;  %v5727_v22 = vld [vmem:[%s8597_s10 + $0x1d8] sm:$0xf0]  ;;  %v5124_v23 = vor.u32 %v5766_v7, %v5121_v20  ;;  %v5401_v7 = vld [vmem:[%s8597_s10 + $0x55c] sm:$0xf0]  ;;  %v5801_v20 = vld [vmem:[%s8597_s10 + $0x42c] sm:$0xf] }
 0x1e6   :  { %v4952_v24 = vor.u32 %v5727_v22, %v4951_v21  ;;  %3268 = vmatpush.bf16.msra.mxu1 %v5260_v51  ;;  %v5261_v21 = vld [vmem:[%s8597_s10 + $0x444] sm:$0xf0] }
 0x1e7   :  { %3253 = vmatpush.bf16.msrb.mxu0 %v5092_v26  ;;  %v5829_v26 = vld [vmem:[%s8597_s10 + $0x50c] sm:$0xf]  ;;  %v5264_v22 = vor.u32 %v5801_v20, %v5261_v21  ;;  %v5707_v20 = vld [vmem:[%s8597_s10 + $0x138] sm:$0xf0] }
 0x1e8   :  { %3242 = vmatpush.bf16.msrb.mxu3 %v4812_v28  ;;  %v5376_v28 = vor.u32 %v5829_v26, %v5373_v57  ;;  %v4981_v26 = vld [vmem:[%s8597_s10 + $0x214] sm:$0xf0]  ;;  %v5794_v57 = vld [vmem:[%s8597_s10 + $0x3f4] sm:$0xf] }
 0x1e9   :  { %v4984_v51 = vor.u32 %v5731_v17, %v4981_v26  ;;  %v5127_v26 = vld [vmem:[%s8597_s10 + $0x318] sm:$0xf] }
 0x1eb   :  { %3254 = vmatpush.bf16.msrb.mxu0 %v5064_v37 }
 0x1ec   :  { %v7655_v45 = vpop.f32.mrf.mxu0 }
 0x1ef   :  { %3255 = vmatpush.bf16.msrb.mxu0 %v5036_v46  ;;  %v7657_v46 = vpop.f32.mrf.mxu1 }
 0x1f2   :  { %v7659_v47 = vpop.f32.mrf.mxu3 }
 0x1f3   :  { %3256 = vmatpush.bf16.msrb.mxu0 %v5008_v59  ;;  %v7661_v48 = vpop.f32.mrf.mxu2  ;;  %v5815_v59 = vld [vmem:[%s8597_s10 + $0x49c] sm:$0xf] }
 0x1f4   :  { %v1970_v49 = vpop.f32.mrf.mxu0  ;;  %v5320_v0 = vor.u32 %v5815_v59, %v5317_v61  ;;  %v4931_v59 = vld [vmem:[%s8597_s10 + $0x190] sm:$0xf] }
 0x1f7   :  { %3257 = vmatpush.bf16.msrb.mxu0 %v4980_v12  ;;  %v4788_v12 = vor.u32 %v5682_v10, %v4785_v11 }
 0x1fa   :  { %v1957_v52 = vpop.f32.mrf.mxu3 }
 0x1fb   :  { %3258 = vmatpush.bf16.msrb.mxu0 %v4952_v24  ;;  %v1996_v54 = vpop.f32.mrf.mxu2  ;;  %v4757_v24 = vld [vmem:[%s8597_s10 + $0x54] sm:$0xf0] }
 0x1fc   :  { %v5407_v54 = vld [vmem:[%s8597_s10 + $0x548] sm:$0xf] }
 0x24b   :  { %v3745_v30 = vpop.permute.xlu1 %3744 }
 0x24c   :  { %3747 = vst.msk [vmem:[#allocation6] sm:$0xff] %vm2028_vm1, %v3745_v30  ;;  %v4869_v30 = vld [vmem:[%s8597_s10 + $0x134] sm:$0xf0] }
 0x256   :  { %v1888_v31 = vpop.permute.xlu0 %1887 }
 0x257   :  { %v1890_v32 = vmul.f32 %v1888_v31, %v1882_v29  ;;  %v4872_v29 = vor.u32 %v5703_v27, %v4869_v30  ;;  %v5759_v31 = vld [vmem:[%s8597_s10 + $0x2dc] sm:$0xf]  ;;  %v5233_v27 = vld [vmem:[%s8597_s10 + $0x40c] sm:$0xf0] }
 0x258   :  { %v5236_v30 = vor.u32 %v5794_v57, %v5233_v27 }
 0x259   :  { %v1891_v35 = vadd.f32 %v1890_v32, %v7384_v18  ;;  %v4783_v18 = vld [vmem:[%s8597_s10 + $0x70] sm:$0xf]  ;;  %v5093_v32 = vld [vmem:[%s8597_s10 + $0x2f4] sm:$0xf0] }
 0x25a   :  { %v4784_v41 = vor.u32 %v5685_v38, %v4783_v18  ;;  %v5345_v18 = vld [vmem:[%s8597_s10 + $0x4ec] sm:$0xf0] }
 0x25b   :  { %v1902_v33 = vpack.c.bf16 %v1891_v35, %v1891_v35  ;;  %v5231_v35 = vld [vmem:[%s8597_s10 + $0x3f0] sm:$0xf]  ;;  %v5348_v38 = vor.u32 %v5822_v36, %v5345_v18  ;;  %v5205_v36 = vld [vmem:[%s8597_s10 + $0x3d4] sm:$0xf0] }
 0x25c   :  { %3243 = vmatpush.bf16.msrb.mxu3 %v4784_v41  ;;  %v5232_v37 = vor.u32 %v5797_v34, %v5231_v35  ;;  %v5752_v41 = vld [vmem:[%s8597_s10 + $0x2a4] sm:$0xf]  ;;  %v4953_v35 = vld [vmem:[%s8597_s10 + $0x1dc] sm:$0xf0]  ;;  %v5787_v34 = vld [vmem:[%s8597_s10 + $0x3bc] sm:$0xf] }
 0x25d   :  { %4721 = vmatmul.msk.bf16.vlgmr.msra.gmra.mxu3 %vm2028_vm1, %v1902_v33  ;;  %4722 = vmatmul.msk.bf16.vlgmr.msra.gmra.mxu0 %vm2028_vm1, %v1902_v33  ;;  %v5068_v44 = vor.u32 %v5752_v41, %v5065_v42  ;;  %v5208_v18 = vor.u32 %v5787_v34, %v5205_v36  ;;  %v2100_v41 = vperm.slane %v2097_v40, 1  ;;  %v5763_v34 = vld [vmem:[%s8597_s10 + $0x2f8] sm:$0xf0] }
 0x25e   :  { %4723 = vmatmul.msk.bf16.vlgmr.msrb.gmra.mxu1 %vm2028_vm1, %v1902_v33  ;;  %4724 = vmatmul.msk.bf16.vlgmr.msrb.gmra.mxu2 %vm2028_vm1, %v1902_v33  ;;  %v5096_v33 = vor.u32 %v5759_v31, %v5093_v32  ;;  %v5724_v32 = vld [vmem:[%s8597_s10 + $0x1c4] sm:$0xf] }
 0x25f   :  { %3290 = vmatpush.bf16.msrb.mxu2 %v4928_v8  ;;  %3316 = vmatpush.bf16.msra.mxu0 %v5376_v28  ;;  %v5176_v8 = vor.u32 %v5783_v5, %v5175_v53  ;;  %v5668_v28 = vld [vmem:[%s8597_s10 + $0x4] sm:$0xf] }
 0x260   :  { %3244 = vmatpush.bf16.msrb.mxu3 %v4756_v50  ;;  %3269 = vmatpush.bf16.msra.mxu1 %v5232_v37  ;;  %v1983_v50 = vpop.f32.mrf.mxu1  ;;  %v5780_v37 = vld [vmem:[%s8597_s10 + $0x384] sm:$0xf] }
 0x263   :  { %3291 = vmatpush.bf16.msrb.mxu2 %v4900_v19  ;;  %3317 = vmatpush.bf16.msra.mxu0 %v5348_v38  ;;  %v5404_v19 = vor.u32 %v5836_v16, %v5401_v7  ;;  %v5177_v38 = vld [vmem:[%s8597_s10 + $0x39c] sm:$0xf0] }
 0x264   :  { %3245 = vmatpush.bf16.msrb.mxu3 %v4728_v63  ;;  %v4813_v63 = vld [vmem:[%s8597_s10 + $0xc4] sm:$0xf0]  ;;  %3270 = vmatpush.bf16.msra.mxu1 %v5204_v60  ;;  %v5180_v39 = vor.u32 %v5780_v37, %v5177_v38  ;;  %v4933_v37 = vld [vmem:[%s8597_s10 + $0x1ac] sm:$0xf0] }
 0x265   :  { %v4816_v1 = vor.u32 %v5689_v62, %v4813_v63  ;;  %v2102_v63 = vperm.slane %v2097_v40, 3 }
 0x267   :  { %3292 = vmatpush.bf16.msrb.mxu2 %v4872_v29  ;;  %3318 = vmatpush.bf16.msra.mxu0 %v5320_v0  ;;  %v4729_v29 = vld [vmem:[%s8597_s10 + $0x1c] sm:$0xf0]  ;;  %v5408_v0 = vor.u32 %v5840_v56, %v5407_v54  ;;  %v5711_v54 = vld [vmem:[%s8597_s10 + $0x15c] sm:$0xf]  ;;  %v4905_v56 = vld [vmem:[%s8597_s10 + $0x174] sm:$0xf0] }
 0x268   :  { %3303 = vmatpush.bf16.msra.mxu3 %v5152_v9  ;;  %v5289_v9 = vld [vmem:[%s8597_s10 + $0x47c] sm:$0xf0]  ;;  %3271 = vmatpush.bf16.msra.mxu1 %v5176_v8  ;;  %v4732_v31 = vor.u32 %v5668_v28, %v4729_v29  ;;  %v4903_v8 = vld [vmem:[%s8597_s10 + $0x158] sm:$0xf]  ;;  %v4847_v28 = vld [vmem:[%s8597_s10 + $0xe8] sm:$0xf] }
 0x269   :  { %v5292_v55 = vor.u32 %v5808_v6, %v5289_v9  ;;  %v5714_v9 = vld [vmem:[%s8597_s10 + $0x170] sm:$0xf0]  ;;  %v5700_v29 = vld [vmem:[%s8597_s10 + $0x100] sm:$0xf0] }
 0x26a   :  { %v4848_v36 = vor.u32 %v5700_v29, %v4847_v28 }
 0x26b   :  { %3293 = vmatpush.bf16.msrb.mxu2 %v4844_v43  ;;  %3319 = vmatpush.bf16.msra.mxu0 %v5292_v55  ;;  %v2101_v43 = vperm.slane %v2097_v40, 2 }
 0x26c   :  { %3304 = vmatpush.bf16.msra.mxu3 %v5124_v23  ;;  %3336 = vmatpush.bf16.msrb.mxu1 %v5404_v19  ;;  %v5675_v23 = vld [vmem:[%s8597_s10 + $0x3c] sm:$0xf]  ;;  %v4875_v19 = vld [vmem:[%s8597_s10 + $0x120] sm:$0xf] }
 0x26d   :  { %v4760_v25 = vor.u32 %v5675_v23, %v4757_v24  ;;  %v5351_v23 = vld [vmem:[%s8597_s10 + $0x4d8] sm:$0xf]  ;;  %v5826_v24 = vld [vmem:[%s8597_s10 + $0x4f0] sm:$0xf0]  ;;  %v4876_v27 = vor.u32 %v5707_v20, %v4875_v19 }
 0x26e   :  { %v5774_v19 = vld [vmem:[%s8597_s10 + $0x354] sm:$0xf] }
 0x26f   :  { %3294 = vmatpush.bf16.msrb.mxu2 %v4816_v1  ;;  %3320 = vmatpush.bf16.msra.mxu0 %v5264_v22 }
 0x270   :  { %3305 = vmatpush.bf16.msra.mxu3 %v5096_v33  ;;  %v4956_v33 = vor.u32 %v5724_v32, %v4953_v35  ;;  %v5323_v32 = vld [vmem:[%s8597_s10 + $0x4a0] sm:$0xf]  ;;  %v5819_v35 = vld [vmem:[%s8597_s10 + $0x4b8] sm:$0xf0] }
 0x271   :  { %v5324_v38 = vor.u32 %v5819_v35, %v5323_v32  ;;  %v5129_v32 = vld [vmem:[%s8597_s10 + $0x334] sm:$0xf0]  ;;  %v4959_v35 = vld [vmem:[%s8597_s10 + $0x1c8] sm:$0xf] }
 0x273   :  { %3295 = vmatpush.bf16.msrb.mxu2 %v4788_v12  ;;  %3321 = vmatpush.bf16.msra.mxu0 %v5236_v30  ;;  %v5155_v12 = vld [vmem:[%s8597_s10 + $0x350] sm:$0xf]  ;;  %v5352_v30 = vor.u32 %v5826_v24, %v5351_v23  ;;  %v5211_v23 = vld [vmem:[%s8597_s10 + $0x3c0] sm:$0xf]  ;;  %v5791_v24 = vld [vmem:[%s8597_s10 + $0x3d8] sm:$0xf0] }
 0x274   :  { %3306 = vmatpush.bf16.msra.mxu3 %v5068_v44  ;;  %v5156_v22 = vor.u32 %v5777_v13, %v5155_v12  ;;  %v5697_v13 = vld [vmem:[%s8597_s10 + $0xec] sm:$0xf]  ;;  %v5212_v29 = vor.u32 %v5791_v24, %v5211_v23 }
 0x275   :  { %v5809_v24 = vld [vmem:[%s8597_s10 + $0x46c] sm:$0xf] }
 0x277   :  { %3296 = vmatpush.bf16.msrb.mxu2 %v4760_v25  ;;  %3322 = vmatpush.bf16.msra.mxu0 %v5208_v18  ;;  %v5718_v18 = vld [vmem:[%s8597_s10 + $0x194] sm:$0xf] }
 0x278   :  { %3307 = vmatpush.bf16.msra.mxu3 %v5040_v4 }
 0x27b   :  { %3297 = vmatpush.bf16.msrb.mxu2 %v4732_v31  ;;  %3323 = vmatpush.bf16.msra.mxu0 %v5180_v39  ;;  %v4819_v39 = vld [vmem:[%s8597_s10 + $0xb0] sm:$0xf] }
 0x27c   :  { %3308 = vmatpush.bf16.msra.mxu3 %v5012_v15  ;;  %v4904_v15 = vor.u32 %v5714_v9, %v4903_v8  ;;  %v5679_v8 = vld [vmem:[%s8597_s10 + $0x58] sm:$0xf0] }
 0x280   :  { %3309 = vmatpush.bf16.msra.mxu3 %v4984_v51  ;;  %v5770_v51 = vld [vmem:[%s8597_s10 + $0x330] sm:$0xf0] }
 0x281   :  { %v5128_v31 = vor.u32 %v5770_v51, %v5127_v26  ;;  %v4987_v26 = vld [vmem:[%s8597_s10 + $0x200] sm:$0xf]  ;;  %v5735_v51 = vld [vmem:[%s8597_s10 + $0x218] sm:$0xf0] }
 0x284   :  { %3310 = vmatpush.bf16.msra.mxu3 %v4956_v33  ;;  %v5099_v33 = vld [vmem:[%s8597_s10 + $0x2e0] sm:$0xf] }
 0x2da   :  { %v2067_v42 = vpop.f32.mrf.mxu0 }
 0x2db   :  { %v2068_v44 = vadd.f32 %v2067_v42, %v7655_v45  ;;  %v2080_v49 = vpop.f32.mrf.mxu1  ;;  %v5721_v45 = vld [vmem:[%s8597_s10 + $0x1a8] sm:$0xf0]  ;;  %v5295_v42 = vld [vmem:[%s8597_s10 + $0x468] sm:$0xf] }
 0x2dc   :  { %v2081_v50 = vadd.f32 %v2080_v49, %v7657_v46  ;;  %v2099_v46 = vperm.slane %v2097_v40, 0  ;;  %v4932_v4 = vor.u32 %v5721_v45, %v4931_v59  ;;  %v5693_v40 = vld [vmem:[%s8597_s10 + $0xc8] sm:$0xf0]  ;;  %v5071_v49 = vld [vmem:[%s8597_s10 + $0x2a8] sm:$0xf] }
 0x2dd   :  { %v2108_v52 = vadd.f32 %v2100_v41, %v2068_v44  ;;  %v5100_v41 = vor.u32 %v5763_v34, %v5099_v33  ;;  %v4936_v44 = vor.u32 %v5718_v18, %v4933_v37  ;;  %v4791_v59 = vld [vmem:[%s8597_s10 + $0x78] sm:$0xf]  ;;  %v5686_v45 = vld [vmem:[%s8597_s10 + $0x90] sm:$0xf0]  ;;  %v4988_v33 = vor.u32 %v5735_v51, %v4987_v26  ;;  %v5728_v34 = vld [vmem:[%s8597_s10 + $0x1e0] sm:$0xf0] }
 0x2de   :  { %v2109_v58 = vadd.f32 %v2101_v43, %v2081_v50  ;;  %v5812_v43 = vld [vmem:[%s8597_s10 + $0x480] sm:$0xf0]  ;;  %v5135_v51 = vld [vmem:[%s8597_s10 + $0x320] sm:$0xf] }
 0x2df   :  { %v2112_v60 = vmax.f32 %v2108_v52, 0.0  ;;  %v5756_v50 = vld [vmem:[%s8597_s10 + $0x2c0] sm:$0xf0]  ;;  %v4820_v52 = vor.u32 %v5693_v40, %v4819_v39  ;;  %v5837_v39 = vld [vmem:[%s8597_s10 + $0x54c] sm:$0xf] }
 0x2e0   :  { %v2113_v61 = vmax.f32 %v2109_v58, 0.0  ;;  %v2054_v62 = vpop.f32.mrf.mxu3  ;;  %v5296_v58 = vor.u32 %v5812_v43, %v5295_v42  ;;  %v5784_v18 = vld [vmem:[%s8597_s10 + $0x3a0] sm:$0xf0]  ;;  %v5409_v40 = vld [vmem:[%s8597_s10 + $0x564] sm:$0xf0] }
 0x2e1   :  { %v7782_v1 = vpack.c.bf16 %v2112_v60, %v2112_v60  ;;  %v2055_v2 = vadd.f32 %v2054_v62, %v7659_v47  ;;  %v2093_v3 = vpop.f32.mrf.mxu2  ;;  %v5379_v47 = vld [vmem:[%s8597_s10 + $0x510] sm:$0xf]  ;;  %v5072_v60 = vor.u32 %v5756_v50, %v5071_v49  ;;  %v4908_v62 = vor.u32 %v5711_v54, %v4905_v56  ;;  %v5683_v42 = vld [vmem:[%s8597_s10 + $0x7c] sm:$0xf]  ;;  %v4793_v43 = vld [vmem:[%s8597_s10 + $0x94] sm:$0xf0] }
 0x2e2   :  { %v7785_v53 = vpack.c.bf16 %v2113_v61, %v2113_v61  ;;  %v2094_v5 = vadd.f32 %v2093_v3, %v7661_v48  ;;  %v2069_v6 = vpop.f32.mrf.mxu0  ;;  %v5833_v48 = vld [vmem:[%s8597_s10 + $0x528] sm:$0xf0]  ;;  %v5704_v3 = vld [vmem:[%s8597_s10 + $0x124] sm:$0xf]  ;;  %v4960_v50 = vor.u32 %v5728_v34, %v4959_v35  ;;  %v5101_v54 = vld [vmem:[%s8597_s10 + $0x2fc] sm:$0xf0]  ;;  %v5412_v56 = vor.u32 %v5837_v39, %v5409_v40 }
 0x2e3   :  { %v2107_v10 = vadd.f32 %v2099_v46, %v2055_v2  ;;  %v2082_v11 = vpop.f32.mrf.mxu1  ;;  %3259 = vmatmul.bf16.vlgmr.msrb.gmra.mxu0 %v7782_v1  ;;  %v5380_v7 = vor.u32 %v5833_v48, %v5379_v47  ;;  %v5267_v46 = vld [vmem:[%s8597_s10 + $0x430] sm:$0xf]  ;;  %v5805_v61 = vld [vmem:[%s8597_s10 + $0x448] sm:$0xf0]  ;;  %v4792_v2 = vor.u32 %v5686_v45, %v4791_v59  ;;  %v4763_v6 = vld [vmem:[%s8597_s10 + $0x40] sm:$0xf]  ;;  %v4796_v59 = vor.u32 %v5683_v42, %v4793_v43 }
 0x2e4   :  { %v2110_v55 = vadd.f32 %v2102_v63, %v2094_v5  ;;  %3272 = vmatmul.bf16.vlgmr.msra.gmra.mxu1 %v7785_v53  ;;  %3388 = vmatpush.bf16.msrb.mxu0 %v5408_v0  ;;  %v5043_v63 = vld [vmem:[%s8597_s10 + $0x270] sm:$0xf]  ;;  %v5749_v0 = vld [vmem:[%s8597_s10 + $0x288] sm:$0xf0]  ;;  %v5268_v5 = vor.u32 %v5805_v61, %v5267_v46  ;;  %v5798_v11 = vld [vmem:[%s8597_s10 + $0x410] sm:$0xf0]  ;;  %v4764_v12 = vor.u32 %v5679_v8, %v4763_v6 }
 0x2e5   :  { %v2111_v14 = vmax.f32 %v2107_v10, 0.0  ;;  %3342 = vmatpush.bf16.msra.mxu1 %v4932_v4  ;;  %v4877_v4 = vld [vmem:[%s8597_s10 + $0x13c] sm:$0xf0]  ;;  %v5044_v9 = vor.u32 %v5749_v0, %v5043_v63  ;;  %v5239_v10 = vld [vmem:[%s8597_s10 + $0x3f8] sm:$0xf] }
 0x2e6   :  { %v2114_v16 = vmax.f32 %v2110_v55, 0.0  ;;  %v4880_v47 = vor.u32 %v5704_v3, %v4877_v4  ;;  %v5015_v48 = vld [vmem:[%s8597_s10 + $0x238] sm:$0xf]  ;;  %v5742_v55 = vld [vmem:[%s8597_s10 + $0x250] sm:$0xf0] }
 0x2e7   :  { %v7814_v21 = vpack.c.bf16 %v2111_v14, %v2111_v14  ;;  %v4849_v14 = vld [vmem:[%s8597_s10 + $0x104] sm:$0xf0]  ;;  %v5016_v20 = vor.u32 %v5742_v55, %v5015_v48  ;;  %v4939_v45 = vld [vmem:[%s8597_s10 + $0x198] sm:$0xf]  ;;  %v5823_v46 = vld [vmem:[%s8597_s10 + $0x4dc] sm:$0xf] }
 0x2e8   :  { %v7822_v17 = vpack.c.bf16 %v2114_v16, %v2114_v16  ;;  %v2056_v25 = vpop.f32.mrf.mxu3  ;;  %v4735_v16 = vld [vmem:[%s8597_s10 + $0x8] sm:$0xf]  ;;  %v5353_v61 = vld [vmem:[%s8597_s10 + $0x4f4] sm:$0xf0]  ;;  %v4765_v63 = vld [vmem:[%s8597_s10 + $0x5c] sm:$0xf0] }
 0x2e9   :  { %3343 = vmatpush.bf16.msra.mxu1 %v4904_v15  ;;  %v2095_v57 = vpop.f32.mrf.mxu2  ;;  %3246 = vmatmul.bf16.vlgmr.msrb.gmra.mxu3 %v7814_v21  ;;  %v5240_v15 = vor.u32 %v5798_v11, %v5239_v10  ;;  %v4852_v25 = vor.u32 %v5697_v13, %v4849_v14  ;;  %v5753_v3 = vld [vmem:[%s8597_s10 + $0x2ac] sm:$0xf]  ;;  %v5073_v4 = vld [vmem:[%s8597_s10 + $0x2c4] sm:$0xf0]  ;;  %v4911_v8 = vld [vmem:[%s8597_s10 + $0x160] sm:$0xf] }
 0x2ea   :  { %5425 = vmatmul.msk.bf16.vlgmr.msra.gmra.mxu2 %vm1247_vm0, %v7822_v17  ;;  %3368 = vmatpush.bf16.msrb.mxu3 %v5380_v7  ;;  %v5672_v7 = vld [vmem:[%s8597_s10 + $0x20] sm:$0xf0]  ;;  %v5325_v11 = vld [vmem:[%s8597_s10 + $0x4bc] sm:$0xf0]  ;;  %v4737_v48 = vld [vmem:[%s8597_s10 + $0x24] sm:$0xf0]  ;;  %v5076_v55 = vor.u32 %v5753_v3, %v5073_v4 }
 0x2eb   :  { %3355 = vmatpush.bf16.msra.mxu2 %v5156_v22  ;;  %v5157_v22 = vld [vmem:[%s8597_s10 + $0x36c] sm:$0xf0]  ;;  %v4736_v57 = vor.u32 %v5672_v7, %v4735_v16  ;;  %v5816_v10 = vld [vmem:[%s8597_s10 + $0x4a4] sm:$0xf]  ;;  %v5778_v13 = vld [vmem:[%s8597_s10 + $0x370] sm:$0xf0] }
 0x2ec   :  { %v5160_v28 = vor.u32 %v5774_v19, %v5157_v22  ;;  %v5045_v16 = vld [vmem:[%s8597_s10 + $0x28c] sm:$0xf0]  ;;  %v5328_v7 = vor.u32 %v5816_v10, %v5325_v11  ;;  %v5708_v22 = vld [vmem:[%s8597_s10 + $0x140] sm:$0xf0]  ;;  %v4989_v40 = vld [vmem:[%s8597_s10 + $0x21c] sm:$0xf0] }
 0x2ed   :  { %3344 = vmatpush.bf16.msra.mxu1 %v4876_v27  ;;  %v5690_v27 = vld [vmem:[%s8597_s10 + $0xb4] sm:$0xf]  ;;  %v5269_v34 = vld [vmem:[%s8597_s10 + $0x44c] sm:$0xf0]  ;;  %v5732_v39 = vld [vmem:[%s8597_s10 + $0x204] sm:$0xf] }
 0x2ee   :  { %3369 = vmatpush.bf16.msrb.mxu3 %v5352_v30  ;;  %v4821_v30 = vld [vmem:[%s8597_s10 + $0xcc] sm:$0xf0]  ;;  %v4827_v42 = vld [vmem:[%s8597_s10 + $0xb8] sm:$0xf]  ;;  %v5694_v43 = vld [vmem:[%s8597_s10 + $0xd0] sm:$0xf0] }
 0x2ef   :  { %3356 = vmatpush.bf16.msra.mxu2 %v5128_v31  ;;  %v5767_v31 = vld [vmem:[%s8597_s10 + $0x31c] sm:$0xf]  ;;  %v4824_v37 = vor.u32 %v5690_v27, %v4821_v30  ;;  %v5213_v3 = vld [vmem:[%s8597_s10 + $0x3dc] sm:$0xf0]  ;;  %v4771_v10 = vld [vmem:[%s8597_s10 + $0x48] sm:$0xf] }
 0x2f0   :  { %v5739_v30 = vld [vmem:[%s8597_s10 + $0x23c] sm:$0xf] }
 0x2f1   :  { %3345 = vmatpush.bf16.msra.mxu1 %v4848_v36  ;;  %v5183_v36 = vld [vmem:[%s8597_s10 + $0x388] sm:$0xf] }
 0x2f2   :  { %3370 = vmatpush.bf16.msrb.mxu3 %v5324_v38  ;;  %v5830_v38 = vld [vmem:[%s8597_s10 + $0x514] sm:$0xf]  ;;  %v5184_v49 = vor.u32 %v5784_v18, %v5183_v36  ;;  %v5107_v18 = vld [vmem:[%s8597_s10 + $0x2e8] sm:$0xf] }
 0x2f3   :  { %3357 = vmatpush.bf16.msra.mxu2 %v5100_v41  ;;  %3324 = vmatmul.bf16.vlgmr.msra.gmra.mxu0 %v7785_v53  ;;  %v5381_v41 = vld [vmem:[%s8597_s10 + $0x52c] sm:$0xf0] }
 0x2f4   :  { %5426 = vmatmul.msk.bf16.vlgmr.msrb.gmra.mxu1 %vm1247_vm0, %v7822_v17  ;;  %3394 = vmatpush.bf16.msra.mxu0 %v4936_v44  ;;  %v5132_v44 = vor.u32 %v5767_v31, %v5129_v32  ;;  %v4855_v31 = vld [vmem:[%s8597_s10 + $0xf0] sm:$0xf]  ;;  %v5701_v32 = vld [vmem:[%s8597_s10 + $0x108] sm:$0xf0] }
 0x2f5   :  { %3346 = vmatpush.bf16.msra.mxu1 %v4820_v52  ;;  %v5760_v52 = vld [vmem:[%s8597_s10 + $0x2e4] sm:$0xf] }
 0x2f6   :  { %3371 = vmatpush.bf16.msrb.mxu3 %v5296_v58  ;;  %v5384_v58 = vor.u32 %v5830_v38, %v5381_v41  ;;  %v5104_v0 = vor.u32 %v5760_v52, %v5101_v54  ;;  %v4856_v38 = vor.u32 %v5701_v32, %v4855_v31  ;;  %v4992_v52 = vor.u32 %v5732_v39, %v4989_v40  ;;  %v5079_v54 = vld [vmem:[%s8597_s10 + $0x2b0] sm:$0xf]  ;;  %v5165_v31 = vld [vmem:[%s8597_s10 + $0x374] sm:$0xf0]  ;;  %v4995_v32 = vld [vmem:[%s8597_s10 + $0x208] sm:$0xf] }
 0x2f7   :  { %3358 = vmatpush.bf16.msra.mxu2 %v5072_v60  ;;  %v5722_v60 = vld [vmem:[%s8597_s10 + $0x1b0] sm:$0xf0]  ;;  %v5712_v40 = vld [vmem:[%s8597_s10 + $0x164] sm:$0xf] }
 0x2f8   :  { %3395 = vmatpush.bf16.msra.mxu0 %v4908_v62  ;;  %v5676_v62 = vld [vmem:[%s8597_s10 + $0x44] sm:$0xf] }
 0x2f9   :  { %3347 = vmatpush.bf16.msra.mxu1 %v4792_v2  ;;  %3311 = vmatmul.bf16.vlgmr.msra.gmra.mxu3 %v7782_v1  ;;  %v4940_v2 = vor.u32 %v5722_v60, %v4939_v45  ;;  %v4768_v6 = vor.u32 %v5676_v62, %v4765_v63  ;;  %v4961_v45 = vld [vmem:[%s8597_s10 + $0x1e4] sm:$0xf0]  ;;  %v4799_v60 = vld [vmem:[%s8597_s10 + $0x80] sm:$0xf]  ;;  %v5387_v62 = vld [vmem:[%s8597_s10 + $0x518] sm:$0xf] }
 0x2fa   :  { %3298 = vmatmul.bf16.vlgmr.msrb.gmra.mxu2 %v7814_v21  ;;  %3372 = vmatpush.bf16.msrb.mxu3 %v5268_v5  ;;  %v5356_v5 = vor.u32 %v5823_v46, %v5353_v61  ;;  %v5687_v61 = vld [vmem:[%s8597_s10 + $0x98] sm:$0xf0]  ;;  %v5834_v63 = vld [vmem:[%s8597_s10 + $0x530] sm:$0xf0] }
 0x2fb   :  { %3359 = vmatpush.bf16.msra.mxu2 %v5044_v9  ;;  %v5715_v9 = vld [vmem:[%s8597_s10 + $0x178] sm:$0xf0] }
 0x2fc   :  { %3396 = vmatpush.bf16.msra.mxu0 %v4880_v47  ;;  %v5669_v47 = vld [vmem:[%s8597_s10 + $0xc] sm:$0xf]  ;;  %v4912_v14 = vor.u32 %v5715_v9, %v4911_v8  ;;  %v4800_v8 = vor.u32 %v5687_v61, %v4799_v60  ;;  %v5388_v9 = vor.u32 %v5834_v63, %v5387_v62  ;;  %v5806_v60 = vld [vmem:[%s8597_s10 + $0x450] sm:$0xf0]  ;;  %v4885_v61 = vld [vmem:[%s8597_s10 + $0x144] sm:$0xf0] }
 0x2fd   :  { %3348 = vmatpush.bf16.msra.mxu1 %v4764_v12  ;;  %v5163_v12 = vld [vmem:[%s8597_s10 + $0x358] sm:$0xf]  ;;  %v4740_v19 = vor.u32 %v5669_v47, %v4737_v48  ;;  %v5680_v47 = vld [vmem:[%s8597_s10 + $0x60] sm:$0xf0]  ;;  %v5359_v48 = vld [vmem:[%s8597_s10 + $0x4e0] sm:$0xf] }
 0x2fe   :  { %3373 = vmatpush.bf16.msrb.mxu3 %v5240_v15  ;;  %v5746_v15 = vld [vmem:[%s8597_s10 + $0x274] sm:$0xf]  ;;  %v5164_v23 = vor.u32 %v5778_v13, %v5163_v12  ;;  %v5781_v13 = vld [vmem:[%s8597_s10 + $0x38c] sm:$0xf] }
 0x2ff   :  { %3360 = vmatpush.bf16.msra.mxu2 %v5016_v20  ;;  %v4883_v20 = vld [vmem:[%s8597_s10 + $0x128] sm:$0xf]  ;;  %v5048_v26 = vor.u32 %v5746_v15, %v5045_v16  ;;  %v5023_v15 = vld [vmem:[%s8597_s10 + $0x240] sm:$0xf]  ;;  %v5743_v16 = vld [vmem:[%s8597_s10 + $0x258] sm:$0xf0] }
 0x300   :  { %3397 = vmatpush.bf16.msra.mxu0 %v4852_v25  ;;  %v5297_v25 = vld [vmem:[%s8597_s10 + $0x484] sm:$0xf0]  ;;  %v4884_v27 = vor.u32 %v5708_v22, %v4883_v20  ;;  %v4772_v20 = vor.u32 %v5680_v47, %v4771_v10  ;;  %v5761_v63 = vld [vmem:[%s8597_s10 + $0x2ec] sm:$0xf]  ;;  %v5698_v10 = vld [vmem:[%s8597_s10 + $0xf4] sm:$0xf] }
 0x301   :  { %3349 = vmatpush.bf16.msra.mxu1 %v4736_v57  ;;  %v5771_v57 = vld [vmem:[%s8597_s10 + $0x338] sm:$0xf0] }
 0x302   :  { %3374 = vmatpush.bf16.msrb.mxu3 %v5212_v29  ;;  %v5300_v29 = vor.u32 %v5809_v24, %v5297_v25  ;;  %v5136_v35 = vor.u32 %v5771_v57, %v5135_v51  ;;  %v5673_v25 = vld [vmem:[%s8597_s10 + $0x28] sm:$0xf0]  ;;  %v5820_v51 = vld [vmem:[%s8597_s10 + $0x4c0] sm:$0xf0]  ;;  %v5024_v57 = vor.u32 %v5743_v16, %v5023_v15  ;;  %v5219_v16 = vld [vmem:[%s8597_s10 + $0x3c8] sm:$0xf] }
 0x303   :  { %3361 = vmatpush.bf16.msra.mxu2 %v4988_v33  ;;  %5427 = vmatmul.msk.bf16.vlgmr.msrb.gmra.mxu0 %vm1247_vm0, %v7822_v17  ;;  %v5802_v33 = vld [vmem:[%s8597_s10 + $0x434] sm:$0xf] }
 0x304   :  { %3350 = vmatmul.bf16.vlgmr.msra.gmra.mxu1 %v7814_v21  ;;  %3398 = vmatpush.bf16.msra.mxu0 %v4824_v37  ;;  %v5764_v37 = vld [vmem:[%s8597_s10 + $0x300] sm:$0xf0]  ;;  %v5272_v41 = vor.u32 %v5802_v33, %v5269_v34 }
 0x305   :  { %3407 = vmatpush.bf16.msrb.mxu1 %v5160_v28  ;;  %v5017_v28 = vld [vmem:[%s8597_s10 + $0x254] sm:$0xf0] }
 0x306   :  { %3375 = vmatpush.bf16.msrb.mxu3 %v5184_v49  ;;  %v5020_v36 = vor.u32 %v5739_v30, %v5017_v28  ;;  %v5795_v49 = vld [vmem:[%s8597_s10 + $0x3fc] sm:$0xf]  ;;  %v4941_v28 = vld [vmem:[%s8597_s10 + $0x1b4] sm:$0xf0] }
 0x307   :  { %3362 = vmatpush.bf16.msra.mxu2 %v4960_v50  ;;  %v5241_v50 = vld [vmem:[%s8597_s10 + $0x414] sm:$0xf0]  ;;  %v5719_v30 = vld [vmem:[%s8597_s10 + $0x19c] sm:$0xf] }
 0x308   :  { %3399 = vmatpush.bf16.msra.mxu0 %v4796_v59  ;;  %v5725_v59 = vld [vmem:[%s8597_s10 + $0x1cc] sm:$0xf]  ;;  %v5244_v46 = vor.u32 %v5795_v49, %v5241_v50  ;;  %v5831_v50 = vld [vmem:[%s8597_s10 + $0x51c] sm:$0xf] }
 0x309   :  { %3408 = vmatpush.bf16.msrb.mxu1 %v5132_v44  ;;  %3376 = vmatmul.bf16.vlgmr.msrb.gmra.mxu3 %v7785_v53  ;;  %v5108_v44 = vor.u32 %v5764_v37, %v5107_v18  ;;  %v4964_v4 = vor.u32 %v5725_v59, %v4961_v45  ;;  %v5303_v18 = vld [vmem:[%s8597_s10 + $0x470] sm:$0xf]  ;;  %v5813_v37 = vld [vmem:[%s8597_s10 + $0x488] sm:$0xf0] }
 0x30a   :  { %3440 = vmatpush.bf16.msra.mxu3 %v5412_v56  ;;  %3363 = vmatmul.bf16.vlgmr.msra.gmra.mxu2 %v7782_v1  ;;  %v5757_v56 = vld [vmem:[%s8597_s10 + $0x2c8] sm:$0xf0] }
 0x30b   :  { %3420 = vmatpush.bf16.msrb.mxu2 %v5384_v58  ;;  %v4828_v58 = vor.u32 %v5694_v43, %v4827_v42  ;;  %v5768_v42 = vld [vmem:[%s8597_s10 + $0x324] sm:$0xf]  ;;  %v5137_v43 = vld [vmem:[%s8597_s10 + $0x33c] sm:$0xf0]  ;;  %v5729_v49 = vld [vmem:[%s8597_s10 + $0x1e8] sm:$0xf0] }
 0x30c   :  { %3400 = vmatpush.bf16.msra.mxu0 %v4768_v6  ;;  %v5750_v6 = vld [vmem:[%s8597_s10 + $0x290] sm:$0xf0]  ;;  %v5140_v59 = vor.u32 %v5768_v42, %v5137_v43 }
 0x30d   :  { %3409 = vmatpush.bf16.msrb.mxu1 %v5104_v0  ;;  %v5080_v0 = vor.u32 %v5757_v56, %v5079_v54  ;;  %v5304_v54 = vor.u32 %v5813_v37, %v5303_v18  ;;  %v5417_v18 = vld [vmem:[%s8597_s10 + $0x56c] sm:$0xf0]  ;;  %v5803_v37 = vld [vmem:[%s8597_s10 + $0x43c] sm:$0xf] }
 0x30e   :  { %3446 = vmatpush.bf16.msrb.mxu3 %v4940_v2  ;;  %v5788_v2 = vld [vmem:[%s8597_s10 + $0x3c4] sm:$0xf] }
 0x30f   :  { %3421 = vmatpush.bf16.msrb.mxu2 %v5356_v5  ;;  %v5051_v5 = vld [vmem:[%s8597_s10 + $0x278] sm:$0xf]  ;;  %v5216_v11 = vor.u32 %v5788_v2, %v5213_v3  ;;  %v5824_v2 = vld [vmem:[%s8597_s10 + $0x4e4] sm:$0xf]  ;;  %v5361_v3 = vld [vmem:[%s8597_s10 + $0x4fc] sm:$0xf0] }
 0x310   :  { %3401 = vmatpush.bf16.msra.mxu0 %v4740_v19  ;;  %v5052_v12 = vor.u32 %v5750_v6, %v5051_v5  ;;  %v5841_v19 = vld [vmem:[%s8597_s10 + $0x568] sm:$0xf0]  ;;  %v5247_v6 = vld [vmem:[%s8597_s10 + $0x400] sm:$0xf]  ;;  %v5364_v47 = vor.u32 %v5824_v2, %v5361_v3  ;;  %v5726_v2 = vld [vmem:[%s8597_s10 + $0x1d4] sm:$0xf] }
 0x311   :  { %3410 = vmatpush.bf16.msrb.mxu1 %v5076_v55  ;;  %v5827_v55 = vld [vmem:[%s8597_s10 + $0x4f8] sm:$0xf0]  ;;  %v4969_v3 = vld [vmem:[%s8597_s10 + $0x1ec] sm:$0xf0] }
 0x312   :  { %3447 = vmatpush.bf16.msrb.mxu3 %v4912_v14  ;;  %v5185_v14 = vld [vmem:[%s8597_s10 + $0x3a4] sm:$0xf0]  ;;  %v5360_v22 = vor.u32 %v5827_v55, %v5359_v48  ;;  %v5754_v48 = vld [vmem:[%s8597_s10 + $0x2b4] sm:$0xf]  ;;  %v5081_v55 = vld [vmem:[%s8597_s10 + $0x2cc] sm:$0xf0] }
 0x313   :  { %3422 = vmatpush.bf16.msrb.mxu2 %v5328_v7  ;;  %3402 = vmatmul.bf16.vlgmr.msra.gmra.mxu0 %v7814_v21  ;;  %v5415_v7 = vld [vmem:[%s8597_s10 + $0x550] sm:$0xf]  ;;  %v5188_v24 = vor.u32 %v5781_v13, %v5185_v14  ;;  %v5333_v13 = vld [vmem:[%s8597_s10 + $0x4c4] sm:$0xf0] }
 0x314   :  { %3459 = vmatpush.bf16.msrb.mxu0 %v5164_v23  ;;  %v4743_v23 = vld [vmem:[%s8597_s10 + $0x10] sm:$0xf] }
 0x315   :  { %3411 = vmatpush.bf16.msrb.mxu1 %v5048_v26  ;;  %v5331_v26 = vld [vmem:[%s8597_s10 + $0x4a8] sm:$0xf]  ;;  %v4744_v33 = vor.u32 %v5673_v25, %v4743_v23  ;;  %v5053_v25 = vld [vmem:[%s8597_s10 + $0x294] sm:$0xf0] }
 0x316   :  { %3448 = vmatpush.bf16.msrb.mxu3 %v4884_v27  ;;  %v5416_v27 = vor.u32 %v5841_v19, %v5415_v7  ;;  %v5332_v34 = vor.u32 %v5820_v51, %v5331_v26  ;;  %v5084_v7 = vor.u32 %v5754_v48, %v5081_v55  ;;  %v5792_v19 = vld [vmem:[%s8597_s10 + $0x3e0] sm:$0xf0]  ;;  %v5810_v26 = vld [vmem:[%s8597_s10 + $0x474] sm:$0xf]  ;;  %v5305_v51 = vld [vmem:[%s8597_s10 + $0x48c] sm:$0xf0]  ;;  %v4972_v55 = vor.u32 %v5726_v2, %v4969_v3 }
 0x317   :  { %3423 = vmatpush.bf16.msrb.mxu2 %v5300_v29  ;;  %v5775_v29 = vld [vmem:[%s8597_s10 + $0x35c] sm:$0xf]  ;;  %v5744_v2 = vld [vmem:[%s8597_s10 + $0x260] sm:$0xf0]  ;;  %v5255_v3 = vld [vmem:[%s8597_s10 + $0x408] sm:$0xf] }
 0x318   :  { %3460 = vmatpush.bf16.msrb.mxu0 %v5136_v35  ;;  %v5736_v35 = vld [vmem:[%s8597_s10 + $0x220] sm:$0xf0] }
 0x319   :  { %3412 = vmatpush.bf16.msrb.mxu1 %v5020_v36  ;;  %5428 = vmatmul.msk.bf16.vlgmr.msra.gmra.mxu3 %vm1247_vm0, %v7822_v17  ;;  %v4944_v36 = vor.u32 %v5719_v30, %v4941_v28  ;;  %v4996_v39 = vor.u32 %v5736_v35, %v4995_v32  ;;  %v5191_v30 = vld [vmem:[%s8597_s10 + $0x390] sm:$0xf]  ;;  %v5785_v28 = vld [vmem:[%s8597_s10 + $0x3a8] sm:$0xf0]  ;;  %v4801_v32 = vld [vmem:[%s8597_s10 + $0x9c] sm:$0xf0] }
 0x31a   :  { %3449 = vmatpush.bf16.msrb.mxu3 %v4856_v38  ;;  %v5168_v38 = vor.u32 %v5775_v29, %v5165_v31  ;;  %v5684_v31 = vld [vmem:[%s8597_s10 + $0x84] sm:$0xf] }
 0x31b   :  { %3424 = vmatpush.bf16.msrb.mxu2 %v5272_v41  ;;  %v4913_v41 = vld [vmem:[%s8597_s10 + $0x17c] sm:$0xf0]  ;;  %v5740_v35 = vld [vmem:[%s8597_s10 + $0x244] sm:$0xf] }
 0x31c   :  { %3461 = vmatpush.bf16.msrb.mxu0 %v5108_v44  ;;  %v4967_v44 = vld [vmem:[%s8597_s10 + $0x1d0] sm:$0xf]  ;;  %v4916_v56 = vor.u32 %v5712_v40, %v4913_v41  ;;  %v4804_v40 = vor.u32 %v5684_v31, %v4801_v32  ;;  %v4947_v41 = vld [vmem:[%s8597_s10 + $0x1a0] sm:$0xf]  ;;  %v5765_v32 = vld [vmem:[%s8597_s10 + $0x308] sm:$0xf0] }
 0x31d   :  { %3413 = vmatpush.bf16.msrb.mxu1 %v4992_v52  ;;  %v5389_v52 = vld [vmem:[%s8597_s10 + $0x534] sm:$0xf0]  ;;  %v4968_v45 = vor.u32 %v5729_v49, %v4967_v44  ;;  %v5723_v44 = vld [vmem:[%s8597_s10 + $0x1b8] sm:$0xf0]  ;;  %v5677_v49 = vld [vmem:[%s8597_s10 + $0x4c] sm:$0xf] }
 0x31e   :  { %3450 = vmatpush.bf16.msrb.mxu3 %v4828_v58  ;;  %v5275_v58 = vld [vmem:[%s8597_s10 + $0x438] sm:$0xf]  ;;  %v5392_v62 = vor.u32 %v5831_v50, %v5389_v52  ;;  %v4773_v50 = vld [vmem:[%s8597_s10 + $0x64] sm:$0xf0]  ;;  %v5115_v31 = vld [vmem:[%s8597_s10 + $0x2f0] sm:$0xf] }
 0x31f   :  { %3425 = vmatpush.bf16.msrb.mxu2 %v5244_v46  ;;  %v5705_v46 = vld [vmem:[%s8597_s10 + $0x12c] sm:$0xf] }
 0x320   :  { %3462 = vmatpush.bf16.msrb.mxu0 %v5080_v0  ;;  %v5109_v0 = vld [vmem:[%s8597_s10 + $0x304] sm:$0xf0]  ;;  %v4888_v5 = vor.u32 %v5705_v46, %v4885_v61  ;;  %v5716_v61 = vld [vmem:[%s8597_s10 + $0x180] sm:$0xf0] }
 0x321   :  { %3414 = vmatpush.bf16.msrb.mxu1 %v4964_v4  ;;  %v5276_v4 = vor.u32 %v5806_v60, %v5275_v58  ;;  %v5796_v58 = vld [vmem:[%s8597_s10 + $0x404] sm:$0xf]  ;;  %v4776_v60 = vor.u32 %v5677_v49, %v4773_v50  ;;  %v4919_v46 = vld [vmem:[%s8597_s10 + $0x168] sm:$0xf] }
 0x322   :  { %3451 = vmatpush.bf16.msrb.mxu3 %v4800_v8  ;;  %v5112_v8 = vor.u32 %v5761_v63, %v5109_v0  ;;  %v4745_v0 = vld [vmem:[%s8597_s10 + $0x2c] sm:$0xf0]  ;;  %v4807_v50 = vld [vmem:[%s8597_s10 + $0x88] sm:$0xf] }
 0x323   :  { %3426 = vmatpush.bf16.msrb.mxu2 %v5216_v11  ;;  %v4857_v11 = vld [vmem:[%s8597_s10 + $0x10c] sm:$0xf0] }
 0x324   :  { %3415 = vmatmul.bf16.vlgmr.msrb.gmra.mxu1 %v7782_v1  ;;  %3463 = vmatpush.bf16.msrb.mxu0 %v5052_v12  ;;  %v5817_v12 = vld [vmem:[%s8597_s10 + $0x4ac] sm:$0xf]  ;;  %v4860_v15 = vor.u32 %v5698_v10, %v4857_v11  ;;  %v5221_v11 = vld [vmem:[%s8597_s10 + $0x3e4] sm:$0xf0] }
 0x325   :  { %3472 = vmatpush.bf16.msra.mxu1 %v5388_v9  ;;  %v5799_v9 = vld [vmem:[%s8597_s10 + $0x418] sm:$0xf0]  ;;  %v5336_v23 = vor.u32 %v5817_v12, %v5333_v13  ;;  %v5789_v10 = vld [vmem:[%s8597_s10 + $0x3cc] sm:$0xf]  ;;  %v4891_v13 = vld [vmem:[%s8597_s10 + $0x130] sm:$0xf] }
 0x326   :  { %3452 = vmatpush.bf16.msrb.mxu3 %v4772_v20  ;;  %v5248_v14 = vor.u32 %v5799_v9, %v5247_v6  ;;  %v5691_v20 = vld [vmem:[%s8597_s10 + $0xbc] sm:$0xf] }
 0x327   :  { %3427 = vmatpush.bf16.msrb.mxu2 %v5188_v24  ;;  %v5747_v24 = vld [vmem:[%s8597_s10 + $0x27c] sm:$0xf] }
 0x328   :  { %3464 = vmatpush.bf16.msrb.mxu0 %v5024_v57  ;;  %v5220_v57 = vor.u32 %v5792_v19, %v5219_v16  ;;  %v5056_v29 = vor.u32 %v5747_v24, %v5053_v25  ;;  %v5779_v6 = vld [vmem:[%s8597_s10 + $0x378] sm:$0xf0]  ;;  %v5224_v16 = vor.u32 %v5789_v10, %v5221_v11  ;;  %v5772_v19 = vld [vmem:[%s8597_s10 + $0x340] sm:$0xf0]  ;;  %v5193_v24 = vld [vmem:[%s8597_s10 + $0x3ac] sm:$0xf0] }
 0x329   :  { %3473 = vmatpush.bf16.msra.mxu1 %v5360_v22  ;;  %v4829_v22 = vld [vmem:[%s8597_s10 + $0xd4] sm:$0xf0]  ;;  %v5835_v9 = vld [vmem:[%s8597_s10 + $0x538] sm:$0xf0]  ;;  %v5003_v11 = vld [vmem:[%s8597_s10 + $0x210] sm:$0xf] }
 0x32a   :  { %3428 = vmatmul.bf16.vlgmr.msrb.gmra.mxu2 %v7785_v53  ;;  %3453 = vmatpush.bf16.msrb.mxu3 %v4744_v33  ;;  %v5308_v33 = vor.u32 %v5810_v26, %v5305_v51  ;;  %v5423_v26 = vld [vmem:[%s8597_s10 + $0x558] sm:$0xf]  ;;  %v5842_v51 = vld [vmem:[%s8597_s10 + $0x570] sm:$0xf0] }
 0x32b   :  { %3492 = vmatpush.bf16.msra.mxu2 %v5416_v27  ;;  %v4832_v27 = vor.u32 %v5691_v20, %v4829_v22  ;;  %v5367_v20 = vld [vmem:[%s8597_s10 + $0x4e8] sm:$0xf]  ;;  %v5828_v22 = vld [vmem:[%s8597_s10 + $0x500] sm:$0xf0] }
 0x32c   :  { %3465 = vmatpush.bf16.msrb.mxu0 %v4996_v39  ;;  %v5192_v39 = vor.u32 %v5785_v28, %v5191_v30  ;;  %v5702_v30 = vld [vmem:[%s8597_s10 + $0x110] sm:$0xf0]  ;;  %v5368_v28 = vor.u32 %v5828_v22, %v5367_v20 }
 0x32d   :  { %3474 = vmatpush.bf16.msra.mxu1 %v5332_v34  ;;  %3454 = vmatmul.bf16.vlgmr.msrb.gmra.mxu3 %v7814_v21  ;;  %v5025_v34 = vld [vmem:[%s8597_s10 + $0x25c] sm:$0xf0] }
 0x32e   :  { %3511 = vmatpush.bf16.msra.mxu3 %v5168_v38  ;;  %v5277_v38 = vld [vmem:[%s8597_s10 + $0x454] sm:$0xf0]  ;;  %v5028_v42 = vor.u32 %v5740_v35, %v5025_v34  ;;  %v5339_v35 = vld [vmem:[%s8597_s10 + $0x4b0] sm:$0xf]  ;;  %v5424_v34 = vor.u32 %v5842_v51, %v5423_v26 }
 0x32f   :  { %3498 = vmatpush.bf16.msrb.mxu2 %v4944_v36  ;;  %v5838_v36 = vld [vmem:[%s8597_s10 + $0x554] sm:$0xf]  ;;  %v5280_v52 = vor.u32 %v5803_v37, %v5277_v38  ;;  %v4835_v37 = vld [vmem:[%s8597_s10 + $0xc0] sm:$0xf]  ;;  %v5695_v38 = vld [vmem:[%s8597_s10 + $0xd8] sm:$0xf0] }
 0x330   :  { %3466 = vmatpush.bf16.msrb.mxu0 %v4968_v45  ;;  %v5420_v43 = vor.u32 %v5838_v36, %v5417_v18  ;;  %v4948_v45 = vor.u32 %v5723_v44, %v4947_v41  ;;  %v5116_v18 = vor.u32 %v5765_v32, %v5115_v31  ;;  %v5758_v41 = vld [vmem:[%s8597_s10 + $0x2d0] sm:$0xf0]  ;;  %v4836_v44 = vor.u32 %v5695_v38, %v4835_v37 }
 0x331   :  { %3475 = vmatpush.bf16.msra.mxu1 %v5304_v54  ;;  %v5733_v54 = vld [vmem:[%s8597_s10 + $0x20c] sm:$0xf] }
 0x332   :  { %3512 = vmatpush.bf16.msra.mxu3 %v5140_v59  ;;  %v5249_v59 = vld [vmem:[%s8597_s10 + $0x41c] sm:$0xf0] }
 0x333   :  { %3499 = vmatpush.bf16.msrb.mxu2 %v4916_v56  ;;  %3467 = vmatmul.bf16.vlgmr.msrb.gmra.mxu0 %v7782_v1  ;;  %v4997_v56 = vld [vmem:[%s8597_s10 + $0x224] sm:$0xf0] }
 0x334   :  { %3524 = vmatpush.bf16.msra.mxu0 %v5392_v62  ;;  %v5670_v62 = vld [vmem:[%s8597_s10 + $0x14] sm:$0xf]  ;;  %v5000_v63 = vor.u32 %v5733_v54, %v4997_v56  ;;  %v5059_v56 = vld [vmem:[%s8597_s10 + $0x280] sm:$0xf] }
 0x335   :  { %3476 = vmatpush.bf16.msra.mxu1 %v5276_v4  ;;  %v5252_v4 = vor.u32 %v5796_v58, %v5249_v59  ;;  %v4748_v48 = vor.u32 %v5670_v62, %v4745_v0  ;;  %v5751_v58 = vld [vmem:[%s8597_s10 + $0x298] sm:$0xf0]  ;;  %v5283_v59 = vld [vmem:[%s8597_s10 + $0x440] sm:$0xf]  ;;  %v5681_v62 = vld [vmem:[%s8597_s10 + $0x68] sm:$0xf0] }
 0x336   :  { %3513 = vmatpush.bf16.msra.mxu3 %v5112_v8  ;;  %v5395_v8 = vld [vmem:[%s8597_s10 + $0x520] sm:$0xf]  ;;  %v5031_v0 = vld [vmem:[%s8597_s10 + $0x248] sm:$0xf] }
 0x337   :  { %3500 = vmatpush.bf16.msrb.mxu2 %v4888_v5  ;;  %v5171_v5 = vld [vmem:[%s8597_s10 + $0x360] sm:$0xf] }
 0x338   :  { %3525 = vmatpush.bf16.msra.mxu0 %v5364_v47  ;;  %v4920_v47 = vor.u32 %v5716_v61, %v4919_v46  ;;  %v5172_v12 = vor.u32 %v5779_v6, %v5171_v5  ;;  %v5060_v46 = vor.u32 %v5751_v58, %v5059_v56  ;;  %v4779_v61 = vld [vmem:[%s8597_s10 + $0x50] sm:$0xf]  ;;  %v5032_v6 = vor.u32 %v5744_v2, %v5031_v0 }
 0x339   :  { %3477 = vmatpush.bf16.msra.mxu1 %v5248_v14  ;;  %v5709_v14 = vld [vmem:[%s8597_s10 + $0x148] sm:$0xf0]  ;;  %v4780_v5 = vor.u32 %v5681_v62, %v4779_v61 }
 0x33a   :  { %3514 = vmatpush.bf16.msra.mxu3 %v5084_v7  ;;  %5429 = vmatmul.msk.bf16.vlgmr.msra.gmra.mxu2 %vm1247_vm0, %v7822_v17  ;;  %v5143_v7 = vld [vmem:[%s8597_s10 + $0x328] sm:$0xf]  ;;  %v4892_v25 = vor.u32 %v5709_v14, %v4891_v13 }
 0x33b   :  { %3501 = vmatpush.bf16.msrb.mxu2 %v4860_v15  ;;  %v5396_v15 = vor.u32 %v5835_v9, %v5395_v8  ;;  %v4751_v8 = vld [vmem:[%s8597_s10 + $0x18] sm:$0xf]  ;;  %v5674_v9 = vld [vmem:[%s8597_s10 + $0x30] sm:$0xf0] }
 0x33c   :  { %3526 = vmatpush.bf16.msra.mxu0 %v5336_v23  ;;  %v5782_v23 = vld [vmem:[%s8597_s10 + $0x394] sm:$0xf] }
 0x33d   :  { %3478 = vmatpush.bf16.msra.mxu1 %v5220_v57  ;;  %v5144_v57 = vor.u32 %v5772_v19, %v5143_v7  ;;  %v5199_v7 = vld [vmem:[%s8597_s10 + $0x398] sm:$0xf]  ;;  %v5786_v19 = vld [vmem:[%s8597_s10 + $0x3b0] sm:$0xf0] }
 0x33e   :  { %3515 = vmatpush.bf16.msra.mxu3 %v5056_v29  ;;  %v5196_v29 = vor.u32 %v5782_v23, %v5193_v24  ;;  %v5200_v22 = vor.u32 %v5786_v19, %v5199_v7 }
 0x33f   :  { %3502 = vmatpush.bf16.msrb.mxu2 %v4832_v27  ;;  %v4863_v27 = vld [vmem:[%s8597_s10 + $0xf8] sm:$0xf] }
 0x340   :  { %3527 = vmatpush.bf16.msra.mxu0 %v5308_v33  ;;  %v5821_v33 = vld [vmem:[%s8597_s10 + $0x4c8] sm:$0xf0]  ;;  %v4864_v36 = vor.u32 %v5702_v30, %v4863_v27 }
 0x341   :  { %3479 = vmatpush.bf16.msra.mxu1 %v5192_v39  ;;  %v5340_v39 = vor.u32 %v5821_v33, %v5339_v35 }
 0x342   :  { %3516 = vmatpush.bf16.msra.mxu3 %v5028_v42  ;;  %v5311_v42 = vld [vmem:[%s8597_s10 + $0x478] sm:$0xf] }
 0x343   :  { %3503 = vmatpush.bf16.msrb.mxu2 %v4804_v40  ;;  %v5087_v40 = vld [vmem:[%s8597_s10 + $0x2b8] sm:$0xf] }
 0x344   :  { %3528 = vmatpush.bf16.msra.mxu0 %v5280_v52  ;;  %3480 = vmatmul.bf16.vlgmr.msra.gmra.mxu1 %v7785_v53  ;;  %v5088_v49 = vor.u32 %v5758_v41, %v5087_v40  ;;  %v5688_v52 = vld [vmem:[%s8597_s10 + $0xa0] sm:$0xf0] }
 0x345   :  { %3544 = vmatpush.bf16.msrb.mxu1 %v5420_v43  ;;  %v5814_v43 = vld [vmem:[%s8597_s10 + $0x490] sm:$0xf0] }
 0x346   :  { %3517 = vmatpush.bf16.msra.mxu3 %v5000_v63  ;;  %v5312_v54 = vor.u32 %v5814_v43, %v5311_v42 }
 0x347   :  { %3504 = vmatpush.bf16.msrb.mxu2 %v4776_v60  ;;  %v4808_v60 = vor.u32 %v5688_v52, %v4807_v50 }
 0x348   :  { %3529 = vmatpush.bf16.msra.mxu0 %v5252_v4  ;;  %v5800_v4 = vld [vmem:[%s8597_s10 + $0x420] sm:$0xf0] }
 0x349   :  { %3550 = vmatpush.bf16.msra.mxu1 %v4948_v45  ;;  %v5807_v45 = vld [vmem:[%s8597_s10 + $0x458] sm:$0xf0]  ;;  %v5256_v10 = vor.u32 %v5800_v4, %v5255_v3 }
 0x34a   :  { %3518 = vmatpush.bf16.msra.mxu3 %v4972_v55  ;;  %v5284_v63 = vor.u32 %v5807_v45, %v5283_v59  ;;  %v5793_v55 = vld [vmem:[%s8597_s10 + $0x3e8] sm:$0xf0] }
 0x34b   :  { %3505 = vmatpush.bf16.msrb.mxu2 %v4748_v48  ;;  %v5227_v48 = vld [vmem:[%s8597_s10 + $0x3d0] sm:$0xf] }
 0x34c   :  { %3530 = vmatpush.bf16.msra.mxu0 %v5224_v16  ;;  %v5228_v14 = vor.u32 %v5793_v55, %v5227_v48  ;;  %v5730_v16 = vld [vmem:[%s8597_s10 + $0x1f0] sm:$0xf0] }
 0x34d   :  { %3551 = vmatpush.bf16.msra.mxu1 %v4920_v47  ;;  %3519 = vmatmul.bf16.vlgmr.msra.gmra.mxu3 %v7782_v1  ;;  %v5737_v47 = vld [vmem:[%s8597_s10 + $0x228] sm:$0xf0] }
 0x34e   :  { %3576 = vmatpush.bf16.msrb.mxu3 %v5396_v15  ;;  %3506 = vmatmul.bf16.vlgmr.msrb.gmra.mxu2 %v7814_v21  ;;  %v5004_v13 = vor.u32 %v5737_v47, %v5003_v11  ;;  %v4975_v15 = vld [vmem:[%s8597_s10 + $0x1d8] sm:$0xf] }
 0x34f   :  { %3563 = vmatpush.bf16.msra.mxu2 %v5172_v12  ;;  %v4752_v12 = vor.u32 %v5674_v9, %v4751_v8  ;;  %v4976_v20 = vor.u32 %v5730_v16, %v4975_v15 }
 0x350   :  { %3531 = vmatpush.bf16.msra.mxu0 %v5196_v29 }
 0x351   :  { %3552 = vmatpush.bf16.msra.mxu1 %v4892_v25  ;;  %v8568_v25 = vld [vmem:[%s8598_s11] sm:$0x7f]  ;;  %s5960_s11 = smov [#allocation4]  }
 0x352   :  { %3577 = vmatpush.bf16.msrb.mxu3 %v5368_v28  ;;  %v2321_v51 = vperm.slane %v8568_v25, 0  ;;  %v2323_v59 = vperm.slane %v8568_v25, 2  ;;  %s3764_s1 = sshll.u32 %s5960_s11, 4  ;;  %s3765_s1 = int_to_ptr.vmem [resolvable:$true] %s3764_s1 }
 0x353   :  { %3564 = vmatpush.bf16.msra.mxu2 %v5144_v57  ;;  %3532 = vmatmul.bf16.vlgmr.msra.gmra.mxu0 %v7785_v53  ;;  %3769 = dma.vmem_to_hbm [thread:$0]  %s3765_s1, 128, %s3767_s2, [#allocation5]  }
 0x354   :  { %3596 = vmatpush.bf16.msrb.mxu0 %v5424_v34  ;;  %5430 = vmatmul.msk.bf16.vlgmr.msrb.gmra.mxu1 %vm1247_vm0, %v7822_v17  ;;  %3780 = dma.vmem_to_hbm [thread:$0]  %s3776_s13, 128, %s3778_s30, [#allocation5]  }
 0x355   :  { %3553 = vmatpush.bf16.msra.mxu1 %v4864_v36  ;;  %v2322_v36 = vperm.slane %v8568_v25, 1 }
 0x356   :  { %3578 = vmatpush.bf16.msrb.mxu3 %v5340_v39 }
 0x357   :  { %3565 = vmatpush.bf16.msra.mxu2 %v5116_v18 }
 0x359   :  { %3554 = vmatpush.bf16.msra.mxu1 %v4836_v44 }
 0x35a   :  { %3579 = vmatpush.bf16.msrb.mxu3 %v5312_v54 }
 0x35b   :  { %3566 = vmatpush.bf16.msra.mxu2 %v5088_v49 }
 0x35d   :  { %3555 = vmatpush.bf16.msra.mxu1 %v4808_v60 }
 0x35e   :  { %3580 = vmatpush.bf16.msrb.mxu3 %v5284_v63 }
 0x35f   :  { %3567 = vmatpush.bf16.msra.mxu2 %v5060_v46 }
 0x360   :  { %v3260_v23 = vpop.f32.mrf.mxu0 }
 0x361   :  { %3556 = vmatpush.bf16.msra.mxu1 %v4780_v5  ;;  %v3273_v24 = vpop.f32.mrf.mxu1 }
 0x362   :  { %3581 = vmatpush.bf16.msrb.mxu3 %v5256_v10 }
 0x363   :  { %3568 = vmatpush.bf16.msra.mxu2 %v5032_v6  ;;  %5431 = vmatmul.msk.bf16.vlgmr.msrb.gmra.mxu0 %vm1247_vm0, %v7822_v17 }
 0x365   :  { %3557 = vmatpush.bf16.msra.mxu1 %v4752_v12 }
 0x366   :  { %3582 = vmatpush.bf16.msrb.mxu3 %v5228_v14 }
 0x367   :  { %3569 = vmatpush.bf16.msra.mxu2 %v5004_v13 }
 0x368   :  { %3558 = vmatmul.bf16.vlgmr.msra.gmra.mxu1 %v7814_v21  ;;  %v3262_v26 = vpop.f32.mrf.mxu0 }
 0x369   :  { %v3275_v17 = vpop.f32.mrf.mxu1 }
 0x36a   :  { %3583 = vmatpush.bf16.msrb.mxu3 %v5200_v22 }
 0x36b   :  { %3570 = vmatpush.bf16.msra.mxu2 %v4976_v20 }
 0x36c   :  { %v3247_v57 = vpop.f32.mrf.mxu3 }
 0x36d   :  { %3584 = vmatmul.bf16.vlgmr.msrb.gmra.mxu3 %v7785_v53  ;;  %v3248_v27 = vadd.f32 %v3247_v57, %v2321_v51  ;;  %v3286_v21 = vpop.f32.mrf.mxu2 }
 0x36e   :  { %3571 = vmatmul.bf16.vlgmr.msra.gmra.mxu2 %v7782_v1 }
 0x36f   :  { %v3261_v30 = vadd.f32 %v3260_v23, %v3248_v27 }
 0x370   :  { %v3325_v28 = vpop.f32.mrf.mxu0 }
 0x371   :  { %v3274_v29 = vadd.f32 %v3273_v24, %v3261_v30  ;;  %v3338_v31 = vpop.f32.mrf.mxu1 }
 0x373   :  { %v3287_v32 = vadd.f32 %v3286_v21, %v3274_v29 }
 0x374   :  { %v3249_v1 = vpop.f32.mrf.mxu3 }
 0x375   :  { %v5432_v35 = vmul.f32 -1.442695, %v3287_v32  ;;  %v3288_v53 = vpop.f32.mrf.mxu2 }
 0x377   :  { %5853 = vpow2.f32 %v5432_v35 }
 0x378   :  { %v3327_v33 = vpop.f32.mrf.mxu0 }
 0x379   :  { %v3340_v34 = vpop.f32.mrf.mxu1 }
 0x37c   :  { %v3312_v18 = vpop.f32.mrf.mxu3 }
 0x37d   :  { %v5854_v37 = vpop.eup %5853  ;;  %v3299_v38 = vpop.f32.mrf.mxu2 }
 0x37e   :  { %v3623_v39 = vadd.f32 1.0, %v5854_v37  ;;  %v3300_v40 = vadd.f32 %v3299_v38, %v2322_v36 }
 0x380   :  { %5855 = vrcp.f32 %v3623_v39  ;;  %v3390_v41 = vpop.f32.mrf.mxu0  ;;  %v3313_v42 = vadd.f32 %v3312_v18, %v3300_v40  ;;  %v3641_v61 = vand.u32 2147483648, %v3623_v39  ;;  %v3639_v63 = vand.u32 2147483647, %v3623_v39 }
 0x381   :  { %v3351_v43 = vpop.f32.mrf.mxu1  ;;  %vm3635_vm7 = vweird.f32 %v3623_v39 }
 0x382   :  { %v3326_v44 = vadd.f32 %v3325_v28, %v3313_v42  ;;  %v3352_v0 = vadd.f32 %v3351_v43, %v2323_v59  ;;  %v3642_v5 = vor.u32 1.1754944e-38, %v3641_v61  ;;  %vm3640_vm9 = vcmp.eq.f32.partialorder %v3639_v63, 8.507059e+37 }
 0x383   :  { %v2324_v28 = vperm.slane %v8568_v25, 3 }
 0x384   :  { %v3314_v49 = vpop.f32.mrf.mxu3  ;;  %v3339_v50 = vadd.f32 %v3338_v31, %v3326_v44 }
 0x385   :  { %v3301_v52 = vpop.f32.mrf.mxu2 }
 0x386   :  { %v5856_v54 = vpop.eup %5855  ;;  %v5433_v58 = vmul.f32 -1.442695, %v3339_v50 }
 0x387   :  { %v3631_v56 = vmul.f32 %v5856_v54, %v3623_v39  ;;  %vm3636_vm6 = vweird.f32 %v5856_v54 }
 0x388   :  { %v3392_v45 = vpop.f32.mrf.mxu0  ;;  %5857 = vpow2.f32 %v5433_v58  ;;  %vm3637_vm8 = vmor %vm3635_vm7, %vm3636_vm6 }
 0x389   :  { %v3632_v60 = vsub.f32 1.0, %v3631_v56  ;;  %v3353_v46 = vpop.f32.mrf.mxu1 }
 0x38b   :  { %v3633_v62 = vmul.f32 %v5856_v54, %v3632_v60 }
 0x38c   :  { %v3377_v2 = vpop.f32.mrf.mxu3 }
 0x38d   :  { %v3634_v3 = vadd.f32 %v5856_v54, %v3633_v62  ;;  %v3364_v4 = vpop.f32.mrf.mxu2 }
 0x38e   :  { %v3365_v6 = vadd.f32 %v3364_v4, %v3352_v0  ;;  %v5858_v8 = vpop.eup %5857 }
 0x38f   :  { %v3638_v9 = vsel %vm3637_vm8, %v5856_v54, %v3634_v3  ;;  %v3624_v11 = vadd.f32 1.0, %v5858_v8  ;;  %v2325_v54 = vperm.slane %v8568_v25, 4 }
 0x390   :  { %v3643_v10 = vsel %vm3640_vm9, %v3642_v5, %v3638_v9  ;;  %v3378_v47 = vadd.f32 %v3377_v2, %v3365_v6  ;;  %v3403_v48 = vpop.f32.mrf.mxu0 }
 0x391   :  { %3735 = vst [vmem:[#allocation2] sm:$0xff] %v3643_v10  ;;  %5859 = vrcp.f32 %v3624_v11  ;;  %v3656_v20 = vand.u32 2147483648, %v3624_v11  ;;  %v3654_v26 = vand.u32 2147483647, %v3624_v11  ;;  %vm3650_vm11 = vweird.f32 %v3624_v11 }
 0x392   :  { %v3391_v55 = vadd.f32 %v3390_v41, %v3378_v47  ;;  %v3404_v35 = vadd.f32 %v3403_v48, %v2324_v28  ;;  %v2326_v48 = vperm.slane %v8568_v25, 5 }
 0x393   :  { %v3657_v27 = vor.u32 1.1754944e-38, %v3656_v20  ;;  %vm3655_vm13 = vcmp.eq.f32.partialorder %v3654_v26, 8.507059e+37 }
 0x394   :  { %v3379_v12 = vpop.f32.mrf.mxu3  ;;  %v5434_v13 = vmul.f32 -1.442695, %v3391_v55 }
 0x395   :  { %v3366_v14 = vpop.f32.mrf.mxu2 }
 0x396   :  { %5861 = vpow2.f32 %v5434_v13 }
 0x397   :  { %v5860_v15 = vpop.eup %5859 }
 0x398   :  { %v3405_v16 = vpop.f32.mrf.mxu0  ;;  %v3646_v7 = vmul.f32 %v5860_v15, %v3624_v11  ;;  %vm3651_vm10 = vweird.f32 %v5860_v15 }
 0x399   :  { %vm3652_vm12 = vmor %vm3650_vm11, %vm3651_vm10 }
 0x39a   :  { %v3647_v19 = vsub.f32 1.0, %v3646_v7 }
 0x39c   :  { %v3442_v22 = vpop.f32.mrf.mxu3  ;;  %v5862_v23 = vpop.eup %5861  ;;  %v3648_v24 = vmul.f32 %v5860_v15, %v3647_v19 }
 0x39d   :  { %v3625_v17 = vadd.f32 1.0, %v5862_v23 }
 0x39e   :  { %v3649_v57 = vadd.f32 %v5860_v15, %v3648_v24 }
 0x39f   :  { %5863 = vrcp.f32 %v3625_v17  ;;  %v3671_v34 = vand.u32 2147483648, %v3625_v17  ;;  %v3669_v37 = vand.u32 2147483647, %v3625_v17  ;;  %vm3665_vm15 = vweird.f32 %v3625_v17 }
 0x3a0   :  { %v3653_v21 = vsel %vm3652_vm12, %v5860_v15, %v3649_v57 }
 0x3a1   :  { %v3416_v51 = vpop.f32.mrf.mxu1  ;;  %v3658_v30 = vsel %vm3655_vm13, %v3657_v27, %v3653_v21  ;;  %v3672_v42 = vor.u32 1.1754944e-38, %v3671_v34  ;;  %vm3670_vm2 = vcmp.eq.f32.partialorder %v3669_v37, 8.507059e+37 }
 0x3a2   :  { %3736 = vst [vmem:[#allocation2 + $0x8] sm:$0xff] %v3658_v30  ;;  %v3417_v33 = vadd.f32 %v3416_v51, %v3404_v35 }
 0x3a4   :  { %v3444_v29 = vpop.f32.mrf.mxu3 }
 0x3a5   :  { %v5864_v31 = vpop.eup %5863 }
 0x3a6   :  { %v3661_v1 = vmul.f32 %v5864_v31, %v3625_v17  ;;  %vm3666_vm14 = vweird.f32 %v5864_v31 }
 0x3a7   :  { %vm3667_vm1 = vmor %vm3665_vm15, %vm3666_vm14 }
 0x3a8   :  { %v3662_v53 = vsub.f32 1.0, %v3661_v1 }
 0x3a9   :  { %v3418_v32 = vpop.f32.mrf.mxu1 }
 0x3aa   :  { %v3663_v18 = vmul.f32 %v5864_v31, %v3662_v53 }
 0x3ac   :  { %v3664_v39 = vadd.f32 %v5864_v31, %v3663_v18 }
 0x3ad   :  { %v3429_v36 = vpop.f32.mrf.mxu2 }
 0x3ae   :  { %v3430_v38 = vadd.f32 %v3429_v36, %v3417_v33  ;;  %v3668_v44 = vsel %vm3667_vm1, %v5864_v31, %v3664_v39  ;;  %v2327_v39 = vperm.slane %v8568_v25, 6 }
 0x3af   :  { %v3673_v50 = vsel %vm3670_vm2, %v3672_v42, %v3668_v44 }
 0x3b0   :  { %v3443_v40 = vadd.f32 %v3442_v22, %v3430_v38  ;;  %v3455_v41 = vpop.f32.mrf.mxu3  ;;  %v3468_v43 = vpop.f32.mrf.mxu0  ;;  %3737 = vst [vmem:[#allocation2 + $0x10] sm:$0xff] %v3673_v50 }
 0x3b1   :  { %v3456_v45 = vadd.f32 %v3455_v41, %v2325_v54 }
 0x3b2   :  { %v5435_v49 = vmul.f32 -1.442695, %v3443_v40 }
 0x3b3   :  { %v3469_v61 = vadd.f32 %v3468_v43, %v3456_v45 }
 0x3b4   :  { %5865 = vpow2.f32 %v5435_v49 }
 0x3b5   :  { %v3431_v52 = vpop.f32.mrf.mxu2 }
 0x3b8   :  { %v3457_v56 = vpop.f32.mrf.mxu3  ;;  %v3470_v58 = vpop.f32.mrf.mxu0 }
 0x3ba   :  { %v5866_v59 = vpop.eup %5865 }
 0x3bb   :  { %v3626_v60 = vadd.f32 1.0, %v5866_v59 }
 0x3bd   :  { %5867 = vrcp.f32 %v3626_v60  ;;  %v3494_v46 = vpop.f32.mrf.mxu2  ;;  %v3686_v8 = vand.u32 2147483648, %v3626_v60  ;;  %v3684_v11 = vand.u32 2147483647, %v3626_v60  ;;  %vm3680_vm4 = vweird.f32 %v3626_v60 }
 0x3bf   :  { %v3687_v55 = vor.u32 1.1754944e-38, %v3686_v8  ;;  %vm3685_vm6 = vcmp.eq.f32.partialorder %v3684_v11, 8.507059e+37 }
 0x3c1   :  { %v3481_v62 = vpop.f32.mrf.mxu1 }
 0x3c2   :  { %v3482_v63 = vadd.f32 %v3481_v62, %v3469_v61 }
 0x3c3   :  { %v5868_v2 = vpop.eup %5867 }
 0x3c4   :  { %v3495_v0 = vadd.f32 %v3494_v46, %v3482_v63  ;;  %v3676_v3 = vmul.f32 %v5868_v2, %v3626_v60  ;;  %vm3681_vm3 = vweird.f32 %v5868_v2 }
 0x3c5   :  { %v3496_v5 = vpop.f32.mrf.mxu2  ;;  %vm3682_vm5 = vmor %vm3680_vm4, %vm3681_vm3 }
 0x3c6   :  { %v5436_v4 = vmul.f32 -1.442695, %v3495_v0  ;;  %v3677_v6 = vsub.f32 1.0, %v3676_v3 }
 0x3c8   :  { %5869 = vpow2.f32 %v5436_v4  ;;  %v3678_v10 = vmul.f32 %v5868_v2, %v3677_v6 }
 0x3c9   :  { %v3483_v9 = vpop.f32.mrf.mxu1 }
 0x3ca   :  { %v3679_v47 = vadd.f32 %v5868_v2, %v3678_v10 }
 0x3cc   :  { %v3683_v13 = vsel %vm3682_vm5, %v5868_v2, %v3679_v47 }
 0x3cd   :  { %v3688_v7 = vsel %vm3685_vm6, %v3687_v55, %v3683_v13 }
 0x3ce   :  { %v5870_v12 = vpop.eup %5869  ;;  %3738 = vst [vmem:[#allocation2 + $0x18] sm:$0xff] %v3688_v7 }
 0x3cf   :  { %v3627_v14 = vadd.f32 1.0, %v5870_v12 }
 0x3d0   :  { %v3533_v16 = vpop.f32.mrf.mxu0  ;;  %v3520_v20 = vpop.f32.mrf.mxu3 }
 0x3d1   :  { %v3507_v15 = vpop.f32.mrf.mxu2  ;;  %5871 = vrcp.f32 %v3627_v14  ;;  %v3546_v22 = vpop.f32.mrf.mxu1  ;;  %v3701_v31 = vand.u32 2147483648, %v3627_v14  ;;  %v3699_v1 = vand.u32 2147483647, %v3627_v14  ;;  %vm3695_vm8 = vweird.f32 %v3627_v14 }
 0x3d2   :  { %v3508_v19 = vadd.f32 %v3507_v15, %v2326_v48 }
 0x3d3   :  { %v3702_v53 = vor.u32 1.1754944e-38, %v3701_v31  ;;  %vm3700_vm10 = vcmp.eq.f32.partialorder %v3699_v1, 8.507059e+37 }
 0x3d4   :  { %v3521_v23 = vadd.f32 %v3520_v20, %v3508_v19 }
 0x3d6   :  { %v3534_v24 = vadd.f32 %v3533_v16, %v3521_v23 }
 0x3d7   :  { %v5872_v17 = vpop.eup %5871 }
 0x3d8   :  { %v3547_v26 = vadd.f32 %v3546_v22, %v3534_v24  ;;  %v3535_v57 = vpop.f32.mrf.mxu0  ;;  %v3691_v27 = vmul.f32 %v5872_v17, %v3627_v14  ;;  %v3522_v30 = vpop.f32.mrf.mxu3  ;;  %vm3696_vm7 = vweird.f32 %v5872_v17 }
 0x3d9   :  { %v3509_v51 = vpop.f32.mrf.mxu2  ;;  %v3548_v28 = vpop.f32.mrf.mxu1  ;;  %vm3697_vm9 = vmor %vm3695_vm8, %vm3696_vm7 }
 0x3da   :  { %v5437_v21 = vmul.f32 -1.442695, %v3547_v26  ;;  %v3692_v29 = vsub.f32 1.0, %v3691_v27 }
 0x3dc   :  { %5873 = vpow2.f32 %v5437_v21  ;;  %v3693_v32 = vmul.f32 %v5872_v17, %v3692_v29 }
 0x3de   :  { %v3694_v35 = vadd.f32 %v5872_v17, %v3693_v32 }
 0x3e0   :  { %v3598_v33 = vpop.f32.mrf.mxu0  ;;  %v3698_v36 = vsel %vm3697_vm9, %v5872_v17, %v3694_v35 }
 0x3e1   :  { %v3703_v38 = vsel %vm3700_vm10, %v3702_v53, %v3698_v36 }
 0x3e2   :  { %v5874_v34 = vpop.eup %5873  ;;  %3739 = vst [vmem:[#allocation2 + $0x20] sm:$0xff] %v3703_v38 }
 0x3e3   :  { %v3628_v18 = vadd.f32 1.0, %v5874_v34 }
 0x3e5   :  { %v3559_v37 = vpop.f32.mrf.mxu1  ;;  %5875 = vrcp.f32 %v3628_v18  ;;  %v3716_v52 = vand.u32 2147483648, %v3628_v18  ;;  %v3714_v59 = vand.u32 2147483647, %v3628_v18  ;;  %vm3710_vm12 = vweird.f32 %v3628_v18 }
 0x3e6   :  { %v3560_v44 = vadd.f32 %v3559_v37, %v2327_v39 }
 0x3e7   :  { %v3717_v46 = vor.u32 1.1754944e-38, %v3716_v52  ;;  %vm3715_vm14 = vcmp.eq.f32.partialorder %v3714_v59, 8.507059e+37 }
 0x3e8   :  { %v3600_v40 = vpop.f32.mrf.mxu0 }
 0x3eb   :  { %v5876_v41 = vpop.eup %5875 }
 0x3ec   :  { %v3706_v43 = vmul.f32 %v5876_v41, %v3628_v18  ;;  %vm3711_vm11 = vweird.f32 %v5876_v41 }
 0x3ed   :  { %v3561_v42 = vpop.f32.mrf.mxu1  ;;  %vm3712_vm13 = vmor %vm3710_vm12, %vm3711_vm11 }
 0x3ee   :  { %v3707_v49 = vsub.f32 1.0, %v3706_v43 }
 0x3f0   :  { %v3585_v56 = vpop.f32.mrf.mxu3  ;;  %v3708_v58 = vmul.f32 %v5876_v41, %v3707_v49 }
 0x3f1   :  { %v3572_v50 = vpop.f32.mrf.mxu2 }
 0x3f2   :  { %v3573_v54 = vadd.f32 %v3572_v50, %v3560_v44  ;;  %v3709_v60 = vadd.f32 %v5876_v41, %v3708_v58 }
 0x3f4   :  { %v3586_v45 = vadd.f32 %v3585_v56, %v3573_v54  ;;  %v3713_v25 = vsel %vm3712_vm13, %v5876_v41, %v3709_v60 }
 0x3f5   :  { %v3718_v62 = vsel %vm3715_vm14, %v3717_v46, %v3713_v25 }
 0x3f6   :  { %v3599_v61 = vadd.f32 %v3598_v33, %v3586_v45  ;;  %3740 = vst [vmem:[#allocation2 + $0x28] sm:$0xff] %v3718_v62 }
 0x3f8   :  { %v5438_v63 = vmul.f32 -1.442695, %v3599_v61  ;;  %v3587_v2 = vpop.f32.mrf.mxu3 }
 0x3f9   :  { %v3574_v0 = vpop.f32.mrf.mxu2 }
 0x3fa   :  { %5877 = vpow2.f32 %v5438_v63 }
 0x400   :  { %v5878_v3 = vpop.eup %5877 }
 0x401   :  { %v3629_v4 = vadd.f32 1.0, %v5878_v3 }
 0x403   :  { %5879 = vrcp.f32 %v3629_v4  ;;  %v3731_v9 = vand.u32 2147483648, %v3629_v4  ;;  %v3729_v11 = vand.u32 2147483647, %v3629_v4  ;;  %vm3725_vm1 = vweird.f32 %v3629_v4 }
 0x405   :  { %v3732_v48 = vor.u32 1.1754944e-38, %v3731_v9  ;;  %vm3730_vm3 = vcmp.eq.f32.partialorder %v3729_v11, 8.507059e+37 }
 0x409   :  { %v5880_v5 = vpop.eup %5879 }
 0x40a   :  { %v3721_v6 = vmul.f32 %v5880_v5, %v3629_v4  ;;  %vm3726_vm15 = vweird.f32 %v5880_v5 }
 0x40b   :  { %vm3727_vm2 = vmor %vm3725_vm1, %vm3726_vm15 }
 0x40c   :  { %v3722_v8 = vsub.f32 1.0, %v3721_v6 }
 0x40e   :  { %v3723_v10 = vmul.f32 %v5880_v5, %v3722_v8 }
 0x410   :  { %v3724_v47 = vadd.f32 %v5880_v5, %v3723_v10 }
 0x412   :  { %v3728_v55 = vsel %vm3727_vm2, %v5880_v5, %v3724_v47 }
 0x413   :  { %v3733_v12 = vsel %vm3730_vm3, %v3732_v48, %v3728_v55 }
 0x414   :  { %3741 = vst.msk [vmem:[#allocation2 + $0x30] sm:$0xff] %vm1247_vm0, %v3733_v12 }
 0x415   :  { %3758 = dma.vmem_to_hbm [thread:$0]  %s3754_s15, 896, %s3756_s18, [#allocation3]  }
 0x416   :  { %5953 = dma.done.wait [#allocation3], 896  }
 0x417   :  { %5954 = vsyncadd [#allocation3], 4294966400 }
 0x418   :  { %5955 = dma.done.wait [#allocation5], 256  }
 0x419   :  { %5956 = vsyncadd [#allocation5], 4294967040 }
 0x41a   :  { %3793 = vsyncpa [#allocation3], 1 }
 0x41b   :  { %3794 = vsyncpa [#allocation5], 1 }

</bundles_post_ra>
